<compile_context>
chip_gen: v7x
topology: tpu7x:2x2x1
jax: 0.10.0
libtpu: 0.0.40
codegen_flags: <defaults>
</compile_context>

<pallas_src>
import functools

import jax
import jax.numpy as jnp
import numpy as np
from jax.experimental import pallas as pl
from jax.experimental.pallas import tpu as pltpu

LANE = 128


def _round_up(v, m):
    return (v + m - 1) // m * m


def _pick_tile(n, mult, target):
    """Largest divisor of n that is a multiple of `mult` and <= target.

    `n` is padded to a multiple of 128 upstream, so `mult` (16 or 128) always
    divides it and the fallback is valid."""
    t = min(n, target)
    for cand in range(t - t % mult, mult - 1, -mult):
        if n % cand == 0:
            return cand
    return mult


def _default_exp_dtype():
    # bf16 exp rides the EUP's bf16 path on v6e / v7x; <= v5 has no bf16 EUP,
    # so keep the exponent fp32 there.
    try:
        kind = jax.devices()[0].device_kind.lower()
    except Exception:
        return jnp.float32
    for old in ("v2", "v3", "v4", "v5"):
        if old in kind:
            return jnp.float32
    return jnp.bfloat16


def _spat_attn_kernel(xq_ref, xk_ref, mqk_ref, u_ref, wv_ref, bv_ref,
                      o_ref, qm_sc, m_sc, l_sc, acc_sc,
                      *, n_keys, tile_k, mask_keys, exp_dtype):
    ki = pl.program_id(2)
    cdt = mqk_ref.dtype                   # matmul compute dtype (bf16)

    @pl.when(ki == 0)
    def _init():
        # Folded query projection qm = xq @ (Wq^T Wk), once per (batch, q-tile);
        # stashed in bf16 for the per-key-tile NT matmul.
        qm = jnp.dot(xq_ref[0], mqk_ref[...], preferred_element_type=jnp.float32)
        qm_sc[...] = qm.astype(qm_sc.dtype)
        m_sc[...] = jnp.full(m_sc.shape, -jnp.inf, m_sc.dtype)
        l_sc[...] = jnp.zeros(l_sc.shape, l_sc.dtype)
        acc_sc[...] = jnp.zeros(acc_sc.shape, acc_sc.dtype)

    xk = xk_ref[0]                                                   # (TK, Cp) bf16

    # Value projection for this key tile (1x1 conv == channel matmul).  No bias
    # here: softmax rows sum to 1, so bv is added exactly once in finalize.
    v = jnp.dot(xk, wv_ref[...], preferred_element_type=jnp.float32).astype(cdt)

    # Energy tile: (x_i M)·x_j + (Wk^T bq)·x_j.  NT contraction — no explicit
    # transpose of the key tile.
    s = jax.lax.dot_general(
        qm_sc[...], xk,
        dimension_numbers=(((1,), (1,)), ((), ())),
        preferred_element_type=jnp.float32)                          # (TQ, TK)
    kb = jax.lax.dot_general(
        u_ref[...], xk,
        dimension_numbers=(((1,), (1,)), ((), ())),
        preferred_element_type=jnp.float32)                          # (1, TK)
    s = s + kb

    if mask_keys:   # static: only when N was padded up to a multiple of 128
        key_idx = ki * tile_k + jax.lax.broadcasted_iota(jnp.int32, (1, tile_k), 1)
        s = jnp.where(key_idx < n_keys, s, -jnp.inf)

    # Online softmax update (unnormalized).  fp32 state; exp in exp_dtype
    # (bf16 on v6e/v7x), row sum always accumulated in fp32.
    m_prev = m_sc[...]
    m_new = jnp.maximum(m_prev, jnp.max(s, axis=-1, keepdims=True))
    alpha = jnp.exp(m_prev - m_new)
    p = jnp.exp((s - m_new).astype(exp_dtype))                       # (TQ, TK)
    l_sc[...] = alpha * l_sc[...] + jnp.sum(p, axis=-1, keepdims=True,
                                            dtype=jnp.float32)
    acc_sc[...] = alpha * acc_sc[...] + jnp.dot(
        p.astype(cdt), v, preferred_element_type=jnp.float32)        # (TQ, Cp)
    m_sc[...] = m_new

    @pl.when(ki == pl.num_programs(2) - 1)
    def _finalize():
        # approx reciprocal = EUP slot; ~1e-3 relative error on the softmax
        # denominator, well under the layer's bf16 noise floor.
        inv_l = pl.reciprocal(l_sc[...], approx=True)
        out = acc_sc[...] * inv_l + bv_ref[...]
        o_ref[0] = out.astype(o_ref.dtype)


def spat_attn_pallas(x_nchw, wq, bq, wk, bk, wv, bv, gamma,
                     *, tq=None, tk=None, compute_dtype=jnp.bfloat16,
                     exp_dtype=None):
    """x_nchw: (B, C, H, W).  wq/wk: (Cr, C, 1, 1), wv: (C, C, 1, 1).

    Note: `bk` (key_conv bias) provably cancels in the softmax and does not
    affect the forward output; it is accepted for parameter parity only."""
    B, C, H, W = x_nchw.shape
    N = H * W
    Cr = wq.shape[0]

    Cp = _round_up(C, LANE)
    Np = _round_up(N, LANE)          # padded key/query rows are masked / sliced off

    # TK: lane dim of s/p and the p@v contraction depth -> multiple of 128.
    # TQ: bf16 sublane packing -> multiple of 16.
    tq_target = 1024
    if B == 1:                        # keep >= 2 query tiles for v7x megacore
        tq_target = max(16, min(tq_target, Np // 2))
    TQ = tq or _pick_tile(Np, 16, tq_target)
    TK = tk or _pick_tile(Np, 128, 1024)

    if exp_dtype is None:
        exp_dtype = _default_exp_dtype()

    # (B, C, H, W) -> (B, Np, Cp): channels last (lane dim), zero padded.
    x_nc = x_nchw.reshape(B, C, N).transpose(0, 2, 1)                 # fp32
    x_pad = jnp.pad(x_nc, ((0, 0), (0, Np - N), (0, Cp - C))).astype(compute_dtype)

    # Fold Q/K projections: softmax_j is invariant to terms constant in j, so
    # s[i,j] = x_i^T (Wq^T Wk) x_j + (Wk^T bq)·x_j reproduces the reference
    # attention weights exactly (bk and the bq-only / constant terms drop out).
    wq2 = wq.reshape(Cr, C).astype(jnp.float32)
    wk2 = wk.reshape(Cr, C).astype(jnp.float32)
    wv2 = wv.reshape(C, C).astype(jnp.float32)
    m_fold = wq2.T @ wk2                                              # (C, C)
    u_fold = wk2.T @ bq.astype(jnp.float32)                           # (C,)

    mqk_p = jnp.pad(m_fold, ((0, Cp - C), (0, Cp - C))).astype(compute_dtype)
    u_p = jnp.pad(u_fold.reshape(1, C), ((0, 0), (0, Cp - C))).astype(compute_dtype)
    wv_t = jnp.pad(wv2.T, ((0, Cp - C), (0, Cp - C))).astype(compute_dtype)
    bv_p = jnp.pad(bv.reshape(1, C).astype(jnp.float32), ((0, 0), (0, Cp - C)))

    grid = (B, Np // TQ, Np // TK)

    itemsize = jnp.dtype(compute_dtype).itemsize
    n_q_tiles = Np // TQ
    flops = int(2 * B * Cp * (Np * Cp                      # qm projection
                              + n_q_tiles * Np * Cp        # V reprojection / q-tile
                              + 2 * Np * Np))              # s and p@v
    transcendentals = int(B * Np * Np)
    bytes_accessed = int(B * Np * Cp * itemsize            # query stream read
                         + B * n_q_tiles * Np * Cp * itemsize  # key-stream re-reads
                         + B * Np * Cp * itemsize          # bf16 output write
                         + (2 * Cp * Cp + 2 * Cp) * itemsize + Cp * 4)
    cost = pl.CostEstimate(flops=flops, transcendentals=transcendentals,
                           bytes_accessed=bytes_accessed)

    kernel = functools.partial(_spat_attn_kernel,
                               n_keys=N, tile_k=TK,
                               mask_keys=(Np != N),
                               exp_dtype=exp_dtype)

    out = pl.pallas_call(
        kernel,
        out_shape=jax.ShapeDtypeStruct((B, Np, Cp), compute_dtype),
        grid_spec=pltpu.PrefetchScalarGridSpec(
            num_scalar_prefetch=0,
            grid=grid,
            in_specs=[
                pl.BlockSpec((1, TQ, Cp), lambda b, qi, ki: (b, qi, 0)),  # x (query rows)
                pl.BlockSpec((1, TK, Cp), lambda b, qi, ki: (b, ki, 0)),  # x (key rows)
                pl.BlockSpec((Cp, Cp), lambda b, qi, ki: (0, 0)),         # M = Wq^T Wk
                pl.BlockSpec((1, Cp), lambda b, qi, ki: (0, 0)),          # u = Wk^T bq
                pl.BlockSpec((Cp, Cp), lambda b, qi, ki: (0, 0)),         # Wv^T
                pl.BlockSpec((1, Cp), lambda b, qi, ki: (0, 0)),          # bv
            ],
            out_specs=pl.BlockSpec((1, TQ, Cp), lambda b, qi, ki: (b, qi, 0)),
            scratch_shapes=[
                pltpu.VMEM((TQ, Cp), compute_dtype),    # qm = xq @ (Wq^T Wk)
                pltpu.VMEM((TQ, 1), jnp.float32),       # running max
                pltpu.VMEM((TQ, 1), jnp.float32),       # running sum
                pltpu.VMEM((TQ, Cp), jnp.float32),      # output accumulator
            ],
        ),
        compiler_params=pltpu.CompilerParams(
            dimension_semantics=("parallel", "parallel", "arbitrary"),
            # comfortably under v7x's 64 MiB/TC even at TQ = TK = 1024
            vmem_limit_bytes=48 * 1024 * 1024,
        ),
        cost_estimate=cost,
    )(x_pad, x_pad, mqk_p, u_p, wv_t, bv_p)

    # Strip padding, back to NCHW.  gamma*out + x stays fp32 with the original
    # x, so gamma == 0 (the PyTorch init) is an exact identity.
    attn_out = out[:, :N, :C].astype(jnp.float32).transpose(0, 2, 1)
    attn_out = attn_out.reshape(B, C, H, W)
    return gamma.reshape(()).astype(jnp.float32) * attn_out + x_nchw


def spat_attn_ref(x, wq, bq, wk, bk, wv, bv, gamma):
    """Pure-JAX reference mirroring the PyTorch forward."""
    B, C, H, W = x.shape
    N = H * W
    Cr = wq.shape[0]
    xf = x.reshape(B, C, N)
    q = jnp.einsum('bcn,oc->bon', xf, wq.reshape(Cr, C)) + bq[None, :, None]   # (B, Cr, N)
    k = jnp.einsum('bcn,oc->bon', xf, wk.reshape(Cr, C)) + bk[None, :, None]   # (B, Cr, N)
    v = jnp.einsum('bcn,oc->bon', xf, wv.reshape(C, C)) + bv[None, :, None]    # (B, C, N)
    energy = jnp.einsum('bci,bcj->bij', q, k)                                  # (B, N, N)
    attn = jax.nn.softmax(energy, axis=-1)
    out = jnp.einsum('bcj,bij->bci', v, attn)                                  # (B, C, N)
    out = out.reshape(B, C, H, W)
    return gamma.reshape(()) * out + x


if __name__ == "__main__":
    B, C, H, W = 2, 32, 16, 16
    ratio = 8
    Cr = C // ratio

    key = jax.random.PRNGKey(0)
    kx, kwq, kbq, kwk, kbk, kwv, kbv = jax.random.split(key, 7)

    x = jax.random.normal(kx, (B, C, H, W), dtype=jnp.float32)

    # Deterministic parameter init (shapes follow nn.Conv2d(in, out, 1) + gamma).
    wq = jax.random.normal(kwq, (Cr, C, 1, 1), dtype=jnp.float32) * 0.1
    bq = jax.random.normal(kbq, (Cr,), dtype=jnp.float32) * 0.1
    wk = jax.random.normal(kwk, (Cr, C, 1, 1), dtype=jnp.float32) * 0.1
    bk = jax.random.normal(kbk, (Cr,), dtype=jnp.float32) * 0.1
    wv = jax.random.normal(kwv, (C, C, 1, 1), dtype=jnp.float32) * 0.1
    bv = jax.random.normal(kbv, (C,), dtype=jnp.float32) * 0.1
    # Nonzero gamma so the attention path is actually exercised.
    gamma = jnp.array([0.5], dtype=jnp.float32)

    out = spat_attn_pallas(x, wq, bq, wk, bk, wv, bv, gamma)
    out = jax.block_until_ready(out)

    ref = spat_attn_ref(x, wq, bq, wk, bk, wv, bv, gamma)
    # bf16 matmul operands / bf16 exp -> loosened (but still meaningful) tolerance.
    np.testing.assert_allclose(np.asarray(out), np.asarray(ref), rtol=3e-2, atol=3e-2)

    # gamma == 0 (the PyTorch module's init) must be an exact fp32 identity.
    out0 = spat_attn_pallas(x, wq, bq, wk, bk, wv, bv, jnp.zeros((1,), jnp.float32))
    out0 = jax.block_until_ready(out0)
    np.testing.assert_array_equal(np.asarray(out0), np.asarray(x))

    print("KERNEL_OK")
</pallas_src>

<mosaic_0001>
module attributes {stable_mosaic.version = 11 : i64} {
  func.func @_spat_attn_kernel(%arg0: i32, %arg1: i32, %arg2: i32, %arg3: memref<1x256x128xbf16, #tpu.memory_space<vmem>>, %arg4: memref<1x256x128xbf16, #tpu.memory_space<vmem>>, %arg5: memref<128x128xbf16, #tpu.memory_space<vmem>>, %arg6: memref<1x128xbf16, #tpu.memory_space<vmem>>, %arg7: memref<128x128xbf16, #tpu.memory_space<vmem>>, %arg8: memref<1x128xf32, #tpu.memory_space<vmem>>, %arg9: memref<1x256x128xbf16, #tpu.memory_space<vmem>>, %arg10: memref<256x128xbf16, #tpu.memory_space<vmem>>, %arg11: memref<256x1xf32, #tpu.memory_space<vmem>>, %arg12: memref<256x1xf32, #tpu.memory_space<vmem>>, %arg13: memref<256x128xf32, #tpu.memory_space<vmem>>) attributes {dimension_semantics = [#tpu.dimension_semantics<parallel>, #tpu.dimension_semantics<parallel>, #tpu.dimension_semantics<arbitrary>], iteration_bounds = array<i64: 2, 1, 1>, scalar_prefetch = 0 : i64, scratch_operands = 4 : i64, tpu.core_type = #tpu.core_type<tc>, window_params = [{transform_indices = @transform_0, window_bounds = array<i64: 1, 256, 128>}, {transform_indices = @transform_1, window_bounds = array<i64: 1, 256, 128>}, {pipeline_mode = #tpu.pipeline_mode<synchronous>, transform_indices = @transform_2, window_bounds = array<i64: 128, 128>}, {pipeline_mode = #tpu.pipeline_mode<synchronous>, transform_indices = @transform_3, window_bounds = array<i64: 1, 128>}, {pipeline_mode = #tpu.pipeline_mode<synchronous>, transform_indices = @transform_4, window_bounds = array<i64: 128, 128>}, {pipeline_mode = #tpu.pipeline_mode<synchronous>, transform_indices = @transform_5, window_bounds = array<i64: 1, 128>}, {transform_indices = @transform_6, window_bounds = array<i64: 1, 256, 128>}]} {
    %c0_i32 = arith.constant 0 : i32
    %0 = arith.cmpi eq, %arg2, %c0_i32 : i32
    %1 = arith.extui %0 : i1 to i32
    %c0_i32_0 = arith.constant 0 : i32
    %2 = arith.cmpi ne, %1, %c0_i32_0 : i32
    scf.if %2 {
      %c0_28 = arith.constant 0 : index
      %c0_29 = arith.constant 0 : index
      %c0_30 = arith.constant 0 : index
      %41 = vector.load %arg3[%c0_28, %c0_29, %c0_30] : memref<1x256x128xbf16, #tpu.memory_space<vmem>>, vector<1x256x128xbf16>
      %42 = vector.shape_cast %41 : vector<1x256x128xbf16> to vector<256x128xbf16>
      %c0_31 = arith.constant 0 : index
      %c0_32 = arith.constant 0 : index
      %43 = vector.load %arg5[%c0_31, %c0_32] : memref<128x128xbf16, #tpu.memory_space<vmem>>, vector<128x128xbf16>
      %cst_33 = arith.constant dense<0.000000e+00> : vector<256x128xf32>
      %44 = tpu.matmul %42, %43, %cst_33 {dimension_numbers = #tpu.dot_dimension_numbers<[1], [0], [0], [1], [0, 0, 1, 1], [], []>} : vector<256x128xbf16>, vector<128x128xbf16>, vector<256x128xf32> -> vector<256x128xf32>
      %45 = arith.truncf %44 : vector<256x128xf32> to vector<256x128xbf16>
      %c0_34 = arith.constant 0 : index
      %c0_35 = arith.constant 0 : index
      %46 = vector.load %arg10[%c0_34, %c0_35] : memref<256x128xbf16, #tpu.memory_space<vmem>>, vector<256x128xbf16>
      tpu.vector_store %arg10[%c0_34, %c0_35], %45 {strides = array<i32>} : memref<256x128xbf16, #tpu.memory_space<vmem>>, vector<256x128xbf16>,
      %cst_36 = arith.constant 0xFF800000 : f32
      %47 = vector.broadcast %cst_36 : f32 to vector<256x1xf32>
      %c0_37 = arith.constant 0 : index
      %c0_38 = arith.constant 0 : index
      %48 = vector.load %arg11[%c0_37, %c0_38] : memref<256x1xf32, #tpu.memory_space<vmem>>, vector<256x1xf32>
      tpu.vector_store %arg11[%c0_37, %c0_38], %47 {strides = array<i32>} : memref<256x1xf32, #tpu.memory_space<vmem>>, vector<256x1xf32>,
      %cst_39 = arith.constant 0.000000e+00 : f32
      %49 = vector.broadcast %cst_39 : f32 to vector<256x1xf32>
      %c0_40 = arith.constant 0 : index
      %c0_41 = arith.constant 0 : index
      %50 = vector.load %arg12[%c0_40, %c0_41] : memref<256x1xf32, #tpu.memory_space<vmem>>, vector<256x1xf32>
      tpu.vector_store %arg12[%c0_40, %c0_41], %49 {strides = array<i32>} : memref<256x1xf32, #tpu.memory_space<vmem>>, vector<256x1xf32>,
      %cst_42 = arith.constant 0.000000e+00 : f32
      %51 = vector.broadcast %cst_42 : f32 to vector<256x128xf32>
      %c0_43 = arith.constant 0 : index
      %c0_44 = arith.constant 0 : index
      %52 = vector.load %arg13[%c0_43, %c0_44] : memref<256x128xf32, #tpu.memory_space<vmem>>, vector<256x128xf32>
      tpu.vector_store %arg13[%c0_43, %c0_44], %51 {strides = array<i32>} : memref<256x128xf32, #tpu.memory_space<vmem>>, vector<256x128xf32>,
    } else {
    }
    %c0 = arith.constant 0 : index
    %c0_1 = arith.constant 0 : index
    %c0_2 = arith.constant 0 : index
    %3 = vector.load %arg4[%c0, %c0_1, %c0_2] : memref<1x256x128xbf16, #tpu.memory_space<vmem>>, vector<1x256x128xbf16>
    %4 = vector.shape_cast %3 : vector<1x256x128xbf16> to vector<256x128xbf16>
    %c0_3 = arith.constant 0 : index
    %c0_4 = arith.constant 0 : index
    %5 = vector.load %arg7[%c0_3, %c0_4] : memref<128x128xbf16, #tpu.memory_space<vmem>>, vector<128x128xbf16>
    %cst = arith.constant dense<0.000000e+00> : vector<256x128xf32>
    %6 = tpu.matmul %4, %5, %cst {dimension_numbers = #tpu.dot_dimension_numbers<[1], [0], [0], [1], [0, 0, 1, 1], [], []>} : vector<256x128xbf16>, vector<128x128xbf16>, vector<256x128xf32> -> vector<256x128xf32>
    %7 = arith.truncf %6 : vector<256x128xf32> to vector<256x128xbf16>
    %c0_5 = arith.constant 0 : index
    %c0_6 = arith.constant 0 : index
    %8 = vector.load %arg10[%c0_5, %c0_6] : memref<256x128xbf16, #tpu.memory_space<vmem>>, vector<256x128xbf16>
    %cst_7 = arith.constant dense<0.000000e+00> : vector<256x256xf32>
    %9 = tpu.matmul %8, %4, %cst_7 {dimension_numbers = #tpu.dot_dimension_numbers<[1], [1], [0], [0], [0, 0, 1, 0], [], []>} : vector<256x128xbf16>, vector<256x128xbf16>, vector<256x256xf32> -> vector<256x256xf32>
    %c0_8 = arith.constant 0 : index
    %c0_9 = arith.constant 0 : index
    %10 = vector.load %arg6[%c0_8, %c0_9] : memref<1x128xbf16, #tpu.memory_space<vmem>>, vector<1x128xbf16>
    %cst_10 = arith.constant dense<0.000000e+00> : vector<1x256xf32>
    %11 = tpu.matmul %10, %4, %cst_10 {dimension_numbers = #tpu.dot_dimension_numbers<[1], [1], [0], [0], [0, 0, 1, 0], [], []>} : vector<1x128xbf16>, vector<256x128xbf16>, vector<1x256xf32> -> vector<1x256xf32>
    %12 = vector.broadcast %11 : vector<1x256xf32> to vector<256x256xf32>
    %13 = arith.addf %9, %12 : vector<256x256xf32>
    %c0_11 = arith.constant 0 : index
    %c0_12 = arith.constant 0 : index
    %14 = vector.load %arg11[%c0_11, %c0_12] : memref<256x1xf32, #tpu.memory_space<vmem>>, vector<256x1xf32>
    %cst_13 = arith.constant dense<0xFF800000> : vector<256xf32>
    %15 = vector.multi_reduction <maximumf>, %13, %cst_13 [1] : vector<256x256xf32> to vector<256xf32>
    %16 = vector.shape_cast %15 : vector<256xf32> to vector<256x1xf32>
    %17 = arith.maximumf %14, %16 : vector<256x1xf32>
    %18 = arith.subf %14, %17 : vector<256x1xf32>
    %19 = math.exp %18 : vector<256x1xf32>
    %20 = vector.broadcast %17 : vector<256x1xf32> to vector<256x256xf32>
    %21 = arith.subf %13, %20 : vector<256x256xf32>
    %22 = arith.truncf %21 : vector<256x256xf32> to vector<256x256xbf16>
    %23 = math.exp %22 : vector<256x256xbf16>
    %c0_14 = arith.constant 0 : index
    %c0_15 = arith.constant 0 : index
    %24 = vector.load %arg12[%c0_14, %c0_15] : memref<256x1xf32, #tpu.memory_space<vmem>>, vector<256x1xf32>
    %25 = arith.mulf %19, %24 : vector<256x1xf32>
    %26 = arith.extf %23 : vector<256x256xbf16> to vector<256x256xf32>
    %cst_16 = arith.constant dense<0.000000e+00> : vector<256xf32>
    %27 = vector.multi_reduction <add>, %26, %cst_16 [1] : vector<256x256xf32> to vector<256xf32>
    %28 = vector.shape_cast %27 : vector<256xf32> to vector<256x1xf32>
    %29 = arith.addf %25, %28 : vector<256x1xf32>
    %c0_17 = arith.constant 0 : index
    %c0_18 = arith.constant 0 : index
    %30 = vector.load %arg12[%c0_17, %c0_18] : memref<256x1xf32, #tpu.memory_space<vmem>>, vector<256x1xf32>
    tpu.vector_store %arg12[%c0_17, %c0_18], %29 {strides = array<i32>} : memref<256x1xf32, #tpu.memory_space<vmem>>, vector<256x1xf32>,
    %c0_19 = arith.constant 0 : index
    %c0_20 = arith.constant 0 : index
    %31 = vector.load %arg13[%c0_19, %c0_20] : memref<256x128xf32, #tpu.memory_space<vmem>>, vector<256x128xf32>
    %32 = vector.broadcast %19 : vector<256x1xf32> to vector<256x128xf32>
    %33 = arith.mulf %32, %31 : vector<256x128xf32>
    %cst_21 = arith.constant dense<0.000000e+00> : vector<256x128xf32>
    %34 = tpu.matmul %23, %7, %cst_21 {dimension_numbers = #tpu.dot_dimension_numbers<[1], [0], [0], [1], [0, 0, 1, 1], [], []>} : vector<256x256xbf16>, vector<256x128xbf16>, vector<256x128xf32> -> vector<256x128xf32>
    %35 = arith.addf %33, %34 : vector<256x128xf32>
    %c0_22 = arith.constant 0 : index
    %c0_23 = arith.constant 0 : index
    %36 = vector.load %arg13[%c0_22, %c0_23] : memref<256x128xf32, #tpu.memory_space<vmem>>, vector<256x128xf32>
    tpu.vector_store %arg13[%c0_22, %c0_23], %35 {strides = array<i32>} : memref<256x128xf32, #tpu.memory_space<vmem>>, vector<256x128xf32>,
    %c0_24 = arith.constant 0 : index
    %c0_25 = arith.constant 0 : index
    %37 = vector.load %arg11[%c0_24, %c0_25] : memref<256x1xf32, #tpu.memory_space<vmem>>, vector<256x1xf32>
    tpu.vector_store %arg11[%c0_24, %c0_25], %17 {strides = array<i32>} : memref<256x1xf32, #tpu.memory_space<vmem>>, vector<256x1xf32>,
    %c0_i32_26 = arith.constant 0 : i32
    %38 = arith.cmpi eq, %arg2, %c0_i32_26 : i32
    %39 = arith.extui %38 : i1 to i32
    %c0_i32_27 = arith.constant 0 : i32
    %40 = arith.cmpi ne, %39, %c0_i32_27 : i32
    scf.if %40 {
      %c0_28 = arith.constant 0 : index
      %c0_29 = arith.constant 0 : index
      %41 = vector.load %arg12[%c0_28, %c0_29] : memref<256x1xf32, #tpu.memory_space<vmem>>, vector<256x1xf32>
      %42 = tpu.reciprocal %41 {approx = true} : vector<256x1xf32> -> vector<256x1xf32>
      %c0_30 = arith.constant 0 : index
      %c0_31 = arith.constant 0 : index
      %43 = vector.load %arg13[%c0_30, %c0_31] : memref<256x128xf32, #tpu.memory_space<vmem>>, vector<256x128xf32>
      %44 = vector.broadcast %42 : vector<256x1xf32> to vector<256x128xf32>
      %45 = arith.mulf %43, %44 : vector<256x128xf32>
      %c0_32 = arith.constant 0 : index
      %c0_33 = arith.constant 0 : index
      %46 = vector.load %arg8[%c0_32, %c0_33] : memref<1x128xf32, #tpu.memory_space<vmem>>, vector<1x128xf32>
      %47 = vector.broadcast %46 : vector<1x128xf32> to vector<256x128xf32>
      %48 = arith.addf %45, %47 : vector<256x128xf32>
      %49 = arith.truncf %48 : vector<256x128xf32> to vector<256x128xbf16>
      %c0_34 = arith.constant 0 : index
      %c0_35 = arith.constant 0 : index
      %c0_36 = arith.constant 0 : index
      %50 = vector.load %arg9[%c0_34, %c0_35, %c0_36] : memref<1x256x128xbf16, #tpu.memory_space<vmem>>, vector<1x256x128xbf16>
      %51 = vector.shape_cast %50 : vector<1x256x128xbf16> to vector<256x128xbf16>
      %52 = vector.shape_cast %49 : vector<256x128xbf16> to vector<1x256x128xbf16>
      tpu.vector_store %arg9[%c0_34, %c0_35, %c0_36], %52 {strides = array<i32>} : memref<1x256x128xbf16, #tpu.memory_space<vmem>>, vector<1x256x128xbf16>,
    } else {
    }
    return
  }
  func.func @transform_0(%arg0: i32, %arg1: i32, %arg2: i32) -> (i32, i32, i32) {
    %c0_i32 = arith.constant 0 : i32
    %c0_i32_0 = arith.constant 0 : i32
    return %arg0, %arg1, %c0_i32 : i32, i32, i32
  }
  func.func @transform_1(%arg0: i32, %arg1: i32, %arg2: i32) -> (i32, i32, i32) {
    %c0_i32 = arith.constant 0 : i32
    %c0_i32_0 = arith.constant 0 : i32
    return %arg0, %arg2, %c0_i32 : i32, i32, i32
  }
  func.func @transform_2(%arg0: i32, %arg1: i32, %arg2: i32) -> (i32, i32) {
    %c0_i32 = arith.constant 0 : i32
    %c0_i32_0 = arith.constant 0 : i32
    %c0_i32_1 = arith.constant 0 : i32
    return %c0_i32, %c0_i32_0 : i32, i32
  }
  func.func @transform_3(%arg0: i32, %arg1: i32, %arg2: i32) -> (i32, i32) {
    %c0_i32 = arith.constant 0 : i32
    %c0_i32_0 = arith.constant 0 : i32
    %c0_i32_1 = arith.constant 0 : i32
    return %c0_i32, %c0_i32_0 : i32, i32
  }
  func.func @transform_4(%arg0: i32, %arg1: i32, %arg2: i32) -> (i32, i32) {
    %c0_i32 = arith.constant 0 : i32
    %c0_i32_0 = arith.constant 0 : i32
    %c0_i32_1 = arith.constant 0 : i32
    return %c0_i32, %c0_i32_0 : i32, i32
  }
  func.func @transform_5(%arg0: i32, %arg1: i32, %arg2: i32) -> (i32, i32) {
    %c0_i32 = arith.constant 0 : i32
    %c0_i32_0 = arith.constant 0 : i32
    %c0_i32_1 = arith.constant 0 : i32
    return %c0_i32, %c0_i32_0 : i32, i32
  }
  func.func @transform_6(%arg0: i32, %arg1: i32, %arg2: i32) -> (i32, i32, i32) {
    %c0_i32 = arith.constant 0 : i32
    %c0_i32_0 = arith.constant 0 : i32
    return %arg0, %arg1, %c0_i32 : i32, i32, i32
  }
}

</mosaic_0001>

<bundles_post_ra>
// kernel: tpu_custom_call.1
= control target key start
LH: loop header
LB: loop body
LE: loop exit
PB: predicated region body
PF: predicated region fallthrough
CT: control target
= control target key end

     0   :  { %s6421_s0 = inlined_call_operand.hbm [shape: bf16[2,256,128], index: 0, kind: input, shape index: {}]   ;;  %s6422_s1 = inlined_call_operand.hbm [shape: bf16[2,256,128], index: 1, kind: input, shape index: {}]   ;;  %s6423_s2 = inlined_call_operand.hbm [shape: bf16[128,128], index: 2, kind: input, shape index: {}]   ;;  %s6424_s3 = inlined_call_operand.vmem [shape: bf16[1,128], index: 3, kind: input, shape index: {}]   ;;  %s6425_s4 = inlined_call_operand.hbm [shape: bf16[128,128], index: 4, kind: input, shape index: {}]   ;;  %s6426_s5 = inlined_call_operand.vmem [shape: f32[1,128], index: 5, kind: input, shape index: {}]   ;;  %s6427_s6 = inlined_call_operand.hbm [shape: bf16[2,256,128], index: 6, kind: output, shape index: {}]  }
   0x1   :  { %6508 = sst [smem:[#allocation90_spill]] %s6421_s0 }
   0x2   :  { %6509 = sst [smem:[#allocation91_spill]] %s6423_s2 }
   0x3   :  { %6510 = sst [smem:[#allocation92_spill]] %s6425_s4 }
   0x4   :  { %11 = vsyncpa [#allocation7], 0 }
   0x5   :  { %13 = vsyncpa [#allocation7 + $0x1], 0 }
   0x6   :  { %14 = vsyncpa [#allocation10], 0 }
   0x7   :  { %16 = vsyncpa [#allocation10 + $0x1], 0 }
   0x8   :  { %17 = vsyncpa [#allocation13], 0 }
   0x9   :  { %18 = vsyncpa [#allocation8], 0 }
   0xa   :  { %20 = vsyncpa [#allocation8 + $0x1], 0  ;;  %s4673_s21 = smov 0   ;;  %s4675_s22 = smov 0  }
   0xb   :  { %s4677_s23 = smov 0   ;;  %s4679_s24 = smov 0  }
   0xc   :  { %s4681_s25 = smov 0   ;;  %s4683_s26 = smov 0  }
   0xd LB: > { %6511 = sst [smem:[#allocation20_spill]] %s4612_s23  ;;  %s4704_s27 = sadd.s32 4294967295, %s4624_s26   ;;  %s4624_s26 = sphi %s4683_s26, %s26_s26   ;;  %s4620_s25 = sphi %s4681_s25, %s6725_s25   ;;  %s4616_s24 = sphi %s4679_s24, %s6724_s24   ;;  %s4612_s23 = sphi %s4677_s23, %s6723_s23   ;;  %s4608_s22 = sphi %s4675_s22, %s6727_s22   ;;  %s4604_s21 = sphi %s4673_s21, %s6726_s21  }
   0xe   : > { %6512 = sst [smem:[#allocation21_spill]] %s4620_s25  ;;  %s3506_s28 = sadd.s32 4294967294, %s4624_s26  }
   0xf   : > { %p67_p0 = scmp.ne.s32.totalorder %s4608_s22, %s4604_s21  ;;  %p6428_p1 = scmp.eq.s32.totalorder %s4704_s27, 0 }
  0x10   : > { %p211_p3 = scmp.eq.s32.totalorder %s3506_s28, 1  ;;  %p3507_p5 = scmp.ge.s32.totalorder %s4624_s26, 1 }
  0x11   : > { %p4713_p4 = por %p6428_p1, %p67_p0  ;;  %p218_p7 = scmp.lt.s32.totalorder %s4624_s26, 3 }
  0x12   : > { %p4718_p6 = por %p211_p3, %p67_p0  ;;  %s4626_s8 = smov [#allocation11]  }
  0x13   : > { %s6513_s29 = scalar_select %p4713_p4, 1, 0 }
  0x14   : > { %s6514_s30 = scalar_select %p4718_p6, 1, 0 }
  0x15   : > { %p4723_p8 = pnand %p3507_p5, %p218_p7  ;;  %s230_s9 = sshll.u32 %s4626_s8, 4  ;;  %s4727_s9 = int_to_ptr.vmem [resolvable:$true] %s230_s9 }
  0x16   : > { %s4627_s11 = smov [#allocation12]   ;;  %s6517_s2 = sld [smem:[#allocation91_spill]] }
  0x17   : > { %p4091_p9 = pneg %p4723_p8  ;;  %s246_s12 = sshll.u32 %s4627_s11, 4  ;;  %s4738_s12 = int_to_ptr.vmem [resolvable:$true] %s246_s12 }
  0x19   : > { %p4734_p11 = pnand %p4091_p9, %p6428_p1 }
  0x1b   : > { %p4416_p13 = pneg %p4734_p11 }
  0x1c   : > { %s4414_s15 = scalar_lea.hbm %s6517_s2, 1024 }
  0x1d   : > { %p4415_p12 = scmp.ne.s32.totalorder %s6517_s2, %s4414_s15  ;;  %p4421_p5 = scmp.lt.u32.totalorder %s4414_s15, %s6517_s2 }
  0x1f   : > { %p4417_p0 = pnand %p4416_p13, %p4415_p12 }
  0x21   : > { %p4418_p3 = pneg %p4417_p0 }
  0x23   : > { %p4423_p7 = pnand %p4421_p5, %p4418_p3 }
  0x25   : > { %4426 = shalt.err (!%p4423_p7)
}
  0x26   : > { %s4427_s20 = scalar_lea.vmem %s4727_s9, 1024  ;;  %p4435_p2 = scmp.lt.s32.totalorder %s4727_s9, %s4727_s9 }
  0x27   : > { %p4428_p9 = scmp.ne.s32.totalorder %s4727_s9, %s4427_s20  ;;  %p4436_p12 = scmp.lt.s32.totalorder %s4427_s20, %s4427_s20 }
  0x29   : > { %p4430_p10 = pnand %p4428_p9, %p4416_p13  ;;  %p4437_p0 = por %p4436_p12, %p4435_p2 }
  0x2b   : > { %p4431_p1 = pneg %p4430_p10 }
  0x2d   : > { %p4438_p6 = pnand %p4437_p0, %p4431_p1 }
  0x2f   : > { %4441 = shalt.err (!%p4438_p6)
}
  0x30   : > { %s6429_s28 = smov 64   ;;  %s6431_s8 = smov 4  }
  0x31   : > { %4094 = dma.hbm_to_vmem [thread:$0]  (!%p4734_p11), %s6517_s2, 1024, %s4727_s9, [#allocation10], %s6429_s28, %s6429_s28, %s6431_s8  }
  0x32   : > { %s6518_s4 = sld [smem:[#allocation92_spill]] }
  0x38   : > { %s4442_s16 = scalar_lea.hbm %s6518_s4, 1024 }
  0x39   : > { %p4443_p1 = scmp.ne.s32.totalorder %s6518_s4, %s4442_s16  ;;  %p4449_p10 = scmp.lt.u32.totalorder %s4442_s16, %s6518_s4 }
  0x3b   : > { %p4445_p2 = pnand %p4443_p1, %p4416_p13 }
  0x3d   : > { %p4446_p6 = pneg %p4445_p2 }
  0x3f   : > { %p4451_p3 = pnand %p4449_p10, %p4446_p6 }
  0x41   : > { %4454 = shalt.err (!%p4451_p3)
}
  0x42   : > { %s4455_s9 = scalar_lea.vmem %s4738_s12, 1024  ;;  %p4463_p12 = scmp.lt.s32.totalorder %s4738_s12, %s4738_s12 }
  0x43   : > { %p4456_p5 = scmp.ne.s32.totalorder %s4738_s12, %s4455_s9  ;;  %p4464_p0 = scmp.lt.s32.totalorder %s4455_s9, %s4455_s9 }
  0x45   : > { %p4458_p7 = pnand %p4456_p5, %p4416_p13  ;;  %p4465_p1 = por %p4464_p0, %p4463_p12 }
  0x47   : > { %p4459_p9 = pneg %p4458_p7 }
  0x49   : > { %p4466_p2 = pnand %p4465_p1, %p4459_p9 }
  0x4b   : > { %4469 = shalt.err (!%p4466_p2)
}
  0x4c   : > { %4097 = dma.hbm_to_vmem [thread:$0]  (!%p4734_p11), %s6518_s4, 1024, %s4738_s12, [#allocation13], %s6429_s28, %s6429_s28, %s6431_s8  }
  0x4d   : > { %s45_s10 = sadd.s32 1, %s4620_s25  ;;  %s54_s14 = sadd.s32 1, %s4612_s23 }
  0x4e   : > { %p47_p13 = scmp.ge.s32.totalorder %s45_s10, 2  ;;  %p61_p6 = scmp.ne.s32.totalorder %s4612_s23, %s4608_s22 }
  0x4f   : > { %p62_p10 = scmp.eq.s32.totalorder %s4624_s26, 0  ;;  %p4111_p3 = scmp.lt.s32.totalorder %s4624_s26, 2 }
  0x50   : > { %s6729_s10 = smov (%p47_p13, %s45_s10), 0  ;;  %p6520_p7 = scmp.eq.s32.totalorder %s4704_s27, 1 }
  0x51   : > { %6519 = sst [smem:[#allocation22_spill]] %s6729_s10  ;;  %p63_p5 = por %p62_p10, %p61_p6 }
  0x52   : > { %p4808_p9 = por %p6520_p7, %p61_p6  ;;  %s49_s16 = ssub.s32 %s4620_s25, %s6729_s10 }
  0x53   : > { %s263_s17 = sand.u32 1, %s4612_s23   ;;  %p52_p12 = scmp.eq.s32.totalorder %s49_s16, 0 }
  0x54   : > { %s6521_s15 = scalar_select %p4808_p9, 1, 0 }
  0x55   : > { %s4815_s12 = sshll.u32 %s263_s17, 7  ;;  %s3609_s18 = sshll.u32 %s4620_s25, 11 }
  0x56   : > { %s4819_s19 = scalar_select %p52_p12, %s4612_s23, %s54_s14  }
  0x57   : > { %s6523_s0 = sld [smem:[#allocation90_spill]]  ;;  %s267_s13 = scalar_lea.vmem [#allocation6], %s4815_s12 }
  0x58   : > { %6522 = sst [smem:[#allocation23_spill]] %s4819_s19  ;;  %s276_s28 = sshll.u32 %s267_s13, 4  ;;  %s4833_s28 = int_to_ptr.vmem [resolvable:$true] %s276_s28 }
  0x59   : > { %p4829_p11 = pnand %p4111_p3, %p63_p5  ;;  %s4838_s20 = scalar_lea.hbm %s6422_s1, %s3609_s18 }
  0x5a   : > { %s4840_s9 = scalar_lea.sflag [#allocation7], %s263_s17 }
  0x5b   : > { %p4472_p1 = pneg %p4829_p11 }
  0x5d   : > { %s4824_s11 = scalar_lea.hbm %s6523_s0, %s3609_s18  ;;  %s4475_s10 = scalar_lea.hbm %s6523_s0, 4096 }
  0x5e   : > { %s4470_s2 = scalar_lea.hbm %s4824_s11, 2048  ;;  %p4476_p6 = scmp.lt.u32.totalorder %s4824_s11, %s6523_s0 }
  0x5f   : > { %p4471_p0 = scmp.ne.s32.totalorder %s4824_s11, %s4470_s2  ;;  %p4477_p10 = scmp.lt.u32.totalorder %s4475_s10, %s4470_s2 }
  0x60   : > { %p4479_p5 = scmp.lt.u32.totalorder %s4470_s2, %s4824_s11 }
  0x61   : > { %p4473_p2 = pnand %p4472_p1, %p4471_p0  ;;  %p4478_p3 = por %p4477_p10, %p4476_p6 }
  0x63   : > { %p4474_p13 = pneg %p4473_p2  ;;  %p4480_p7 = por %p4479_p5, %p4478_p3 }
  0x65   : > { %p4481_p12 = pnand %p4480_p7, %p4474_p13 }
  0x67   : > { %4484 = shalt.err (!%p4481_p12)
}
  0x68   : > { %s4485_s8 = scalar_lea.vmem %s4833_s28, 2048  ;;  %s4630_s4 = smov [#allocation6]  }
  0x69   : > { %p4486_p0 = scmp.ne.s32.totalorder %s4833_s28, %s4485_s8  ;;  %s4490_s17 = sshll.u32 %s4630_s4, 4  ;;  %s4491_s17 = int_to_ptr.vmem [resolvable:$false] %s4490_s17 }
  0x6a   : > { %s4492_s25 = scalar_lea.vmem %s4491_s17, 4096  ;;  %p4493_p4 = scmp.lt.s32.totalorder %s4833_s28, %s4491_s17 }
  0x6b   : > { %p4488_p2 = pnand %p4486_p0, %p4472_p1  ;;  %p4494_p6 = scmp.lt.s32.totalorder %s4492_s25, %s4485_s8 }
  0x6d   : > { %p4489_p9 = pneg %p4488_p2  ;;  %p4495_p10 = por %p4494_p6, %p4493_p4 }
  0x6f   : > { %p4496_p3 = pnand %p4495_p10, %p4489_p9 }
  0x71   : > { %4499 = shalt.err (!%p4496_p3)
}
  0x72   : > { %s6525_s2 = smov 4   ;;  %s6526_s10 = smov 64  }
  0x73   : > { %4101 = dma.hbm_to_vmem [thread:$0]  (!%p4829_p11), %s4824_s11, 2048, %s4833_s28, %s4840_s9, %s6526_s10, %s6526_s10, %s6525_s2  }
  0x74   : > { %s290_s18 = scalar_lea.vmem [#allocation9], %s4815_s12  ;;  %s286_s14 = sand.u32 1, %s4624_s26  }
  0x75   : > { %s299_s19 = sshll.u32 %s290_s18, 4  ;;  %s4875_s13 = scalar_lea.sflag [#allocation10], %s286_s14  ;;  %s4873_s19 = int_to_ptr.vmem [resolvable:$true] %s299_s19 }
  0x76   : > { %s4500_s8 = scalar_lea.hbm %s4838_s20, 2048  ;;  %s4505_s25 = scalar_lea.hbm %s6422_s1, 4096 }
  0x77   : > { %p4501_p4 = scmp.ne.s32.totalorder %s4838_s20, %s4500_s8  ;;  %p4506_p5 = scmp.lt.u32.totalorder %s4838_s20, %s6422_s1 }
  0x78   : > { %p4507_p7 = scmp.lt.u32.totalorder %s4505_s25, %s4500_s8  ;;  %p4509_p0 = scmp.lt.u32.totalorder %s4500_s8, %s4838_s20 }
  0x79   : > { %p4503_p9 = pnand %p4501_p4, %p4472_p1 }
  0x7a   : > { %p4508_p12 = por %p4507_p7, %p4506_p5 }
  0x7b   : > { %p4504_p13 = pneg %p4503_p9 }
  0x7c   : > { %p4510_p2 = por %p4509_p0, %p4508_p12 }
  0x7e   : > { %p4511_p6 = pnand %p4510_p2, %p4504_p13 }
  0x80   : > { %4514 = shalt.err (!%p4511_p6)
}
  0x81   : > { %s4515_s28 = scalar_lea.vmem %s4873_s19, 2048  ;;  %s4631_s12 = smov [#allocation9]  }
  0x82   : > { %p4516_p10 = scmp.ne.s32.totalorder %s4873_s19, %s4515_s28  ;;  %s4520_s11 = sshll.u32 %s4631_s12, 4  ;;  %s4521_s11 = int_to_ptr.vmem [resolvable:$false] %s4520_s11 }
  0x83   : > { %s4522_s0 = scalar_lea.vmem %s4521_s11, 4096  ;;  %p4523_p9 = scmp.lt.s32.totalorder %s4873_s19, %s4521_s11 }
  0x84   : > { %p4518_p3 = pnand %p4516_p10, %p4472_p1  ;;  %p4524_p5 = scmp.lt.s32.totalorder %s4522_s0, %s4515_s28 }
  0x86   : > { %p4519_p4 = pneg %p4518_p3  ;;  %p4525_p7 = por %p4524_p5, %p4523_p9 }
  0x88   : > { %p4526_p12 = pnand %p4525_p7, %p4519_p4 }
  0x8a   : > { %4529 = shalt.err (!%p4526_p12)
}
  0x8b   : > { %4104 = dma.hbm_to_vmem [thread:$0]  (!%p4829_p11), %s4838_s20, 2048, %s4873_s19, %s4875_s13, %s6526_s10, %s6526_s10, %s6525_s2  }
  0x8c   : > { %311 = sbr.rel (%p4723_p8) target bundleno = 1364 (0x554), region = 44 }
  0x93   : > { %s4907_s23 = sand.u32 1, %s4608_s22   ;;  %p6527_p1 = scmp.ne.s32.totalorder %s6513_s29, 0 }
  0x94   : > { %s4910_s9 = sshll.u32 %s4907_s23, 7  ;;  %s314_s16 = scalar_lea.sflag [#allocation7], %s4907_s23 }
  0x95   : > { %s4914_s18 = scalar_lea.vmem [#allocation6], %s4910_s9 }
  0x96   : > { %4583 = dma.done.wait (%p6527_p1), %s314_s16, 2048  }
  0x97   : > { %4585 = vsyncadd (%p6527_p1), %s314_s16, 4294965248  ;;  %s322_s7 = sand.u32 1, %s4704_s27   ;;  %s4922_s2 = scalar_lea.vmem [#allocation9], %s4910_s9 }
  0x98   : > { %s323_s20 = scalar_lea.sflag [#allocation10], %s322_s7 }
  0x99   : > { %4587 = dma.done.wait (%p6527_p1), %s323_s20, 2048  }
  0x9a   : > { %4589 = vsyncadd (%p6527_p1), %s323_s20, 4294965248  ;;  %p6528_p8 = scmp.eq.s32.totalorder %s4704_s27, 0 }
  0x9c   : > { %4591 = dma.done.wait (%p6528_p8), [#allocation10], 1024   ;;  %p6529_p11 = pmov %p6528_p8 }
  0x9d   : > { %p6530_p13 = pmov %p6528_p8 }
  0x9e   : > { %4593 = vsyncadd (%p6529_p11), [#allocation10], 4294966272 }
  0x9f   : > { %4595 = dma.done.wait (%p6530_p13), [#allocation13], 1024   ;;  %p6531_p0 = pmov %p6528_p8 }
  0xa0   : > { %v4174_v0 = vld [vmem:[#allocation11] sm:$0xff]   ;;  %v4175_v1 = vld [vmem:[#allocation11 + $0x8] sm:$0xff]   ;;  %v4176_v2 = vld [vmem:[#allocation11 + $0x10] sm:$0xff]   ;;  %vm761_vm0 = vcmask 7168   ;;  %s6288_s14 = scalar_lea.vmem [#allocation14], %s4910_s9  ;;  %s3643_s13 = sshll.u32 %s4616_s24, 11 }
  0xa1   : > { %4597 = vsyncadd (%p6531_p0), [#allocation13], 4294966272  ;;  %3965 = vmatprep.subr.bf16.mxu0 %v4174_v0  ;;  %v4177_v3 = vld [vmem:[#allocation11 + $0x18] sm:$0xff]   ;;  %v4182_v4 = vld [vmem:[%s4914_s18] sm:$0xff]   ;;  %s3370_s8 = sshll.u32 %s6288_s14, 4  ;;  %s6369_s25 = scalar_lea.hbm %s6427_s6, %s3643_s13  ;;  %s6371_s8 = int_to_ptr.vmem [resolvable:$true] %s3370_s8 }
  0xa2   : > { %3966 = vmatpush3.bf16.msra.mxu0 %v4174_v0  ;;  %3981 = vmatprep.mubr.bf16.mxu0 %v4182_v4  ;;  %v4178_v5 = vld [vmem:[#allocation11 + $0x20] sm:$0xff]   ;;  %v4179_v6 = vld [vmem:[#allocation11 + $0x28] sm:$0xff]   ;;  %v4180_v7 = vld [vmem:[#allocation11 + $0x30] sm:$0xff]   ;;  %s3355_s28 = scalar_lea.sflag [#allocation8], %s4907_s23  ;;  %s4530_s24 = scalar_lea.vmem %s6371_s8, 2048 }
  0xa3   : > { %3967 = vmatprep.subr.bf16.mxu0 %v4175_v1  ;;  %v4194_v8 = vld [vmem:[#allocation12] sm:$0xff]   ;;  %v4195_v9 = vld [vmem:[#allocation12 + $0x8] sm:$0xff]   ;;  %v4181_v10 = vld [vmem:[#allocation11 + $0x38] sm:$0xff]   ;;  %p4531_p2 = scmp.ne.s32.totalorder %s6371_s8, %s4530_s24  ;;  %p6719_p6 = scmp.ne.s32.totalorder %s6521_s15, 0 }
  0xa4   : > { %4013 = vmatprep.subr.bf16.mxu1 %v4194_v8  ;;  %v4196_v11 = vld [vmem:[#allocation12 + $0x10] sm:$0xff]   ;;  %v4199_v12 = vld [vmem:[#allocation12 + $0x18] sm:$0xff]   ;;  %v4183_v13 = vld [vmem:[%s4914_s18 + $0x8] sm:$0xff]   ;;  %s4635_s12 = smov [#allocation14]  }
  0xa5   : > { %4014 = vmatpush3.bf16.msra.mxu1 %v4194_v8  ;;  %v4184_v14 = vld [vmem:[%s4914_s18 + $0x10] sm:$0xff]   ;;  %v4200_v15 = vld [vmem:[#allocation12 + $0x20] sm:$0xff]   ;;  %v4201_v17 = vld [vmem:[#allocation12 + $0x28] sm:$0xff]   ;;  %p4532_p10 = pnand %p4531_p2, %p6719_p6  ;;  %s4534_s11 = sshll.u32 %s4635_s12, 4  ;;  %s4535_s11 = int_to_ptr.vmem [resolvable:$false] %s4534_s11 }
  0xa6   : > { %3968 = vmatpush3.bf16.msra.mxu0 %v4175_v1  ;;  %4015 = vmatprep.subr.bf16.mxu1 %v4195_v9  ;;  %v4206_v16 = vld [vmem:[%s4922_s2] sm:$0xff]   ;;  %v4185_v18 = vld [vmem:[%s4914_s18 + $0x18] sm:$0xff]   ;;  %v4202_v20 = vld [vmem:[#allocation12 + $0x30] sm:$0xff]   ;;  %s4536_s0 = scalar_lea.vmem %s4535_s11, 4096  ;;  %p4537_p4 = scmp.lt.s32.totalorder %s6371_s8, %s4535_s11 }
  0xa7   : > { %3969 = vmatprep.subr.bf16.mxu0 %v4176_v2  ;;  %4029 = vmatprep.mubr.bf16.mxu1 %v4206_v16  ;;  %v4186_v19 = vld [vmem:[%s4914_s18 + $0x20] sm:$0xff]   ;;  %v4947_v22 = vld [vmem:[%s4922_s2 + $0x48] sm:$0xff]   ;;  %v4205_v23 = vld [vmem:[#allocation12 + $0x38] sm:$0xff]   ;;  %p4533_p3 = pneg %p4532_p10  ;;  %p4538_p9 = scmp.lt.s32.totalorder %s4536_s0, %s4530_s24 }
  0xa8   : > { %v4943_v21 = vld [vmem:[%s4922_s2 + $0x40] sm:$0xff]   ;;  %v4187_v24 = vld [vmem:[%s4914_s18 + $0x28] sm:$0xff]   ;;  %v4188_v25 = vld [vmem:[%s4914_s18 + $0x30] sm:$0xff]  }
  0xa9   : > { %4016 = vmatpush3.bf16.msra.mxu1 %v4195_v9  ;;  %v4207_v26 = vld [vmem:[%s4922_s2 + $0x8] sm:$0xff]   ;;  %v4208_v27 = vld [vmem:[%s4922_s2 + $0x10] sm:$0xff]   ;;  %v4189_v29 = vld [vmem:[%s4914_s18 + $0x38] sm:$0xff]   ;;  %p4539_p5 = por %p4538_p9, %p4537_p4 }
  0xaa   : > { %3970 = vmatpush3.bf16.msra.mxu0 %v4176_v2  ;;  %4017 = vmatprep.subr.bf16.mxu1 %v4196_v11  ;;  %v4216_v28 = vld [vmem:[%s4922_s2 + $0x50] sm:$0xff]   ;;  %v4190_v30 = vld [vmem:[%s4914_s18 + $0x40] sm:$0xff]   ;;  %v4209_v31 = vld [vmem:[%s4922_s2 + $0x18] sm:$0xff]  }
  0xab   : > { %3971 = vmatprep.subr.bf16.mxu0 %v4177_v3  ;;  %v4210_v32 = vld [vmem:[%s4922_s2 + $0x20] sm:$0xff]   ;;  %v4217_v33 = vld [vmem:[%s4922_s2 + $0x58] sm:$0xff]   ;;  %v4191_v34 = vld [vmem:[%s4914_s18 + $0x48] sm:$0xff]   ;;  %p4540_p7 = pnand %p4539_p5, %p4533_p3 }
  0xac   : > { %v4192_v35 = vld [vmem:[%s4914_s18 + $0x50] sm:$0xff]   ;;  %v4211_v36 = vld [vmem:[%s4922_s2 + $0x28] sm:$0xff]   ;;  %v4218_v38 = vld [vmem:[%s4922_s2 + $0x60] sm:$0xff]  }
  0xad   : > { %4018 = vmatpush3.bf16.msra.mxu1 %v4196_v11  ;;  %v4212_v37 = vld [vmem:[%s4922_s2 + $0x30] sm:$0xff]   ;;  %v4193_v39 = vld [vmem:[%s4914_s18 + $0x58] sm:$0xff]   ;;  %v4197_v40 = vld [vmem:[%s4914_s18 + $0x60] sm:$0xff]  }
  0xae   : > { %3972 = vmatpush3.bf16.msra.mxu0 %v4177_v3  ;;  %4019 = vmatprep.subr.bf16.mxu1 %v4199_v12  ;;  %v4213_v41 = vld [vmem:[%s4922_s2 + $0x38] sm:$0xff]   ;;  %v4219_v42 = vld [vmem:[%s4922_s2 + $0x68] sm:$0xff]   ;;  %v4203_v44 = vld [vmem:[%s4914_s18 + $0x70] sm:$0xff]  }
  0xaf   : > { %3973 = vmatprep.subr.bf16.mxu0 %v4178_v5  ;;  %v4198_v43 = vld [vmem:[%s4914_s18 + $0x68] sm:$0xff]   ;;  %v4220_v45 = vld [vmem:[%s4922_s2 + $0x70] sm:$0xff]   ;;  %v4204_v46 = vld [vmem:[%s4914_s18 + $0x78] sm:$0xff]  }
  0xb0   : > { %v4221_v47 = vld [vmem:[%s4922_s2 + $0x78] sm:$0xff]   ;;  %v1243_v48 = vld [vmem:[%s6424_s3] sm:$0x1] }
  0xb1   : > { %4020 = vmatpush3.bf16.msra.mxu1 %v4199_v12 }
  0xb2   : > { %3974 = vmatpush3.bf16.msra.mxu0 %v4178_v5  ;;  %4021 = vmatprep.subr.bf16.mxu1 %v4200_v15 }
  0xb3   : > { %3975 = vmatprep.subr.bf16.mxu0 %v4179_v6 }
  0xb5   : > { %4022 = vmatpush3.bf16.msra.mxu1 %v4200_v15 }
  0xb6   : > { %3976 = vmatpush3.bf16.msra.mxu0 %v4179_v6  ;;  %4023 = vmatprep.subr.bf16.mxu1 %v4201_v17 }
  0xb7   : > { %3977 = vmatprep.subr.bf16.mxu0 %v4180_v7 }
  0xb9   : > { %4024 = vmatpush3.bf16.msra.mxu1 %v4201_v17 }
  0xba   : > { %3978 = vmatpush3.bf16.msra.mxu0 %v4180_v7  ;;  %4025 = vmatprep.subr.bf16.mxu1 %v4202_v20 }
  0xbb   : > { %3979 = vmatprep.subr.bf16.mxu0 %v4181_v10 }
  0xbd   : > { %4026 = vmatpush3.bf16.msra.mxu1 %v4202_v20 }
  0xbe   : > { %3980 = vmatpush3.bf16.msra.mxu0 %v4181_v10  ;;  %4027 = vmatprep.subr.bf16.mxu1 %v4205_v23 }
  0xbf   : > { %3787 = vmatprep.subr.bf16.mxu0 %v4943_v21 }
  0xc1   : > { %3982 = vmatmul.mubr.bf16.vlgmr.msra.gmra.mrb[0].mxu0 %v4183_v13  ;;  %4028 = vmatpush3.bf16.msra.mxu1 %v4205_v23 }
  0xc2   : > { %3985 = vmatprep.mubr.bf16.mxu0 %v4184_v14  ;;  %3805 = vmatprep.subr.bf16.mxu1 %v4943_v21 }
  0xc4   : > { %4030 = vmatmul.mubr.bf16.vlgmr.msra.gmra.mrb[0].mxu1 %v4207_v26 }
  0xc5   : > { %4033 = vmatprep.mubr.bf16.mxu1 %v4208_v27 }
  0xc7   : > { %3788 = vmatpush3.bf16.xpose.msra.mxu0 %v4206_v16 }
  0xc8   : > { %3789 = vmatprep.subr.bf16.mxu0 %v4947_v22 }
  0xc9   : > { %3986 = vmatmul.mubr.bf16.gmra.mrb[4].mxu0 %v4185_v18 }
  0xca   : > { %3989 = vmatprep.mubr.bf16.mxu0 %v4186_v19  ;;  %3806 = vmatpush3.bf16.xpose.msra.mxu1 %v4206_v16 }
  0xcb   : > { %3807 = vmatprep.subr.bf16.mxu1 %v4947_v22 }
  0xcc   : > { %4034 = vmatmul.mubr.bf16.gmra.mrb[4].mxu1 %v4209_v31 }
  0xcd   : > { %4037 = vmatprep.mubr.bf16.mxu1 %v4210_v32 }
  0xcf   : > { %3790 = vmatpush3.bf16.xpose.msra.mxu0 %v4207_v26 }
  0xd0   : > { %3791 = vmatprep.subr.bf16.mxu0 %v4216_v28 }
  0xd1   : > { %3990 = vmatmul.mubr.bf16.gmra.mrb[8].mxu0 %v4187_v24 }
  0xd2   : > { %3993 = vmatprep.mubr.bf16.mxu0 %v4188_v25  ;;  %3808 = vmatpush3.bf16.xpose.msra.mxu1 %v4207_v26 }
  0xd3   : > { %3809 = vmatprep.subr.bf16.mxu1 %v4216_v28 }
  0xd4   : > { %4038 = vmatmul.mubr.bf16.gmra.mrb[8].mxu1 %v4211_v36 }
  0xd5   : > { %4041 = vmatprep.mubr.bf16.mxu1 %v4212_v37 }
  0xd7   : > { %3792 = vmatpush3.bf16.xpose.msra.mxu0 %v4208_v27 }
  0xd8   : > { %3793 = vmatprep.subr.bf16.mxu0 %v4217_v33 }
  0xd9   : > { %3994 = vmatmul.mubr.bf16.gmra.mrb[12].mxu0 %v4189_v29 }
  0xda   : > { %3997 = vmatprep.mubr.bf16.mxu0 %v4190_v30  ;;  %3810 = vmatpush3.bf16.xpose.msra.mxu1 %v4208_v27 }
  0xdb   : > { %3811 = vmatprep.subr.bf16.mxu1 %v4217_v33 }
  0xdc   : > { %4042 = vmatmul.mubr.bf16.gmra.mrb[12].mxu1 %v4213_v41 }
  0xdd   : > { %4045 = vmatprep.mubr.bf16.mxu1 %v4943_v21 }
  0xdf   : > { %3794 = vmatpush3.bf16.xpose.msra.mxu0 %v4209_v31 }
  0xe0   : > { %3795 = vmatprep.subr.bf16.mxu0 %v4218_v38 }
  0xe1   : > { %3998 = vmatmul.mubr.bf16.gmra.mrb[16].mxu0 %v4191_v34 }
  0xe2   : > { %4001 = vmatprep.mubr.bf16.mxu0 %v4192_v35  ;;  %3812 = vmatpush3.bf16.xpose.msra.mxu1 %v4209_v31 }
  0xe3   : > { %3813 = vmatprep.subr.bf16.mxu1 %v4218_v38 }
  0xe4   : > { %4046 = vmatmul.mubr.bf16.gmra.mrb[16].mxu1 %v4947_v22 }
  0xe5   : > { %4049 = vmatprep.mubr.bf16.mxu1 %v4216_v28 }
  0xe7   : > { %3796 = vmatpush3.bf16.xpose.msra.mxu0 %v4210_v32 }
  0xe8   : > { %3797 = vmatprep.subr.bf16.mxu0 %v4219_v42 }
  0xe9   : > { %4002 = vmatmul.mubr.bf16.gmra.mrb[20].mxu0 %v4193_v39 }
  0xea   : > { %4005 = vmatprep.mubr.bf16.mxu0 %v4197_v40  ;;  %3814 = vmatpush3.bf16.xpose.msra.mxu1 %v4210_v32 }
  0xeb   : > { %3815 = vmatprep.subr.bf16.mxu1 %v4219_v42 }
  0xec   : > { %4050 = vmatmul.mubr.bf16.gmra.mrb[20].mxu1 %v4217_v33 }
  0xed   : > { %4053 = vmatprep.mubr.bf16.mxu1 %v4218_v38 }
  0xef   : > { %3798 = vmatpush3.bf16.xpose.msra.mxu0 %v4211_v36 }
  0xf0   : > { %3799 = vmatprep.subr.bf16.mxu0 %v4220_v45 }
  0xf1   : > { %4006 = vmatmul.mubr.bf16.gmra.mrb[24].mxu0 %v4198_v43 }
  0xf2   : > { %4009 = vmatprep.mubr.bf16.mxu0 %v4203_v44  ;;  %3816 = vmatpush3.bf16.xpose.msra.mxu1 %v4211_v36 }
  0xf3   : > { %3817 = vmatprep.subr.bf16.mxu1 %v4220_v45 }
  0xf4   : > { %4054 = vmatmul.mubr.bf16.gmra.mrb[24].mxu1 %v4219_v42 }
  0xf5   : > { %4057 = vmatprep.mubr.bf16.mxu1 %v4220_v45 }
  0xf7   : > { %3800 = vmatpush3.bf16.xpose.msra.mxu0 %v4212_v37 }
  0xf8   : > { %3801 = vmatprep.subr.bf16.mxu0 %v4221_v47 }
  0xf9   : > { %4010 = vmatmul.mubr.bf16.gmra.mrb[28].mxu0 %v4204_v46 }
  0xfa   : > { %3818 = vmatpush3.bf16.xpose.msra.mxu1 %v4212_v37  ;;  %3803 = vmatprep.mubr.bf16.mxu0 %v1243_v48 }
  0xfb   : > { %3819 = vmatprep.subr.bf16.mxu1 %v4221_v47 }
  0xfc   : > { %4058 = vmatmul.mubr.bf16.gmra.mrb[28].mxu1 %v4221_v47 }
  0xff   : > { %3802 = vmatpush3.bf16.xpose.msra.mxu0 %v4213_v41 }
 0x102   : > { %3820 = vmatpush3.bf16.xpose.msra.mxu1 %v4213_v41 }
 0x106   : > { %3804 = vmatmul.mubr.bf16.vlgmr.msra.gmra.mrb[32].mxu0 %v1243_v48 }
 0x194   : > { %v3983_v49 = vpop.f32.mrb[0].mxu0 }
 0x195   : > { %v602_v50 = vpop.f32.mrb[1].mxu0 }
 0x196   : > { %v3984_v51 = vpop.f32.mrb[2].mxu0 }
 0x197   : > { %v730_v52 = vpack.c.bf16 %v3984_v51, %v3983_v49  ;;  %v605_v53 = vpop.f32.mrb[3].mxu0  ;;  %v4031_v3 = vpop.f32.mrb[0].mxu1 }
 0x198   : > { %v729_v54 = vpack.c.bf16 %v605_v53, %v602_v50  ;;  %v1084_v4 = vpop.f32.mrb[1].mxu1 }
 0x199   : > { %v4032_v5 = vpop.f32.mrb[2].mxu1 }
 0x19a   : > { %3821 = vmatprep.mubr.bf16.mxu1 %v729_v54  ;;  %v4981_v6 = vpack.c.bf16 %v4032_v5, %v4031_v3  ;;  %v1087_v7 = vpop.f32.mrb[3].mxu1 }
 0x19b   : > { %3822 = vmatmul.mubr.bf16.vlgmr.msra.gmra.mrb[32].mxu1 %v729_v54  ;;  %v4983_v9 = vpack.c.bf16 %v1087_v7, %v1084_v4 }
 0x19c   : > { %3823 = vmatprep.mubr.bf16.mxu1 %v730_v52  ;;  %v3987_v55 = vpop.f32.mrb[4].mxu0 }
 0x19d   : > { %v618_v56 = vpop.f32.mrb[5].mxu0 }
 0x19e   : > { %v3988_v57 = vpop.f32.mrb[6].mxu0 }
 0x19f   : > { %v732_v58 = vpack.c.bf16 %v3988_v57, %v3987_v55  ;;  %v621_v59 = vpop.f32.mrb[7].mxu0  ;;  %v4035_v15 = vpop.f32.mrb[4].mxu1 }
 0x1a0   : > { %v731_v60 = vpack.c.bf16 %v621_v59, %v618_v56  ;;  %v1100_v16 = vpop.f32.mrb[5].mxu1 }
 0x1a1   : > { %v4036_v17 = vpop.f32.mrb[6].mxu1 }
 0x1a2   : > { %v4987_v18 = vpack.c.bf16 %v4036_v17, %v4035_v15  ;;  %v1103_v19 = vpop.f32.mrb[7].mxu1 }
 0x1a3   : > { %3824 = vmatmul.mubr.bf16.gmra.mrb[36].mxu1 %v730_v52  ;;  %v4989_v21 = vpack.c.bf16 %v1103_v19, %v1100_v16 }
 0x1a4   : > { %3825 = vmatprep.mubr.bf16.mxu1 %v731_v60  ;;  %v3991_v61 = vpop.f32.mrb[8].mxu0 }
 0x1a5   : > { %v634_v62 = vpop.f32.mrb[9].mxu0 }
 0x1a6   : > { %v3992_v63 = vpop.f32.mrb[10].mxu0 }
 0x1a7   : > { %v734_v0 = vpack.c.bf16 %v3992_v63, %v3991_v61  ;;  %v637_v1 = vpop.f32.mrb[11].mxu0  ;;  %v4039_v27 = vpop.f32.mrb[8].mxu1 }
 0x1a8   : > { %v733_v2 = vpack.c.bf16 %v637_v1, %v634_v62  ;;  %v1116_v28 = vpop.f32.mrb[9].mxu1 }
 0x1a9   : > { %v4040_v29 = vpop.f32.mrb[10].mxu1 }
 0x1aa   : > { %v4995_v30 = vpack.c.bf16 %v4040_v29, %v4039_v27  ;;  %v1119_v31 = vpop.f32.mrb[11].mxu1  ;;  %v4632_v29 = vmov -inf  }
 0x1ab   : > { %3826 = vmatmul.mubr.bf16.gmra.mrb[40].mxu1 %v731_v60  ;;  %v4997_v33 = vpack.c.bf16 %v1119_v31, %v1116_v28  ;;  %762 = vst.msk [vmem:[#allocation3] sm:$0xff] %vm761_vm0, %v4632_v29  ;;  %763 = vst.msk [vmem:[#allocation3 + $0x8] sm:$0xff] %vm761_vm0, %v4632_v29 }
 0x1ac   : > { %3827 = vmatprep.mubr.bf16.mxu1 %v732_v58  ;;  %v3995_v8 = vpop.f32.mrb[12].mxu0  ;;  %764 = vst.msk [vmem:[#allocation3 + $0x10] sm:$0xff] %vm761_vm0, %v4632_v29  ;;  %765 = vst.msk [vmem:[#allocation3 + $0x18] sm:$0xff] %vm761_vm0, %v4632_v29 }
 0x1ad   : > { %v650_v10 = vpop.f32.mrb[13].mxu0  ;;  %766 = vst.msk [vmem:[#allocation3 + $0x20] sm:$0xff] %vm761_vm0, %v4632_v29  ;;  %767 = vst.msk [vmem:[#allocation3 + $0x28] sm:$0xff] %vm761_vm0, %v4632_v29 }
 0x1ae   : > { %v3996_v11 = vpop.f32.mrb[14].mxu0  ;;  %768 = vst.msk [vmem:[#allocation3 + $0x30] sm:$0xff] %vm761_vm0, %v4632_v29  ;;  %769 = vst.msk [vmem:[#allocation3 + $0x38] sm:$0xff] %vm761_vm0, %v4632_v29 }
 0x1af   : > { %v4985_v12 = vpack.c.bf16 %v3996_v11, %v3995_v8  ;;  %v653_v13 = vpop.f32.mrb[15].mxu0  ;;  %v4043_v39 = vpop.f32.mrb[12].mxu1  ;;  %770 = vst.msk [vmem:[#allocation3 + $0x40] sm:$0xff] %vm761_vm0, %v4632_v29  ;;  %771 = vst.msk [vmem:[#allocation3 + $0x48] sm:$0xff] %vm761_vm0, %v4632_v29 }
 0x1b0   : > { %v735_v14 = vpack.c.bf16 %v653_v13, %v650_v10  ;;  %v1132_v40 = vpop.f32.mrb[13].mxu1  ;;  %772 = vst.msk [vmem:[#allocation3 + $0x50] sm:$0xff] %vm761_vm0, %v4632_v29  ;;  %773 = vst.msk [vmem:[#allocation3 + $0x58] sm:$0xff] %vm761_vm0, %v4632_v29 }
 0x1b1   : > { %v4044_v41 = vpop.f32.mrb[14].mxu1  ;;  %774 = vst.msk [vmem:[#allocation3 + $0x60] sm:$0xff] %vm761_vm0, %v4632_v29  ;;  %775 = vst.msk [vmem:[#allocation3 + $0x68] sm:$0xff] %vm761_vm0, %v4632_v29 }
 0x1b2   : > { %v5003_v42 = vpack.c.bf16 %v4044_v41, %v4043_v39  ;;  %v1135_v43 = vpop.f32.mrb[15].mxu1  ;;  %776 = vst.msk [vmem:[#allocation3 + $0x70] sm:$0xff] %vm761_vm0, %v4632_v29  ;;  %777 = vst.msk [vmem:[#allocation3 + $0x78] sm:$0xff] %vm761_vm0, %v4632_v29 }
 0x1b3   : > { %3828 = vmatmul.mubr.bf16.gmra.mrb[44].mxu1 %v732_v58  ;;  %v5005_v45 = vpack.c.bf16 %v1135_v43, %v1132_v40  ;;  %778 = vst.msk [vmem:[#allocation3 + $0x80] sm:$0xff] %vm761_vm0, %v4632_v29  ;;  %779 = vst.msk [vmem:[#allocation3 + $0x88] sm:$0xff] %vm761_vm0, %v4632_v29 }
 0x1b4   : > { %3829 = vmatprep.mubr.bf16.mxu1 %v733_v2  ;;  %v3999_v20 = vpop.f32.mrb[16].mxu0  ;;  %780 = vst.msk [vmem:[#allocation3 + $0x90] sm:$0xff] %vm761_vm0, %v4632_v29  ;;  %781 = vst.msk [vmem:[#allocation3 + $0x98] sm:$0xff] %vm761_vm0, %v4632_v29 }
 0x1b5   : > { %v666_v22 = vpop.f32.mrb[17].mxu0  ;;  %782 = vst.msk [vmem:[#allocation3 + $0xa0] sm:$0xff] %vm761_vm0, %v4632_v29  ;;  %783 = vst.msk [vmem:[#allocation3 + $0xa8] sm:$0xff] %vm761_vm0, %v4632_v29 }
 0x1b6   : > { %v4000_v23 = vpop.f32.mrb[18].mxu0  ;;  %784 = vst.msk [vmem:[#allocation3 + $0xb0] sm:$0xff] %vm761_vm0, %v4632_v29  ;;  %785 = vst.msk [vmem:[#allocation3 + $0xb8] sm:$0xff] %vm761_vm0, %v4632_v29 }
 0x1b7   : > { %v4991_v24 = vpack.c.bf16 %v4000_v23, %v3999_v20  ;;  %v669_v25 = vpop.f32.mrb[19].mxu0  ;;  %v4047_v51 = vpop.f32.mrb[16].mxu1  ;;  %786 = vst.msk [vmem:[#allocation3 + $0xc0] sm:$0xff] %vm761_vm0, %v4632_v29  ;;  %787 = vst.msk [vmem:[#allocation3 + $0xc8] sm:$0xff] %vm761_vm0, %v4632_v29 }
 0x1b8   : > { %v4993_v26 = vpack.c.bf16 %v669_v25, %v666_v22  ;;  %v1148_v52 = vpop.f32.mrb[17].mxu1  ;;  %788 = vst.msk [vmem:[#allocation3 + $0xd0] sm:$0xff] %vm761_vm0, %v4632_v29  ;;  %789 = vst.msk [vmem:[#allocation3 + $0xd8] sm:$0xff] %vm761_vm0, %v4632_v29 }
 0x1b9   : > { %v4048_v53 = vpop.f32.mrb[18].mxu1  ;;  %790 = vst.msk [vmem:[#allocation3 + $0xe0] sm:$0xff] %vm761_vm0, %v4632_v29  ;;  %791 = vst.msk [vmem:[#allocation3 + $0xe8] sm:$0xff] %vm761_vm0, %v4632_v29 }
 0x1ba   : > { %v1220_v54 = vpack.c.bf16 %v4048_v53, %v4047_v51  ;;  %v1151_v55 = vpop.f32.mrb[19].mxu1  ;;  %792 = vst.msk [vmem:[#allocation3 + $0xf0] sm:$0xff] %vm761_vm0, %v4632_v29  ;;  %793 = vst.msk [vmem:[#allocation3 + $0xf8] sm:$0xff] %vm761_vm0, %v4632_v29 }
 0x1bb   : > { %3830 = vmatmul.mubr.bf16.gmra.mrb[48].mxu1 %v733_v2  ;;  %v1219_v57 = vpack.c.bf16 %v1151_v55, %v1148_v52 }
 0x1bc   : > { %3831 = vmatprep.mubr.bf16.mxu1 %v734_v0  ;;  %v4003_v32 = vpop.f32.mrb[20].mxu0 }
 0x1bd   : > { %v682_v34 = vpop.f32.mrb[21].mxu0  ;;  %3853 = vmatprep.subr.bf16.mxu0 %v1219_v57  ;;  %4061 = vmatprep.subr.bf16.mxu1 %v1219_v57 }
 0x1be   : > { %v4004_v35 = vpop.f32.mrb[22].mxu0  ;;  %3854 = vmatpush3.bf16.msra.mxu0 %v4983_v9  ;;  %4069 = vmatpush3.bf16.msra.mxu1 %v4983_v9 }
 0x1bf   : > { %v4999_v36 = vpack.c.bf16 %v4004_v35, %v4003_v32  ;;  %v685_v37 = vpop.f32.mrb[23].mxu0  ;;  %v4051_v63 = vpop.f32.mrb[20].mxu1  ;;  %3855 = vmatprep.subr.bf16.mxu0 %v1220_v54  ;;  %4062 = vmatprep.subr.bf16.mxu1 %v1220_v54 }
 0x1c0   : > { %v5001_v38 = vpack.c.bf16 %v685_v37, %v682_v34 }
 0x1c2   : > { %3856 = vmatpush3.bf16.msra.mxu0 %v4981_v6  ;;  %4070 = vmatpush3.bf16.msra.mxu1 %v4981_v6 }
 0x1c3   : > { %3832 = vmatmul.mubr.bf16.gmra.mrb[52].mxu1 %v734_v0  ;;  %v1164_v0 = vpop.f32.mrb[21].mxu1 }
 0x1c4   : > { %3833 = vmatprep.mubr.bf16.mxu1 %v735_v14  ;;  %v4007_v44 = vpop.f32.mrb[24].mxu0  ;;  %v4052_v1 = vpop.f32.mrb[22].mxu1 }
 0x1c5   : > { %v698_v46 = vpop.f32.mrb[25].mxu0  ;;  %v1222_v2 = vpack.c.bf16 %v4052_v1, %v4051_v63  ;;  %v1167_v3 = vpop.f32.mrb[23].mxu1 }
 0x1c6   : > { %v4008_v47 = vpop.f32.mrb[26].mxu0  ;;  %v1221_v4 = vpack.c.bf16 %v1167_v3, %v1164_v0 }
 0x1c7   : > { %v5007_v48 = vpack.c.bf16 %v4008_v47, %v4007_v44  ;;  %v701_v49 = vpop.f32.mrb[27].mxu0  ;;  %v4055_v5 = vpop.f32.mrb[24].mxu1 }
 0x1c8   : > { %v5009_v50 = vpack.c.bf16 %v701_v49, %v698_v46  ;;  %3857 = vmatprep.subr.bf16.mxu0 %v1221_v4  ;;  %4063 = vmatprep.subr.bf16.mxu1 %v1221_v4  ;;  %v1180_v7 = vpop.f32.mrb[25].mxu1  ;;  %v4634_v4 = vmov 0.0  }
 0x1c9   : > { %3858 = vmatpush3.bf16.msra.mxu0 %v4989_v21  ;;  %4071 = vmatpush3.bf16.msra.mxu1 %v4989_v21  ;;  %v4056_v8 = vpop.f32.mrb[26].mxu1  ;;  %v1285_v21 = vlaneseq  ;;  %795 = vst.msk [vmem:[#allocation4 + $0x8] sm:$0xff] %vm761_vm0, %v4634_v4  ;;  %794 = vst.msk [vmem:[#allocation4] sm:$0xff] %vm761_vm0, %v4634_v4 }
 0x1ca   : > { %3859 = vmatprep.subr.bf16.mxu0 %v1222_v2  ;;  %4064 = vmatprep.subr.bf16.mxu1 %v1222_v2  ;;  %v1224_v9 = vpack.c.bf16 %v4056_v8, %v4055_v5  ;;  %v1183_v10 = vpop.f32.mrb[27].mxu1  ;;  %796 = vst.msk [vmem:[#allocation4 + $0x10] sm:$0xff] %vm761_vm0, %v4634_v4  ;;  %797 = vst.msk [vmem:[#allocation4 + $0x18] sm:$0xff] %vm761_vm0, %v4634_v4 }
 0x1cb   : > { %3834 = vmatmul.mubr.bf16.gmra.mrb[56].mxu1 %v735_v14  ;;  %v1223_v6 = vpack.c.bf16 %v1183_v10, %v1180_v7  ;;  %v1286_v22 = vshrl.u32 %v1285_v21, 7  ;;  %798 = vst.msk [vmem:[#allocation4 + $0x20] sm:$0xff] %vm761_vm0, %v4634_v4  ;;  %799 = vst.msk [vmem:[#allocation4 + $0x28] sm:$0xff] %vm761_vm0, %v4634_v4 }
 0x1cc   : > { %3835 = vmatprep.mubr.bf16.mxu1 %v4985_v12  ;;  %v4011_v56 = vpop.f32.mrb[28].mxu0  ;;  %800 = vst.msk [vmem:[#allocation4 + $0x30] sm:$0xff] %vm761_vm0, %v4634_v4  ;;  %801 = vst.msk [vmem:[#allocation4 + $0x38] sm:$0xff] %vm761_vm0, %v4634_v4 }
 0x1cd   : > { %v714_v58 = vpop.f32.mrb[29].mxu0  ;;  %3860 = vmatpush3.bf16.msra.mxu0 %v4987_v18  ;;  %4072 = vmatpush3.bf16.msra.mxu1 %v4987_v18  ;;  %v1287_v23 = vsub.s32 0, %v1286_v22  ;;  %802 = vst.msk [vmem:[#allocation4 + $0x40] sm:$0xff] %vm761_vm0, %v4634_v4  ;;  %803 = vst.msk [vmem:[#allocation4 + $0x48] sm:$0xff] %vm761_vm0, %v4634_v4 }
 0x1ce   : > { %v4012_v59 = vpop.f32.mrb[30].mxu0  ;;  %3861 = vmatprep.subr.bf16.mxu0 %v1223_v6  ;;  %4065 = vmatprep.subr.bf16.mxu1 %v1223_v6  ;;  %804 = vst.msk [vmem:[#allocation4 + $0x50] sm:$0xff] %vm761_vm0, %v4634_v4  ;;  %805 = vst.msk [vmem:[#allocation4 + $0x58] sm:$0xff] %vm761_vm0, %v4634_v4 }
 0x1cf   : > { %v5012_v60 = vpack.c.bf16 %v4012_v59, %v4011_v56  ;;  %v717_v61 = vpop.f32.mrb[31].mxu0  ;;  %v4059_v11 = vpop.f32.mrb[28].mxu1  ;;  %v4633_v56 = vmov 0   ;;  %806 = vst.msk [vmem:[#allocation4 + $0x60] sm:$0xff] %vm761_vm0, %v4634_v4  ;;  %807 = vst.msk [vmem:[#allocation4 + $0x68] sm:$0xff] %vm761_vm0, %v4634_v4 }
 0x1d0   : > { %v5016_v62 = vpack.c.bf16 %v717_v61, %v714_v58  ;;  %4172 = vset.pattern.permute.xlu0 %v4633_v56  ;;  %4173 = vset.pattern.permute.xlu1 %v4633_v56  ;;  %808 = vst.msk [vmem:[#allocation4 + $0x70] sm:$0xff] %vm761_vm0, %v4634_v4  ;;  %809 = vst.msk [vmem:[#allocation4 + $0x78] sm:$0xff] %vm761_vm0, %v4634_v4 }
 0x1d1   : > { %3862 = vmatpush3.bf16.msra.mxu0 %v4997_v33  ;;  %4073 = vmatpush3.bf16.msra.mxu1 %v4997_v33  ;;  %810 = vst.msk [vmem:[#allocation4 + $0x80] sm:$0xff] %vm761_vm0, %v4634_v4  ;;  %811 = vst.msk [vmem:[#allocation4 + $0x88] sm:$0xff] %vm761_vm0, %v4634_v4 }
 0x1d2   : > { %3863 = vmatprep.subr.bf16.mxu0 %v1224_v9  ;;  %4066 = vmatprep.subr.bf16.mxu1 %v1224_v9  ;;  %812 = vst.msk [vmem:[#allocation4 + $0x90] sm:$0xff] %vm761_vm0, %v4634_v4  ;;  %813 = vst.msk [vmem:[#allocation4 + $0x98] sm:$0xff] %vm761_vm0, %v4634_v4 }
 0x1d3   : > { %3836 = vmatmul.mubr.bf16.gmra.mrb[60].mxu1 %v4985_v12  ;;  %v1196_v12 = vpop.f32.mrb[29].mxu1  ;;  %814 = vst.msk [vmem:[#allocation4 + $0xa0] sm:$0xff] %vm761_vm0, %v4634_v4  ;;  %815 = vst.msk [vmem:[#allocation4 + $0xa8] sm:$0xff] %vm761_vm0, %v4634_v4 }
 0x1d4   : > { %3837 = vmatprep.mubr.bf16.mxu1 %v4993_v26  ;;  %v4060_v13 = vpop.f32.mrb[30].mxu1  ;;  %816 = vst.msk [vmem:[#allocation4 + $0xb0] sm:$0xff] %vm761_vm0, %v4634_v4  ;;  %817 = vst.msk [vmem:[#allocation4 + $0xb8] sm:$0xff] %vm761_vm0, %v4634_v4 }
 0x1d5   : > { %v1226_v14 = vpack.c.bf16 %v4060_v13, %v4059_v11  ;;  %v1199_v15 = vpop.f32.mrb[31].mxu1  ;;  %3864 = vmatpush3.bf16.msra.mxu0 %v4995_v30  ;;  %4074 = vmatpush3.bf16.msra.mxu1 %v4995_v30  ;;  %818 = vst.msk [vmem:[#allocation4 + $0xc0] sm:$0xff] %vm761_vm0, %v4634_v4  ;;  %819 = vst.msk [vmem:[#allocation4 + $0xc8] sm:$0xff] %vm761_vm0, %v4634_v4 }
 0x1d6   : > { %v1225_v16 = vpack.c.bf16 %v1199_v15, %v1196_v12  ;;  %820 = vst.msk [vmem:[#allocation4 + $0xd0] sm:$0xff] %vm761_vm0, %v4634_v4  ;;  %821 = vst.msk [vmem:[#allocation4 + $0xd8] sm:$0xff] %vm761_vm0, %v4634_v4 }
 0x1d7   : > { %822 = vst.msk [vmem:[#allocation4 + $0xe0] sm:$0xff] %vm761_vm0, %v4634_v4  ;;  %823 = vst.msk [vmem:[#allocation4 + $0xe8] sm:$0xff] %vm761_vm0, %v4634_v4 }
 0x1d8   : > { %3865 = vmatprep.subr.bf16.mxu0 %v1225_v16  ;;  %4067 = vmatprep.subr.bf16.mxu1 %v1225_v16  ;;  %824 = vst.msk [vmem:[#allocation4 + $0xf0] sm:$0xff] %vm761_vm0, %v4634_v4  ;;  %825 = vst.msk [vmem:[#allocation4 + $0xf8] sm:$0xff] %vm761_vm0, %v4634_v4 }
 0x1d9   : > { %3866 = vmatpush3.bf16.msra.mxu0 %v5005_v45  ;;  %4075 = vmatpush3.bf16.msra.mxu1 %v5005_v45  ;;  %v1278_v17 = vpop.f32.mrb[32].mxu0 }
 0x1da   : > { %3867 = vmatprep.subr.bf16.mxu0 %v1226_v14  ;;  %4068 = vmatprep.subr.bf16.mxu1 %v1226_v14  ;;  %v1280_v18 = vpop.f32.mrb[33].mxu0 }
 0x1db   : > { %3838 = vmatmul.mubr.bf16.gmra.mrb[64].mxu1 %v4993_v26  ;;  %v1282_v19 = vpop.f32.mrb[34].mxu0  ;;  %v5051_v25 = vrot.slane %v1280_v18, %v1287_v23 }
 0x1dc   : > { %3839 = vmatprep.mubr.bf16.mxu1 %v4991_v24  ;;  %v1283_v20 = vpop.f32.mrb[35].mxu0 }
 0x1dd   : > { %3868 = vmatpush3.bf16.msra.mxu0 %v5003_v42  ;;  %4076 = vmatpush3.bf16.msra.mxu1 %v5003_v42 }
 0x1e3   : > { %3840 = vmatmul.mubr.bf16.gmra.mrb[68].mxu1 %v4991_v24  ;;  %v5049_v24 = vrot.slane %v1278_v17, %v1287_v23 }
 0x1e4   : > { %3841 = vmatprep.mubr.bf16.mxu1 %v5001_v38 }
 0x1eb   : > { %3842 = vmatmul.mubr.bf16.gmra.mrb[72].mxu1 %v5001_v38 }
 0x1ec   : > { %3843 = vmatprep.mubr.bf16.mxu1 %v4999_v36 }
 0x1f3   : > { %3844 = vmatmul.mubr.bf16.gmra.mrb[76].mxu1 %v4999_v36 }
 0x1f4   : > { %3845 = vmatprep.mubr.bf16.mxu1 %v5009_v50 }
 0x1fb   : > { %3846 = vmatmul.mubr.bf16.gmra.mrb[80].mxu1 %v5009_v50 }
 0x1fc   : > { %3847 = vmatprep.mubr.bf16.mxu1 %v5007_v48 }
 0x203   : > { %3848 = vmatmul.mubr.bf16.gmra.mrb[84].mxu1 %v5007_v48 }
 0x204   : > { %3849 = vmatprep.mubr.bf16.mxu1 %v5016_v62 }
 0x20b   : > { %3850 = vmatmul.mubr.bf16.gmra.mrb[88].mxu1 %v5016_v62 }
 0x20c   : > { %3851 = vmatprep.mubr.bf16.mxu1 %v5012_v60 }
 0x213   : > { %3852 = vmatmul.mubr.bf16.gmra.mrb[92].mxu1 %v5012_v60 }
 0x26e   : > { %v1327_v26 = vpop.f32.mrb[32].mxu1 }
 0x26f   : > { %v5054_v27 = vadd.f32 %v1327_v26, %v5049_v24  ;;  %v1329_v28 = vpop.f32.mrb[33].mxu1 }
 0x270   : > { %v5089_v30 = vadd.f32 %v1329_v28, %v5051_v25  ;;  %v1331_v31 = vpop.f32.mrb[34].mxu1 }
 0x271   : > { %v1333_v32 = vpop.f32.mrb[35].mxu1  ;;  %v5092_v33 = vadd.f32 %v1331_v31, %v5049_v24 }
 0x272   : > { %v5095_v34 = vadd.f32 %v1333_v32, %v5051_v25  ;;  %v1518_v35 = vmax.f32 %v5054_v27, %v5089_v30 }
 0x274   : > { %1519 = vmax.xlane.f32.xlu0 %v1518_v35  ;;  %v1521_v37 = vmax.f32 %v5092_v33, %v5095_v34 }
 0x276   : > { %v1337_v36 = vpop.f32.mrb[36].mxu1 }
 0x277   : > { %v5102_v38 = vadd.f32 %v1337_v36, %v5049_v24  ;;  %v1339_v39 = vpop.f32.mrb[37].mxu1 }
 0x278   : > { %v5105_v40 = vadd.f32 %v1339_v39, %v5051_v25  ;;  %v1341_v41 = vpop.f32.mrb[38].mxu1  ;;  %1522 = vmax.xlane.f32.xlu0 %v1521_v37 }
 0x279   : > { %v1343_v42 = vpop.f32.mrb[39].mxu1  ;;  %v5108_v43 = vadd.f32 %v1341_v41, %v5049_v24 }
 0x27a   : > { %v5111_v44 = vadd.f32 %v1343_v42, %v5051_v25  ;;  %v1524_v45 = vmax.f32 %v5102_v38, %v5105_v40 }
 0x27c   : > { %1525 = vmax.xlane.f32.xlu1 %v1524_v45  ;;  %v1527_v47 = vmax.f32 %v5108_v43, %v5111_v44 }
 0x27e   : > { %v1347_v46 = vpop.f32.mrb[40].mxu1 }
 0x27f   : > { %v5118_v48 = vadd.f32 %v1347_v46, %v5049_v24  ;;  %v1349_v49 = vpop.f32.mrb[41].mxu1 }
 0x280   : > { %v5121_v50 = vadd.f32 %v1349_v49, %v5051_v25  ;;  %v1351_v51 = vpop.f32.mrb[42].mxu1  ;;  %1528 = vmax.xlane.f32.xlu1 %v1527_v47 }
 0x281   : > { %v5124_v52 = vadd.f32 %v1351_v51, %v5049_v24  ;;  %v1353_v53 = vpop.f32.mrb[43].mxu1 }
 0x282   : > { %v5127_v54 = vadd.f32 %v1353_v53, %v5051_v25  ;;  %v1530_v55 = vmax.f32 %v5118_v48, %v5121_v50 }
 0x283   : > { %6532 = vst [vmem:[#allocation24_spill] sm:$0xff] %v5124_v52 }
 0x284   : > { %6533 = vst [vmem:[#allocation25_spill] sm:$0xff] %v5127_v54  ;;  %1531 = vmax.xlane.f32.xlu0 %v1530_v55  ;;  %v1533_v57 = vmax.f32 %v5124_v52, %v5127_v54 }
 0x286   : > { %v1357_v58 = vpop.f32.mrb[44].mxu1  ;;  %1534 = vmax.xlane.f32.xlu1 %v1533_v57 }
 0x287   : > { %v5134_v59 = vadd.f32 %v1357_v58, %v5049_v24  ;;  %v1359_v60 = vpop.f32.mrb[45].mxu1 }
 0x288   : > { %v5137_v61 = vadd.f32 %v1359_v60, %v5051_v25  ;;  %v1361_v62 = vpop.f32.mrb[46].mxu1 }
 0x289   : > { %6534 = vst [vmem:[#allocation26_spill] sm:$0xff] %v5134_v59  ;;  %v5140_v63 = vadd.f32 %v1361_v62, %v5049_v24  ;;  %v1363_v0 = vpop.f32.mrb[47].mxu1 }
 0x28a   : > { %6535 = vst [vmem:[#allocation27_spill] sm:$0xff] %v5137_v61  ;;  %v5143_v1 = vadd.f32 %v1363_v0, %v5051_v25  ;;  %v1536_v2 = vmax.f32 %v5134_v59, %v5137_v61  ;;  %v5615_v61 = vld [vmem:[#allocation3 + $0xc8] sm:$0xff]  ;;  %v5629_v59 = vld [vmem:[#allocation3 + $0xd0] sm:$0xff] }
 0x28b   : > { %6536 = vst [vmem:[#allocation28_spill] sm:$0xff] %v5140_v63  ;;  %6591 = vst [vmem:[#allocation83_spill] sm:$0xff] %v5615_v61 }
 0x28c   : > { %6537 = vst [vmem:[#allocation29_spill] sm:$0xff] %v5143_v1  ;;  %1537 = vmax.xlane.f32.xlu0 %v1536_v2  ;;  %v1539_v3 = vmax.f32 %v5140_v63, %v5143_v1  ;;  %6594 = vst [vmem:[#allocation86_spill] sm:$0xff] %v5629_v59 }
 0x28e   : > { %v1367_v5 = vpop.f32.mrb[48].mxu1  ;;  %1540 = vmax.xlane.f32.xlu1 %v1539_v3 }
 0x28f   : > { %v5182_v7 = vadd.f32 %v1367_v5, %v5049_v24  ;;  %v1369_v8 = vpop.f32.mrb[49].mxu1 }
 0x290   : > { %v5185_v9 = vadd.f32 %v1369_v8, %v5051_v25  ;;  %v1371_v10 = vpop.f32.mrb[50].mxu1 }
 0x291   : > { %6538 = vst [vmem:[#allocation30_spill] sm:$0xff] %v5182_v7  ;;  %v5188_v6 = vadd.f32 %v1371_v10, %v5049_v24  ;;  %v1373_v11 = vpop.f32.mrb[51].mxu1 }
 0x292   : > { %6539 = vst [vmem:[#allocation31_spill] sm:$0xff] %v5185_v9  ;;  %v5191_v12 = vadd.f32 %v1373_v11, %v5051_v25  ;;  %v1542_v13 = vmax.f32 %v5182_v7, %v5185_v9  ;;  %v5595_v9 = vld [vmem:[#allocation3 + $0xb8] sm:$0xff] }
 0x293   : > { %6540 = vst [vmem:[#allocation32_spill] sm:$0xff] %v5188_v6  ;;  %6587 = vst [vmem:[#allocation79_spill] sm:$0xff] %v5595_v9 }
 0x294   : > { %6541 = vst [vmem:[#allocation33_spill] sm:$0xff] %v5191_v12  ;;  %1543 = vmax.xlane.f32.xlu0 %v1542_v13  ;;  %v1545_v14 = vmax.f32 %v5188_v6, %v5191_v12 }
 0x296   : > { %v1377_v15 = vpop.f32.mrb[52].mxu1  ;;  %1546 = vmax.xlane.f32.xlu1 %v1545_v14 }
 0x297   : > { %v5198_v16 = vadd.f32 %v1377_v15, %v5049_v24  ;;  %v1379_v17 = vpop.f32.mrb[53].mxu1 }
 0x298   : > { %v5201_v18 = vadd.f32 %v1379_v17, %v5051_v25  ;;  %v1381_v19 = vpop.f32.mrb[54].mxu1 }
 0x299   : > { %6542 = vst [vmem:[#allocation34_spill] sm:$0xff] %v5198_v16  ;;  %v5204_v20 = vadd.f32 %v1381_v19, %v5049_v24  ;;  %v1383_v21 = vpop.f32.mrb[55].mxu1 }
 0x29a   : > { %6543 = vst [vmem:[#allocation35_spill] sm:$0xff] %v5201_v18  ;;  %v5207_v22 = vadd.f32 %v1383_v21, %v5051_v25  ;;  %v1548_v23 = vmax.f32 %v5198_v16, %v5201_v18  ;;  %v5575_v18 = vld [vmem:[#allocation3 + $0xa8] sm:$0xff] }
 0x29b   : > { %6544 = vst [vmem:[#allocation36_spill] sm:$0xff] %v5204_v20 }
 0x29c   : > { %6545 = vst [vmem:[#allocation37_spill] sm:$0xff] %v5207_v22  ;;  %1549 = vmax.xlane.f32.xlu0 %v1548_v23  ;;  %v1551_v26 = vmax.f32 %v5204_v20, %v5207_v22 }
 0x29e   : > { %v1387_v28 = vpop.f32.mrb[56].mxu1  ;;  %1552 = vmax.xlane.f32.xlu1 %v1551_v26 }
 0x29f   : > { %v5214_v29 = vadd.f32 %v1387_v28, %v5049_v24  ;;  %v1389_v31 = vpop.f32.mrb[57].mxu1 }
 0x2a0   : > { %v5217_v32 = vadd.f32 %v1389_v31, %v5051_v25  ;;  %v1391_v35 = vpop.f32.mrb[58].mxu1 }
 0x2a1   : > { %6546 = vst [vmem:[#allocation38_spill] sm:$0xff] %v5214_v29  ;;  %v5220_v36 = vadd.f32 %v1391_v35, %v5049_v24  ;;  %v1393_v37 = vpop.f32.mrb[59].mxu1 }
 0x2a2   : > { %6547 = vst [vmem:[#allocation39_spill] sm:$0xff] %v5217_v32  ;;  %v5223_v39 = vadd.f32 %v1393_v37, %v5051_v25  ;;  %v1554_v41 = vmax.f32 %v5214_v29, %v5217_v32  ;;  %v5555_v32 = vld [vmem:[#allocation3 + $0x98] sm:$0xff] }
 0x2a3   : > { %6548 = vst [vmem:[#allocation40_spill] sm:$0xff] %v5220_v36 }
 0x2a4   : > { %6549 = vst [vmem:[#allocation41_spill] sm:$0xff] %v5223_v39  ;;  %1555 = vmax.xlane.f32.xlu0 %v1554_v41  ;;  %v1557_v42 = vmax.f32 %v5220_v36, %v5223_v39 }
 0x2a6   : > { %v1397_v45 = vpop.f32.mrb[60].mxu1  ;;  %1558 = vmax.xlane.f32.xlu1 %v1557_v42 }
 0x2a7   : > { %v5230_v46 = vadd.f32 %v1397_v45, %v5049_v24  ;;  %v1399_v47 = vpop.f32.mrb[61].mxu1 }
 0x2a8   : > { %v5233_v49 = vadd.f32 %v1399_v47, %v5051_v25  ;;  %v1401_v51 = vpop.f32.mrb[62].mxu1 }
 0x2a9   : > { %6550 = vst [vmem:[#allocation42_spill] sm:$0xff] %v5230_v46  ;;  %v5236_v53 = vadd.f32 %v1401_v51, %v5049_v24  ;;  %v1403_v55 = vpop.f32.mrb[63].mxu1 }
 0x2aa   : > { %6551 = vst [vmem:[#allocation43_spill] sm:$0xff] %v5233_v49  ;;  %v5239_v56 = vadd.f32 %v1403_v55, %v5051_v25  ;;  %v1560_v57 = vmax.f32 %v5230_v46, %v5233_v49  ;;  %v5535_v49 = vld [vmem:[#allocation3 + $0x88] sm:$0xff] }
 0x2ab   : > { %6552 = vst [vmem:[#allocation44_spill] sm:$0xff] %v5236_v53 }
 0x2ac   : > { %6553 = vst [vmem:[#allocation45_spill] sm:$0xff] %v5239_v56  ;;  %1561 = vmax.xlane.f32.xlu0 %v1560_v57  ;;  %v1563_v58 = vmax.f32 %v5236_v53, %v5239_v56 }
 0x2ae   : > { %v1407_v60 = vpop.f32.mrb[64].mxu1  ;;  %1564 = vmax.xlane.f32.xlu1 %v1563_v58 }
 0x2af   : > { %v5246_v62 = vadd.f32 %v1407_v60, %v5049_v24  ;;  %v1409_v0 = vpop.f32.mrb[65].mxu1 }
 0x2b0   : > { %v5249_v2 = vadd.f32 %v1409_v0, %v5051_v25  ;;  %v1411_v3 = vpop.f32.mrb[66].mxu1 }
 0x2b1   : > { %6554 = vst [vmem:[#allocation46_spill] sm:$0xff] %v5246_v62  ;;  %v5252_v4 = vadd.f32 %v1411_v3, %v5049_v24  ;;  %v1413_v5 = vpop.f32.mrb[67].mxu1 }
 0x2b2   : > { %6555 = vst [vmem:[#allocation47_spill] sm:$0xff] %v5249_v2  ;;  %v5255_v8 = vadd.f32 %v1413_v5, %v5051_v25  ;;  %v1566_v10 = vmax.f32 %v5246_v62, %v5249_v2  ;;  %v5515_v2 = vld [vmem:[#allocation3 + $0x78] sm:$0xff] }
 0x2b3   : > { %6556 = vst [vmem:[#allocation48_spill] sm:$0xff] %v5252_v4 }
 0x2b4   : > { %6557 = vst [vmem:[#allocation49_spill] sm:$0xff] %v5255_v8  ;;  %1567 = vmax.xlane.f32.xlu0 %v1566_v10  ;;  %v1569_v11 = vmax.f32 %v5252_v4, %v5255_v8 }
 0x2b6   : > { %v1417_v13 = vpop.f32.mrb[68].mxu1  ;;  %1570 = vmax.xlane.f32.xlu1 %v1569_v11 }
 0x2b7   : > { %v5262_v14 = vadd.f32 %v1417_v13, %v5049_v24  ;;  %v1419_v15 = vpop.f32.mrb[69].mxu1 }
 0x2b8   : > { %v5265_v17 = vadd.f32 %v1419_v15, %v5051_v25  ;;  %v1421_v19 = vpop.f32.mrb[70].mxu1 }
 0x2b9   : > { %6558 = vst [vmem:[#allocation50_spill] sm:$0xff] %v5262_v14  ;;  %v5268_v21 = vadd.f32 %v1421_v19, %v5049_v24  ;;  %v1423_v23 = vpop.f32.mrb[71].mxu1 }
 0x2ba   : > { %6559 = vst [vmem:[#allocation51_spill] sm:$0xff] %v5265_v17  ;;  %v5271_v26 = vadd.f32 %v1423_v23, %v5051_v25  ;;  %v1572_v28 = vmax.f32 %v5262_v14, %v5265_v17  ;;  %v5495_v17 = vld [vmem:[#allocation3 + $0x68] sm:$0xff] }
 0x2bb   : > { %6560 = vst [vmem:[#allocation52_spill] sm:$0xff] %v5268_v21 }
 0x2bc   : > { %6561 = vst [vmem:[#allocation53_spill] sm:$0xff] %v5271_v26  ;;  %1573 = vmax.xlane.f32.xlu0 %v1572_v28  ;;  %v1575_v31 = vmax.f32 %v5268_v21, %v5271_v26 }
 0x2be   : > { %v1427_v35 = vpop.f32.mrb[72].mxu1  ;;  %1576 = vmax.xlane.f32.xlu1 %v1575_v31 }
 0x2bf   : > { %v5278_v37 = vadd.f32 %v1427_v35, %v5049_v24  ;;  %v1429_v41 = vpop.f32.mrb[73].mxu1 }
 0x2c0   : > { %v5281_v42 = vadd.f32 %v1429_v41, %v5051_v25  ;;  %v1431_v45 = vpop.f32.mrb[74].mxu1 }
 0x2c1   : > { %6562 = vst [vmem:[#allocation54_spill] sm:$0xff] %v5278_v37  ;;  %v5284_v47 = vadd.f32 %v1431_v45, %v5049_v24  ;;  %v1433_v51 = vpop.f32.mrb[75].mxu1 }
 0x2c2   : > { %6563 = vst [vmem:[#allocation55_spill] sm:$0xff] %v5281_v42  ;;  %v5287_v55 = vadd.f32 %v1433_v51, %v5051_v25  ;;  %v1578_v57 = vmax.f32 %v5278_v37, %v5281_v42  ;;  %v5475_v42 = vld [vmem:[#allocation3 + $0x58] sm:$0xff] }
 0x2c3   : > { %6564 = vst [vmem:[#allocation56_spill] sm:$0xff] %v5284_v47 }
 0x2c4   : > { %6565 = vst [vmem:[#allocation57_spill] sm:$0xff] %v5287_v55  ;;  %1579 = vmax.xlane.f32.xlu0 %v1578_v57  ;;  %v1581_v58 = vmax.f32 %v5284_v47, %v5287_v55 }
 0x2c6   : > { %v1437_v60 = vpop.f32.mrb[76].mxu1  ;;  %1582 = vmax.xlane.f32.xlu1 %v1581_v58 }
 0x2c7   : > { %v5294_v0 = vadd.f32 %v1437_v60, %v5049_v24  ;;  %v1439_v3 = vpop.f32.mrb[77].mxu1 }
 0x2c8   : > { %v5297_v5 = vadd.f32 %v1439_v3, %v5051_v25  ;;  %v1441_v10 = vpop.f32.mrb[78].mxu1 }
 0x2c9   : > { %6566 = vst [vmem:[#allocation58_spill] sm:$0xff] %v5294_v0  ;;  %v5300_v11 = vadd.f32 %v1441_v10, %v5049_v24  ;;  %v1443_v13 = vpop.f32.mrb[79].mxu1 }
 0x2ca   : > { %6567 = vst [vmem:[#allocation59_spill] sm:$0xff] %v5297_v5  ;;  %v5303_v15 = vadd.f32 %v1443_v13, %v5051_v25  ;;  %v1584_v19 = vmax.f32 %v5294_v0, %v5297_v5  ;;  %v5455_v5 = vld [vmem:[#allocation3 + $0x48] sm:$0xff] }
 0x2cb   : > { %6568 = vst [vmem:[#allocation60_spill] sm:$0xff] %v5300_v11 }
 0x2cc   : > { %6569 = vst [vmem:[#allocation61_spill] sm:$0xff] %v5303_v15  ;;  %1585 = vmax.xlane.f32.xlu0 %v1584_v19  ;;  %v1587_v23 = vmax.f32 %v5300_v11, %v5303_v15 }
 0x2ce   : > { %v1447_v28 = vpop.f32.mrb[80].mxu1  ;;  %1588 = vmax.xlane.f32.xlu1 %v1587_v23 }
 0x2cf   : > { %v5310_v31 = vadd.f32 %v1447_v28, %v5049_v24  ;;  %v1449_v35 = vpop.f32.mrb[81].mxu1 }
 0x2d0   : > { %v5313_v41 = vadd.f32 %v1449_v35, %v5051_v25  ;;  %v1451_v45 = vpop.f32.mrb[82].mxu1 }
 0x2d1   : > { %6570 = vst [vmem:[#allocation62_spill] sm:$0xff] %v5310_v31  ;;  %v5316_v51 = vadd.f32 %v1451_v45, %v5049_v24  ;;  %v1453_v57 = vpop.f32.mrb[83].mxu1 }
 0x2d2   : > { %6571 = vst [vmem:[#allocation63_spill] sm:$0xff] %v5313_v41  ;;  %v5319_v58 = vadd.f32 %v1453_v57, %v5051_v25  ;;  %v1590_v60 = vmax.f32 %v5310_v31, %v5313_v41 }
 0x2d3   : > { %6572 = vst [vmem:[#allocation64_spill] sm:$0xff] %v5316_v51 }
 0x2d4   : > { %6573 = vst [vmem:[#allocation65_spill] sm:$0xff] %v5319_v58  ;;  %1591 = vmax.xlane.f32.xlu0 %v1590_v60  ;;  %v1593_v3 = vmax.f32 %v5316_v51, %v5319_v58 }
 0x2d6   : > { %v1457_v10 = vpop.f32.mrb[84].mxu1  ;;  %1594 = vmax.xlane.f32.xlu1 %v1593_v3 }
 0x2d7   : > { %v5326_v13 = vadd.f32 %v1457_v10, %v5049_v24  ;;  %v1459_v19 = vpop.f32.mrb[85].mxu1 }
 0x2d8   : > { %v5329_v23 = vadd.f32 %v1459_v19, %v5051_v25  ;;  %v1461_v28 = vpop.f32.mrb[86].mxu1 }
 0x2d9   : > { %6574 = vst [vmem:[#allocation66_spill] sm:$0xff] %v5326_v13  ;;  %v5332_v35 = vadd.f32 %v1461_v28, %v5049_v24  ;;  %v1463_v45 = vpop.f32.mrb[87].mxu1 }
 0x2da   : > { %6575 = vst [vmem:[#allocation67_spill] sm:$0xff] %v5329_v23  ;;  %v5335_v57 = vadd.f32 %v1463_v45, %v5051_v25  ;;  %v1596_v60 = vmax.f32 %v5326_v13, %v5329_v23 }
 0x2db   : > { %6576 = vst [vmem:[#allocation68_spill] sm:$0xff] %v5332_v35 }
 0x2dc   : > { %6577 = vst [vmem:[#allocation69_spill] sm:$0xff] %v5335_v57  ;;  %1597 = vmax.xlane.f32.xlu0 %v1596_v60  ;;  %v1599_v3 = vmax.f32 %v5332_v35, %v5335_v57 }
 0x2de   : > { %1600 = vmax.xlane.f32.xlu1 %v1599_v3  ;;  %v1467_v10 = vpop.f32.mrb[88].mxu1 }
 0x2df   : > { %v5342_v19 = vadd.f32 %v1467_v10, %v5049_v24  ;;  %v1469_v58 = vpop.f32.mrb[89].mxu1 }
 0x2e0   : > { %v5345_v28 = vadd.f32 %v1469_v58, %v5051_v25  ;;  %v1471_v51 = vpop.f32.mrb[90].mxu1 }
 0x2e1   : > { %6578 = vst [vmem:[#allocation70_spill] sm:$0xff] %v5342_v19  ;;  %v5348_v45 = vadd.f32 %v1471_v51, %v5049_v24  ;;  %v1473_v41 = vpop.f32.mrb[91].mxu1 }
 0x2e2   : > { %6579 = vst [vmem:[#allocation71_spill] sm:$0xff] %v5345_v28  ;;  %v5351_v23 = vadd.f32 %v1473_v41, %v5051_v25  ;;  %v1602_v60 = vmax.f32 %v5342_v19, %v5345_v28 }
 0x2e3   : > { %6580 = vst [vmem:[#allocation72_spill] sm:$0xff] %v5348_v45 }
 0x2e4   : > { %6581 = vst [vmem:[#allocation73_spill] sm:$0xff] %v5351_v23  ;;  %1603 = vmax.xlane.f32.xlu0 %v1602_v60  ;;  %v1605_v3 = vmax.f32 %v5348_v45, %v5351_v23 }
 0x2e6   : > { %v1477_v10 = vpop.f32.mrb[92].mxu1  ;;  %1606 = vmax.xlane.f32.xlu1 %v1605_v3 }
 0x2e7   : > { %v5358_v58 = vadd.f32 %v1477_v10, %v5049_v24  ;;  %v1479_v57 = vpop.f32.mrb[93].mxu1  ;;  %v5373_v10 = vld [vmem:[#allocation3] sm:$0xff] }
 0x2e8   : > { %v5361_v51 = vadd.f32 %v1479_v57, %v5051_v25  ;;  %v1481_v35 = vpop.f32.mrb[94].mxu1 }
 0x2e9   : > { %6582 = vst [vmem:[#allocation74_spill] sm:$0xff] %v5358_v58  ;;  %v5364_v41 = vadd.f32 %v1481_v35, %v5049_v24  ;;  %v1483_v13 = vpop.f32.mrb[95].mxu1  ;;  %v5378_v24 = vld [vmem:[#allocation3 + $0x8] sm:$0xff] }
 0x2ea   : > { %6583 = vst [vmem:[#allocation75_spill] sm:$0xff] %v5361_v51  ;;  %v5367_v28 = vadd.f32 %v1483_v13, %v5051_v25  ;;  %v1608_v60 = vmax.f32 %v5358_v58, %v5361_v51  ;;  %v5408_v51 = vld [vmem:[#allocation3 + $0x20] sm:$0xff]  ;;  %v5415_v58 = vld [vmem:[#allocation3 + $0x28] sm:$0xff] }
 0x2eb   : > { %6584 = vst [vmem:[#allocation76_spill] sm:$0xff] %v5364_v41 }
 0x2ec   : > { %6585 = vst [vmem:[#allocation77_spill] sm:$0xff] %v5367_v28  ;;  %1609 = vmax.xlane.f32.xlu0 %v1608_v60  ;;  %v1611_v3 = vmax.f32 %v5364_v41, %v5367_v28  ;;  %v5388_v60 = vld [vmem:[#allocation3 + $0x10] sm:$0xff]  ;;  %v5398_v28 = vld [vmem:[#allocation3 + $0x18] sm:$0xff] }
 0x2ee   : > { %1612 = vmax.xlane.f32.xlu1 %v1611_v3 }
 0x301   : > { %v1520_v57 = vpop.xlane.xlu0 %1519 }
 0x302   : > { %v5376_v23 = vmax.f32 %v5373_v10, %v1520_v57 }
 0x304   : > { %2832 = vst.msk [vmem:[#allocation3] sm:$0xff] %vm761_vm0, %v5376_v23  ;;  %1744 = vperm.xlu0 %4172, %v5376_v23  }
 0x305   : > { %v1523_v13 = vpop.xlane.xlu0 %1522 }
 0x306   : > { %v5386_v35 = vmax.f32 %v5378_v24, %v1523_v13 }
 0x308   : > { %2833 = vst.msk [vmem:[#allocation3 + $0x8] sm:$0xff] %vm761_vm0, %v5386_v35  ;;  %1749 = vperm.xlu1 %4173, %v5386_v35  }
 0x309   : > { %v1526_v57 = vpop.xlane.xlu1 %1525 }
 0x30a   : > { %v5396_v25 = vmax.f32 %v5388_v60, %v1526_v57 }
 0x30c   : > { %2834 = vst.msk [vmem:[#allocation3 + $0x10] sm:$0xff] %vm761_vm0, %v5396_v25  ;;  %1754 = vperm.xlu1 %4173, %v5396_v25  }
 0x30d   : > { %v1529_v3 = vpop.xlane.xlu1 %1528 }
 0x30e   : > { %v5406_v41 = vmax.f32 %v5398_v28, %v1529_v3  ;;  %v5435_v3 = vld [vmem:[#allocation3 + $0x38] sm:$0xff] }
 0x310   : > { %2835 = vst.msk [vmem:[#allocation3 + $0x18] sm:$0xff] %vm761_vm0, %v5406_v41  ;;  %1759 = vperm.xlu1 %4173, %v5406_v41  }
 0x311   : > { %v1532_v13 = vpop.xlane.xlu0 %1531 }
 0x312   : > { %v5418_v45 = vmax.f32 %v5408_v51, %v1532_v13  ;;  %v5432_v13 = vld [vmem:[#allocation3 + $0x30] sm:$0xff] }
 0x313   : > { %v1535_v19 = vpop.xlane.xlu1 %1534 }
 0x314   : > { %2836 = vst.msk [vmem:[#allocation3 + $0x20] sm:$0xff] %vm761_vm0, %v5418_v45  ;;  %v5425_v57 = vmax.f32 %v5415_v58, %v1535_v19  ;;  %1764 = vperm.xlu1 %4173, %v5418_v45  }
 0x316   : > { %2837 = vst.msk [vmem:[#allocation3 + $0x28] sm:$0xff] %vm761_vm0, %v5425_v57 }
 0x318   : > { %1769 = vperm.xlu1 %4173, %v5425_v57  }
 0x319   : > { %v1538_v15 = vpop.xlane.xlu0 %1537 }
 0x31a   : > { %v5438_v11 = vmax.f32 %v5432_v13, %v1538_v15  ;;  %v5452_v15 = vld [vmem:[#allocation3 + $0x40] sm:$0xff] }
 0x31b   : > { %v1541_v19 = vpop.xlane.xlu1 %1540 }
 0x31c   : > { %2838 = vst.msk [vmem:[#allocation3 + $0x30] sm:$0xff] %vm761_vm0, %v5438_v11  ;;  %v5445_v31 = vmax.f32 %v5435_v3, %v1541_v19  ;;  %1774 = vperm.xlu1 %4173, %v5438_v11  }
 0x31e   : > { %2839 = vst.msk [vmem:[#allocation3 + $0x38] sm:$0xff] %vm761_vm0, %v5445_v31 }
 0x320   : > { %1779 = vperm.xlu1 %4173, %v5445_v31  }
 0x321   : > { %v1544_v55 = vpop.xlane.xlu0 %1543 }
 0x322   : > { %v5458_v47 = vmax.f32 %v5452_v15, %v1544_v55  ;;  %v5473_v55 = vld [vmem:[#allocation3 + $0x50] sm:$0xff] }
 0x323   : > { %v1547_v19 = vpop.xlane.xlu1 %1546 }
 0x324   : > { %2840 = vst.msk [vmem:[#allocation3 + $0x40] sm:$0xff] %vm761_vm0, %v5458_v47  ;;  %v5465_v0 = vmax.f32 %v5455_v5, %v1547_v19  ;;  %1784 = vperm.xlu1 %4173, %v5458_v47  }
 0x326   : > { %2841 = vst.msk [vmem:[#allocation3 + $0x48] sm:$0xff] %vm761_vm0, %v5465_v0  ;;  %1789 = vperm.xlu0 %4172, %v5465_v0  }
 0x329   : > { %v1550_v26 = vpop.xlane.xlu0 %1549 }
 0x32a   : > { %v5478_v21 = vmax.f32 %v5473_v55, %v1550_v26  ;;  %v5493_v26 = vld [vmem:[#allocation3 + $0x60] sm:$0xff] }
 0x32b   : > { %v1553_v19 = vpop.xlane.xlu1 %1552 }
 0x32c   : > { %2842 = vst.msk [vmem:[#allocation3 + $0x50] sm:$0xff] %vm761_vm0, %v5478_v21  ;;  %v5485_v37 = vmax.f32 %v5475_v42, %v1553_v19  ;;  %1794 = vperm.xlu1 %4173, %v5478_v21  }
 0x32e   : > { %2843 = vst.msk [vmem:[#allocation3 + $0x58] sm:$0xff] %vm761_vm0, %v5485_v37  ;;  %1799 = vperm.xlu0 %4172, %v5485_v37  }
 0x331   : > { %v1556_v8 = vpop.xlane.xlu0 %1555 }
 0x332   : > { %v5498_v4 = vmax.f32 %v5493_v26, %v1556_v8  ;;  %v5513_v8 = vld [vmem:[#allocation3 + $0x70] sm:$0xff] }
 0x333   : > { %v1559_v19 = vpop.xlane.xlu1 %1558 }
 0x334   : > { %2844 = vst.msk [vmem:[#allocation3 + $0x60] sm:$0xff] %vm761_vm0, %v5498_v4  ;;  %v5505_v14 = vmax.f32 %v5495_v17, %v1559_v19  ;;  %1804 = vperm.xlu1 %4173, %v5498_v4  }
 0x336   : > { %2845 = vst.msk [vmem:[#allocation3 + $0x68] sm:$0xff] %vm761_vm0, %v5505_v14  ;;  %1809 = vperm.xlu0 %4172, %v5505_v14  }
 0x339   : > { %v1562_v56 = vpop.xlane.xlu0 %1561 }
 0x33a   : > { %v5518_v53 = vmax.f32 %v5513_v8, %v1562_v56  ;;  %v5533_v56 = vld [vmem:[#allocation3 + $0x80] sm:$0xff] }
 0x33b   : > { %v1565_v19 = vpop.xlane.xlu1 %1564 }
 0x33c   : > { %2846 = vst.msk [vmem:[#allocation3 + $0x70] sm:$0xff] %vm761_vm0, %v5518_v53  ;;  %v5525_v62 = vmax.f32 %v5515_v2, %v1565_v19  ;;  %1814 = vperm.xlu1 %4173, %v5518_v53  }
 0x33e   : > { %2847 = vst.msk [vmem:[#allocation3 + $0x78] sm:$0xff] %vm761_vm0, %v5525_v62  ;;  %1819 = vperm.xlu0 %4172, %v5525_v62  }
 0x341   : > { %v1568_v39 = vpop.xlane.xlu0 %1567 }
 0x342   : > { %v5538_v36 = vmax.f32 %v5533_v56, %v1568_v39  ;;  %v5553_v39 = vld [vmem:[#allocation3 + $0x90] sm:$0xff] }
 0x343   : > { %v1571_v19 = vpop.xlane.xlu1 %1570 }
 0x344   : > { %2848 = vst.msk [vmem:[#allocation3 + $0x80] sm:$0xff] %vm761_vm0, %v5538_v36  ;;  %v5545_v46 = vmax.f32 %v5535_v49, %v1571_v19  ;;  %1824 = vperm.xlu1 %4173, %v5538_v36  }
 0x346   : > { %2849 = vst.msk [vmem:[#allocation3 + $0x88] sm:$0xff] %vm761_vm0, %v5545_v46  ;;  %1829 = vperm.xlu0 %4172, %v5545_v46  }
 0x349   : > { %v1574_v22 = vpop.xlane.xlu0 %1573 }
 0x34a   : > { %v5558_v20 = vmax.f32 %v5553_v39, %v1574_v22  ;;  %v5573_v22 = vld [vmem:[#allocation3 + $0xa0] sm:$0xff] }
 0x34b   : > { %v1577_v19 = vpop.xlane.xlu1 %1576 }
 0x34c   : > { %2850 = vst.msk [vmem:[#allocation3 + $0x90] sm:$0xff] %vm761_vm0, %v5558_v20  ;;  %v5565_v29 = vmax.f32 %v5555_v32, %v1577_v19  ;;  %1834 = vperm.xlu1 %4173, %v5558_v20  }
 0x34e   : > { %2851 = vst.msk [vmem:[#allocation3 + $0x98] sm:$0xff] %vm761_vm0, %v5565_v29  ;;  %1839 = vperm.xlu0 %4172, %v5565_v29  }
 0x351   : > { %v1580_v12 = vpop.xlane.xlu0 %1579 }
 0x352   : > { %v5578_v6 = vmax.f32 %v5573_v22, %v1580_v12  ;;  %v5593_v12 = vld [vmem:[#allocation3 + $0xb0] sm:$0xff] }
 0x353   : > { %v1583_v19 = vpop.xlane.xlu1 %1582  ;;  %6586 = vst [vmem:[#allocation78_spill] sm:$0xff] %v5593_v12 }
 0x354   : > { %2852 = vst.msk [vmem:[#allocation3 + $0xa0] sm:$0xff] %vm761_vm0, %v5578_v6  ;;  %v5585_v16 = vmax.f32 %v5575_v18, %v1583_v19  ;;  %1844 = vperm.xlu1 %4173, %v5578_v6  }
 0x356   : > { %2853 = vst.msk [vmem:[#allocation3 + $0xa8] sm:$0xff] %vm761_vm0, %v5585_v16  ;;  %1849 = vperm.xlu0 %4172, %v5585_v16  }
 0x359   : > { %v1586_v1 = vpop.xlane.xlu0 %1585 }
 0x35a   : > { %v5598_v63 = vmax.f32 %v5593_v12, %v1586_v1  ;;  %v5613_v1 = vld [vmem:[#allocation3 + $0xc0] sm:$0xff] }
 0x35b   : > { %v1589_v19 = vpop.xlane.xlu1 %1588  ;;  %6590 = vst [vmem:[#allocation82_spill] sm:$0xff] %v5613_v1 }
 0x35c   : > { %6588 = vst [vmem:[#allocation80_spill] sm:$0xff] %v5598_v63  ;;  %2854 = vst.msk [vmem:[#allocation3 + $0xb0] sm:$0xff] %vm761_vm0, %v5598_v63  ;;  %v5605_v7 = vmax.f32 %v5595_v9, %v1589_v19  ;;  %1854 = vperm.xlu1 %4173, %v5598_v63   ;;  %v5631_v9 = vld [vmem:[#allocation3 + $0xd8] sm:$0xff] }
 0x35d   : > { %6595 = vst [vmem:[#allocation87_spill] sm:$0xff] %v5631_v9 }
 0x35e   : > { %6589 = vst [vmem:[#allocation81_spill] sm:$0xff] %v5605_v7  ;;  %2855 = vst.msk [vmem:[#allocation3 + $0xb8] sm:$0xff] %vm761_vm0, %v5605_v7  ;;  %1859 = vperm.xlu0 %4172, %v5605_v7  }
 0x361   : > { %v1592_v54 = vpop.xlane.xlu0 %1591 }
 0x362   : > { %v5618_v12 = vmax.f32 %v5613_v1, %v1592_v54 }
 0x363   : > { %v1595_v19 = vpop.xlane.xlu1 %1594 }
 0x364   : > { %6592 = vst [vmem:[#allocation84_spill] sm:$0xff] %v5618_v12  ;;  %2856 = vst.msk [vmem:[#allocation3 + $0xc0] sm:$0xff] %vm761_vm0, %v5618_v12  ;;  %v5623_v63 = vmax.f32 %v5615_v61, %v1595_v19  ;;  %1864 = vperm.xlu1 %4173, %v5618_v12   ;;  %v5645_v61 = vld [vmem:[#allocation3 + $0xe0] sm:$0xff]  ;;  %v5650_v12 = vld [vmem:[#allocation3 + $0xe8] sm:$0xff] }
 0x366   : > { %6593 = vst [vmem:[#allocation85_spill] sm:$0xff] %v5623_v63  ;;  %2857 = vst.msk [vmem:[#allocation3 + $0xc8] sm:$0xff] %vm761_vm0, %v5623_v63  ;;  %1869 = vperm.xlu0 %4172, %v5623_v63  }
 0x369   : > { %v1598_v7 = vpop.xlane.xlu0 %1597 }
 0x36a   : > { %v5634_v54 = vmax.f32 %v5629_v59, %v1598_v7  ;;  %v6598_v7 = vsub.f32 %v5378_v24, %v5386_v35  ;;  %v6600_v24 = vsub.f32 %v5388_v60, %v5396_v25  ;;  %v5678_v25 = vld [vmem:[#allocation3 + $0xf8] sm:$0xff] }
 0x36b   : > { %v1601_v1 = vpop.xlane.xlu1 %1600 }
 0x36c   : > { %6596 = vst [vmem:[#allocation88_spill] sm:$0xff] %v5634_v54  ;;  %2858 = vst.msk [vmem:[#allocation3 + $0xd0] sm:$0xff] %vm761_vm0, %v5634_v54  ;;  %v5639_v19 = vmax.f32 %v5631_v9, %v1601_v1  ;;  %1874 = vperm.xlu1 %4173, %v5634_v54   ;;  %v1680_v59 = vmul.f32 1.442695, %v6598_v7  ;;  %v6599_v1 = vsub.f32 %v5373_v10, %v5376_v23  ;;  %v1682_v35 = vmul.f32 1.442695, %v6600_v24 }
 0x36d   : > { %v5673_v10 = vld [vmem:[#allocation3 + $0xf0] sm:$0xff] }
 0x36e   : > { %6597 = vst [vmem:[#allocation89_spill] sm:$0xff] %v5639_v19  ;;  %2859 = vst.msk [vmem:[#allocation3 + $0xd8] sm:$0xff] %vm761_vm0, %v5639_v19  ;;  %1879 = vperm.xlu0 %4172, %v5639_v19   ;;  %v1678_v9 = vmul.f32 1.442695, %v6599_v1  ;;  %4222 = vpow2.f32 %v1680_v59  ;;  %v6602_v59 = vsub.f32 %v5408_v51, %v5418_v45  ;;  %v6604_v45 = vsub.f32 %v5432_v13, %v5438_v11 }
 0x36f   : > { %v6606_v11 = vsub.f32 %v5452_v15, %v5458_v47  ;;  %v6609_v15 = vsub.f32 %v5475_v42, %v5485_v37 }
 0x370   : > { %4224 = vpow2.f32 %v1678_v9  ;;  %v6603_v9 = vsub.f32 %v5415_v58, %v5425_v57  ;;  %v1690_v51 = vmul.f32 1.442695, %v6604_v45  ;;  %v6605_v57 = vsub.f32 %v5435_v3, %v5445_v31 }
 0x371   : > { %v1604_v63 = vpop.xlane.xlu0 %1603  ;;  %4226 = vpow2.f32 %v1682_v35  ;;  %v1694_v13 = vmul.f32 1.442695, %v6606_v11  ;;  %v6608_v3 = vsub.f32 %v5473_v55, %v5478_v21  ;;  %v6614_v11 = vsub.f32 %v5533_v56, %v5538_v36 }
 0x372   : > { %v5653_v52 = vmax.f32 %v5645_v61, %v1604_v63  ;;  %v6601_v63 = vsub.f32 %v5398_v28, %v5406_v41  ;;  %v1688_v1 = vmul.f32 1.442695, %v6603_v9  ;;  %v1692_v35 = vmul.f32 1.442695, %v6605_v57 }
 0x373   : > { %v1607_v54 = vpop.xlane.xlu1 %1606  ;;  %v1700_v9 = vmul.f32 1.442695, %v6609_v15 }
 0x374   : > { %2860 = vst.msk [vmem:[#allocation3 + $0xe0] sm:$0xff] %vm761_vm0, %v5653_v52  ;;  %v5661_v19 = vmax.f32 %v5650_v12, %v1607_v54  ;;  %1884 = vperm.xlu1 %4173, %v5653_v52   ;;  %v1684_v23 = vmul.f32 1.442695, %v6601_v63  ;;  %v1686_v54 = vmul.f32 1.442695, %v6602_v59  ;;  %v6607_v59 = vsub.f32 %v5455_v5, %v5465_v0 }
 0x375   : > { %v6610_v0 = vsub.f32 %v5493_v26, %v5498_v4  ;;  %v6612_v4 = vsub.f32 %v5513_v8, %v5518_v53  ;;  %v6613_v53 = vsub.f32 %v5515_v2, %v5525_v62 }
 0x376   : > { %2861 = vst.msk [vmem:[#allocation3 + $0xe8] sm:$0xff] %vm761_vm0, %v5661_v19  ;;  %1889 = vperm.xlu0 %4172, %v5661_v19   ;;  %4228 = vpow2.f32 %v1684_v23 }
 0x377   : > { %4230 = vpow2.f32 %v1686_v54  ;;  %v1696_v54 = vmul.f32 1.442695, %v6607_v59  ;;  %v1702_v5 = vmul.f32 1.442695, %v6610_v0  ;;  %v1706_v26 = vmul.f32 1.442695, %v6612_v4 }
 0x378   : > { %v5700_v58 = vpop.eup %4222  ;;  %4232 = vpow2.f32 %v1688_v1  ;;  %v1708_v8 = vmul.f32 1.442695, %v6613_v53  ;;  %v6620_v4 = vld [vmem:[#allocation24_spill] sm:$0xff] }
 0x379   : > { %v1610_v7 = vpop.xlane.xlu0 %1609  ;;  %4234 = vpow2.f32 %v1690_v51 }
 0x37a   : > { %v5681_v60 = vmax.f32 %v5673_v10, %v1610_v7  ;;  %v5706_v63 = vpop.eup %4224  ;;  %4236 = vpow2.f32 %v1692_v35  ;;  %v1698_v7 = vmul.f32 1.442695, %v6608_v3 }
 0x37b   : > { %v1613_v28 = vpop.xlane.xlu1 %1612  ;;  %v5712_v23 = vpop.eup %4226  ;;  %4238 = vpow2.f32 %v1694_v13  ;;  %v1710_v13 = vmul.f32 1.442695, %v6614_v11  ;;  %v6625_v11 = vld [vmem:[#allocation84_spill] sm:$0xff] }
 0x37c   : > { %2862 = vst.msk [vmem:[#allocation3 + $0xf0] sm:$0xff] %vm761_vm0, %v5681_v60  ;;  %v5689_v41 = vmax.f32 %v5678_v25, %v1613_v28  ;;  %1894 = vperm.xlu1 %4173, %v5681_v60   ;;  %4240 = vpow2.f32 %v1696_v54  ;;  %v6611_v28 = vsub.f32 %v5495_v17, %v5505_v14  ;;  %v6615_v54 = vsub.f32 %v5535_v49, %v5545_v46 }
 0x37d   : > { %4242 = vpow2.f32 %v1698_v7  ;;  %v6616_v7 = vsub.f32 %v5553_v39, %v5558_v20  ;;  %v6617_v46 = vsub.f32 %v5555_v32, %v5565_v29  ;;  %v6618_v29 = vsub.f32 %v5573_v22, %v5578_v6  ;;  %v6621_v22 = vld [vmem:[#allocation25_spill] sm:$0xff] }
 0x37e   : > { %2863 = vst.msk [vmem:[#allocation3 + $0xf8] sm:$0xff] %vm761_vm0, %v5689_v41  ;;  %1899 = vperm.xlu0 %4172, %v5689_v41   ;;  %v1704_v45 = vmul.f32 1.442695, %v6611_v28  ;;  %4244 = vpow2.f32 %v1700_v9  ;;  %v1712_v3 = vmul.f32 1.442695, %v6615_v54 }
 0x37f   : > { %4246 = vpow2.f32 %v1702_v5  ;;  %v1716_v20 = vmul.f32 1.442695, %v6617_v46  ;;  %v1718_v32 = vmul.f32 1.442695, %v6618_v29 }
 0x380   : > { %2422 = vperm.xlu1 %4173, %v5700_v58   ;;  %v5718_v31 = vpop.eup %4228  ;;  %4248 = vpow2.f32 %v1704_v45 }
 0x381   : > { %v5727_v1 = vpop.eup %4230  ;;  %4250 = vpow2.f32 %v1706_v26 }
 0x382   : > { %2417 = vperm.xlu0 %4172, %v5706_v63   ;;  %v5740_v57 = vpop.eup %4232 }
 0x383   : > { %v1745_v47 = vpop.permute.xlu0 %1744 }
 0x384   : > { %2427 = vperm.xlu1 %4173, %v5712_v23   ;;  %v1902_v55 = vsub.f32 %v5054_v27, %v1745_v47  ;;  %v1903_v51 = vsub.f32 %v5089_v30, %v1745_v47  ;;  %v5746_v27 = vpop.eup %4234  ;;  %v1714_v47 = vmul.f32 1.442695, %v6616_v7  ;;  %v6628_v7 = vld [vmem:[#allocation83_spill] sm:$0xff] }
 0x385   : > { %v5749_v35 = vpop.eup %4236 }
 0x386   : > { %2432 = vperm.xlu0 %4172, %v5718_v31   ;;  %v5758_v59 = vpop.eup %4238 }
 0x387   : > { %v1750_v21 = vpop.permute.xlu1 %1749  ;;  %v5771_v9 = vpop.eup %4240 }
 0x388   : > { %v1904_v37 = vsub.f32 %v5092_v33, %v1750_v21  ;;  %v1905_v42 = vsub.f32 %v5095_v34, %v1750_v21  ;;  %2437 = vperm.xlu1 %4173, %v5727_v1   ;;  %v6619_v21 = vsub.f32 %v5575_v18, %v5585_v16 }
 0x38a   : > { %v1966_v14 = vpack.c.bf16 %v1904_v37, %v1902_v55  ;;  %v1967_v17 = vpack.c.bf16 %v1905_v42, %v1903_v51  ;;  %2442 = vperm.xlu0 %4172, %v5740_v57   ;;  %v1720_v55 = vmul.f32 1.442695, %v6619_v21 }
 0x38b   : > { %v1755_v30 = vpop.permute.xlu1 %1754 }
 0x38c   : > { %v1999_v33 = vmul.bf16 1069105081, %v1966_v14  ;;  %v2002_v34 = vmul.bf16 1069105081, %v1967_v17  ;;  %2447 = vperm.xlu1 %4173, %v5746_v27   ;;  %v1906_v2 = vsub.f32 %v5102_v38, %v1755_v30  ;;  %v1907_v36 = vsub.f32 %v5105_v40, %v1755_v30  ;;  %v5777_v38 = vpop.eup %4242  ;;  %v6622_v17 = vld [vmem:[#allocation78_spill] sm:$0xff]  ;;  %v6623_v30 = vld [vmem:[#allocation80_spill] sm:$0xff] }
 0x38e   : > { %4252 = vpow.bf16 %v1999_v33  ;;  %2452 = vperm.xlu0 %4172, %v5749_v35   ;;  %v6624_v33 = vsub.f32 %v6622_v17, %v6623_v30  ;;  %v6635_v17 = vld [vmem:[#allocation29_spill] sm:$0xff] }
 0x38f   : > { %4254 = vpow.bf16 %v2002_v34  ;;  %v1760_v62 = vpop.permute.xlu1 %1759 }
 0x390   : > { %v1908_v56 = vsub.f32 %v5108_v43, %v1760_v62  ;;  %v1909_v15 = vsub.f32 %v5111_v44, %v1760_v62  ;;  %2457 = vperm.xlu1 %4173, %v5758_v59   ;;  %4256 = vpow2.f32 %v1708_v8  ;;  %v5779_v43 = vpop.eup %4244  ;;  %v1722_v34 = vmul.f32 1.442695, %v6624_v33 }
 0x391   : > { %4258 = vpow2.f32 %v1710_v13  ;;  %v5782_v5 = vpop.eup %4246  ;;  %v6626_v13 = vld [vmem:[#allocation82_spill] sm:$0xff] }
 0x392   : > { %v1968_v49 = vpack.c.bf16 %v1908_v56, %v1906_v2  ;;  %v1969_v39 = vpack.c.bf16 %v1909_v15, %v1907_v36  ;;  %2462 = vperm.xlu0 %4172, %v5771_v9   ;;  %4260 = vpow2.f32 %v1712_v3  ;;  %v5787_v28 = vpop.eup %4248  ;;  %v1670_v54 = vsub.f32 %v6626_v13, %v6625_v11  ;;  %v6627_v3 = vld [vmem:[#allocation85_spill] sm:$0xff] }
 0x393   : > { %v1765_v40 = vpop.permute.xlu1 %1764  ;;  %4262 = vpow2.f32 %v1714_v47  ;;  %v5790_v45 = vpop.eup %4250  ;;  %v1671_v47 = vsub.f32 %v6628_v7, %v6627_v3  ;;  %v6638_v3 = vld [vmem:[#allocation89_spill] sm:$0xff]  ;;  %v6639_v7 = vld [vmem:[#allocation87_spill] sm:$0xff] }
 0x394   : > { %v2005_v44 = vmul.bf16 1069105081, %v1968_v49  ;;  %v2008_v0 = vmul.bf16 1069105081, %v1969_v39  ;;  %2467 = vperm.xlu1 %4173, %v5777_v38   ;;  %4264 = vpow2.f32 %v1716_v20  ;;  %v1910_v37 = vsub.f32 %v5118_v48, %v1765_v40  ;;  %v6629_v49 = vld [vmem:[#allocation79_spill] sm:$0xff]  ;;  %v6630_v39 = vld [vmem:[#allocation81_spill] sm:$0xff] }
 0x395   : > { %v1911_v42 = vsub.f32 %v5121_v50, %v1765_v40  ;;  %v6631_v40 = vsub.f32 %v6629_v49, %v6630_v39 }
 0x396   : > { %4266 = vpow.bf16 %v2005_v44  ;;  %2472 = vperm.xlu0 %4172, %v5779_v43  }
 0x397   : > { %4268 = vpow.bf16 %v2008_v0  ;;  %v1770_v51 = vpop.permute.xlu1 %1769  ;;  %v1724_v44 = vmul.f32 1.442695, %v6631_v40  ;;  %v6640_v40 = vld [vmem:[#allocation30_spill] sm:$0xff] }
 0x398   : > { %v1912_v6 = vsub.f32 %v6620_v4, %v1770_v51  ;;  %v1913_v26 = vsub.f32 %v6621_v22, %v1770_v51  ;;  %2477 = vperm.xlu1 %4173, %v5782_v5   ;;  %4270 = vpow2.f32 %v1718_v32  ;;  %v1728_v51 = vmul.f32 1.442695, %v1671_v47 }
 0x399   : > { %v4253_v14 = vpop.eup %4252  ;;  %4272 = vpow2.f32 %v1720_v55  ;;  %v1726_v55 = vmul.f32 1.442695, %v1670_v54  ;;  %v1673_v47 = vsub.f32 %v6639_v7, %v6638_v3 }
 0x39a   : > { %v4255_v16 = vpop.eup %4254  ;;  %v1970_v18 = vpack.c.bf16 %v1912_v6, %v1910_v37  ;;  %v1971_v53 = vpack.c.bf16 %v1913_v26, %v1911_v42  ;;  %2482 = vperm.xlu0 %4172, %v5787_v28   ;;  %v2160_v48 = vunpack.c.h.bf16 %v4253_v14  ;;  %v2158_v8 = vunpack.c.l.bf16 %v4253_v14  ;;  %v6632_v42 = vld [vmem:[#allocation26_spill] sm:$0xff]  ;;  %v6633_v6 = vld [vmem:[#allocation27_spill] sm:$0xff]  ;;  %v6634_v26 = vld [vmem:[#allocation28_spill] sm:$0xff] }
 0x39b   : > { %v5804_v50 = vpop.eup %4256  ;;  %2639 = vmatprep.mubr.bf16.mxu0 %v4255_v16  ;;  %v1775_v62 = vpop.permute.xlu1 %1774  ;;  %v2161_v2 = vunpack.c.h.bf16 %v4255_v16  ;;  %v2159_v36 = vunpack.c.l.bf16 %v4255_v16  ;;  %4274 = vpow2.f32 %v1722_v34  ;;  %v6636_v34 = vld [vmem:[#allocation88_spill] sm:$0xff]  ;;  %v6637_v16 = vld [vmem:[#allocation86_spill] sm:$0xff] }
 0x39c   : > { %v5810_v56 = vpop.eup %4258  ;;  %v2011_v15 = vmul.bf16 1069105081, %v1970_v18  ;;  %v2014_v46 = vmul.bf16 1069105081, %v1971_v53  ;;  %2640 = vmatmul.mubr.bf16.vlgmr.msra.gmra.mrb[36].mxu0 %v4253_v14  ;;  %2487 = vperm.xlu1 %4173, %v5790_v45   ;;  %v1914_v4 = vsub.f32 %v6632_v42, %v1775_v62  ;;  %v1915_v22 = vsub.f32 %v6633_v6, %v1775_v62 }
 0x39d   : > { %v5813_v20 = vpop.eup %4260  ;;  %v5818_v0 = vadd.f32 %v2161_v2, %v2160_v48  ;;  %v5820_v29 = vadd.f32 %v2159_v36, %v2158_v8  ;;  %v1672_v18 = vsub.f32 %v6637_v16, %v6636_v34 }
 0x39e   : > { %v5822_v32 = vpop.eup %4262  ;;  %4276 = vpow.bf16 %v2011_v15  ;;  %2492 = vperm.xlu0 %4172, %v5804_v50   ;;  %v1674_v15 = vsub.f32 %v5645_v61, %v5653_v52  ;;  %v6643_v61 = vld [vmem:[#allocation33_spill] sm:$0xff] }
 0x39f   : > { %v5825_v21 = vpop.eup %4264  ;;  %4278 = vpow.bf16 %v2014_v46  ;;  %v1780_v37 = vpop.permute.xlu1 %1779  ;;  %v1730_v39 = vmul.f32 1.442695, %v1672_v18 }
 0x3a0   : > { %v1916_v14 = vsub.f32 %v6634_v26, %v1780_v37  ;;  %v1917_v30 = vsub.f32 %v6635_v17, %v1780_v37  ;;  %2497 = vperm.xlu1 %4173, %v5810_v56   ;;  %4280 = vpow2.f32 %v1724_v44  ;;  %v1732_v17 = vmul.f32 1.442695, %v1673_v47 }
 0x3a1   : > { %v4267_v33 = vpop.eup %4266  ;;  %4282 = vpow2.f32 %v1726_v55 }
 0x3a2   : > { %v4269_v53 = vpop.eup %4268  ;;  %v1972_v48 = vpack.c.bf16 %v1916_v14, %v1914_v4  ;;  %v1973_v8 = vpack.c.bf16 %v1917_v30, %v1915_v22  ;;  %2502 = vperm.xlu0 %4172, %v5813_v20   ;;  %v2162_v11 = vunpack.c.l.bf16 %v4267_v33  ;;  %v2164_v13 = vunpack.c.h.bf16 %v4267_v33  ;;  %v6642_v22 = vld [vmem:[#allocation32_spill] sm:$0xff] }
 0x3a3   : > { %v5835_v54 = vpop.eup %4270  ;;  %2647 = vmatprep.mubr.bf16.mxu0 %v4269_v53  ;;  %v1785_v62 = vpop.permute.xlu1 %1784  ;;  %v2163_v2 = vunpack.c.l.bf16 %v4269_v53  ;;  %v2165_v36 = vunpack.c.h.bf16 %v4269_v53  ;;  %4284 = vpow2.f32 %v1728_v51  ;;  %v6641_v51 = vld [vmem:[#allocation31_spill] sm:$0xff]  ;;  %v1675_v30 = vsub.f32 %v5650_v12, %v5661_v19 }
 0x3a4   : > { %v2017_v46 = vmul.bf16 1069105081, %v1972_v48  ;;  %v2020_v49 = vmul.bf16 1069105081, %v1973_v8  ;;  %2648 = vmatmul.mubr.bf16.gmra.mrb[40].mxu0 %v4267_v33  ;;  %2507 = vperm.xlu1 %4173, %v5822_v32   ;;  %v1918_v44 = vsub.f32 %v6640_v40, %v1785_v62  ;;  %v5847_v4 = vpop.eup %4272  ;;  %v1919_v6 = vsub.f32 %v6641_v51, %v1785_v62 }
 0x3a5   : > { %v1790_v55 = vpop.permute.xlu0 %1789  ;;  %v5843_v37 = vadd.f32 %v2163_v2, %v2162_v11  ;;  %v5845_v42 = vadd.f32 %v2165_v36, %v2164_v13  ;;  %v5853_v14 = vpop.eup %4274  ;;  %v1734_v33 = vmul.f32 1.442695, %v1674_v15  ;;  %v1676_v53 = vsub.f32 %v5673_v10, %v5681_v60  ;;  %v6644_v36 = vld [vmem:[#allocation34_spill] sm:$0xff] }
 0x3a6   : > { %4286 = vpow.bf16 %v2017_v46  ;;  %v1920_v52 = vsub.f32 %v6642_v22, %v1790_v55  ;;  %v1921_v26 = vsub.f32 %v6643_v61, %v1790_v55  ;;  %2512 = vperm.xlu0 %4172, %v5825_v21   ;;  %v1736_v19 = vmul.f32 1.442695, %v1675_v30  ;;  %v6645_v46 = vld [vmem:[#allocation35_spill] sm:$0xff] }
 0x3a7   : > { %4288 = vpow.bf16 %v2020_v49  ;;  %v1738_v60 = vmul.f32 1.442695, %v1676_v53  ;;  %v6650_v53 = vld [vmem:[#allocation38_spill] sm:$0xff] }
 0x3a8   : > { %v1974_v34 = vpack.c.bf16 %v1920_v52, %v1918_v44  ;;  %v1975_v16 = vpack.c.bf16 %v1921_v26, %v1919_v6  ;;  %2517 = vperm.xlu1 %4173, %v5835_v54   ;;  %4290 = vpow2.f32 %v1730_v39  ;;  %v6646_v39 = vld [vmem:[#allocation36_spill] sm:$0xff]  ;;  %v6647_v44 = vld [vmem:[#allocation37_spill] sm:$0xff] }
 0x3a9   : > { %v5858_v18 = vpop.eup %4276  ;;  %4292 = vpow2.f32 %v1732_v17 }
 0x3aa   : > { %v5862_v48 = vpop.eup %4278  ;;  %v2026_v8 = vmul.bf16 1069105081, %v1975_v16  ;;  %2522 = vperm.xlu0 %4172, %v5847_v4   ;;  %v2168_v11 = vunpack.c.h.bf16 %v5858_v18  ;;  %4294 = vpow2.f32 %v1734_v33  ;;  %v2023_v7 = vmul.bf16 1069105081, %v1974_v34 }
 0x3ab   : > { %v5866_v12 = vpop.eup %4280  ;;  %2655 = vmatprep.mubr.bf16.mxu0 %v5862_v48  ;;  %v1795_v13 = vpop.permute.xlu1 %1794  ;;  %v2169_v3 = vunpack.c.h.bf16 %v5862_v48 }
 0x3ac   : > { %2656 = vmatmul.mubr.bf16.gmra.mrb[44].mxu0 %v5858_v18  ;;  %2527 = vperm.xlu1 %4173, %v5853_v14   ;;  %v5872_v10 = vpop.eup %4282  ;;  %4296 = vpow.bf16 %v2026_v8  ;;  %v1922_v15 = vsub.f32 %v6644_v36, %v1795_v13  ;;  %v1923_v49 = vsub.f32 %v6645_v46, %v1795_v13  ;;  %v6652_v13 = vld [vmem:[#allocation40_spill] sm:$0xff] }
 0x3ad   : > { %v1800_v47 = vpop.permute.xlu0 %1799  ;;  %v5874_v62 = vadd.f32 %v2169_v3, %v2168_v11  ;;  %v5876_v2 = vpop.eup %4284  ;;  %4298 = vpow2.f32 %v1736_v19  ;;  %v6651_v11 = vld [vmem:[#allocation39_spill] sm:$0xff] }
 0x3ae   : > { %v1924_v40 = vsub.f32 %v6646_v39, %v1800_v47  ;;  %v1925_v55 = vsub.f32 %v6647_v44, %v1800_v47  ;;  %2532 = vperm.xlu0 %4172, %v5866_v12   ;;  %4300 = vpow.bf16 %v2023_v7  ;;  %v6653_v7 = vld [vmem:[#allocation41_spill] sm:$0xff] }
 0x3af   : > { %4302 = vpow2.f32 %v1738_v60 }
 0x3b0   : > { %v1976_v51 = vpack.c.bf16 %v1924_v40, %v1922_v15  ;;  %v1977_v6 = vpack.c.bf16 %v1925_v55, %v1923_v49  ;;  %2537 = vperm.xlu1 %4173, %v5872_v10  }
 0x3b1   : > { %v5884_v22 = vpop.eup %4286 }
 0x3b2   : > { %v5886_v52 = vpop.eup %4288  ;;  %v2032_v61 = vmul.bf16 1069105081, %v1977_v6  ;;  %2542 = vperm.xlu0 %4172, %v5876_v2   ;;  %v2029_v30 = vmul.bf16 1069105081, %v1976_v51  ;;  %v6656_v6 = vld [vmem:[#allocation42_spill] sm:$0xff] }
 0x3b3   : > { %v5889_v26 = vpop.eup %4290  ;;  %2663 = vmatprep.mubr.bf16.mxu0 %v5886_v52  ;;  %v1805_v17 = vpop.permute.xlu1 %1804 }
 0x3b4   : > { %2664 = vmatmul.mubr.bf16.gmra.mrb[48].mxu0 %v5884_v22  ;;  %2547 = vperm.xlu1 %4173, %v5889_v26   ;;  %v5894_v33 = vpop.eup %4292  ;;  %4304 = vpow.bf16 %v2032_v61  ;;  %v1926_v8 = vsub.f32 %v6650_v53, %v1805_v17  ;;  %v1927_v19 = vsub.f32 %v6651_v11, %v1805_v17  ;;  %v6657_v17 = vld [vmem:[#allocation43_spill] sm:$0xff] }
 0x3b5   : > { %6648 = vst [vmem:[#allocation24_spill] sm:$0xff] %v5894_v33  ;;  %v1810_v34 = vpop.permute.xlu0 %1809  ;;  %v5896_v16 = vpop.eup %4294  ;;  %4306 = vpow.bf16 %v2029_v30 }
 0x3b6   : > { %6649 = vst [vmem:[#allocation25_spill] sm:$0xff] %v5896_v16  ;;  %v1928_v3 = vsub.f32 %v6652_v13, %v1810_v34  ;;  %v1929_v60 = vsub.f32 %v6653_v7, %v1810_v34  ;;  %2552 = vperm.xlu0 %4172, %v5894_v33   ;;  %v6658_v34 = vld [vmem:[#allocation44_spill] sm:$0xff] }
 0x3b7   : > { %v5903_v47 = vpop.eup %4296 }
 0x3b8   : > { %v1978_v36 = vpack.c.bf16 %v1928_v3, %v1926_v8  ;;  %v1979_v15 = vpack.c.bf16 %v1929_v60, %v1927_v19  ;;  %2557 = vperm.xlu1 %4173, %v5896_v16   ;;  %v5906_v46 = vpop.eup %4298  ;;  %2671 = vmatprep.mubr.bf16.mxu0 %v5903_v47  ;;  %v6659_v8 = vld [vmem:[#allocation45_spill] sm:$0xff] }
 0x3b9   : > { %6654 = vst [vmem:[#allocation78_spill] sm:$0xff] %v5906_v46  ;;  %v5910_v39 = vpop.eup %4300 }
 0x3ba   : > { %v2038_v49 = vmul.bf16 1069105081, %v1979_v15  ;;  %2562 = vperm.xlu0 %4172, %v5906_v46   ;;  %v5912_v40 = vpop.eup %4302  ;;  %v2035_v55 = vmul.bf16 1069105081, %v1978_v36 }
 0x3bb   : > { %6655 = vst [vmem:[#allocation80_spill] sm:$0xff] %v5912_v40  ;;  %v1815_v44 = vpop.permute.xlu1 %1814 }
 0x3bc   : > { %2672 = vmatmul.mubr.bf16.gmra.mrb[52].mxu0 %v5910_v39  ;;  %2567 = vperm.xlu1 %4173, %v5912_v40   ;;  %4308 = vpow.bf16 %v2038_v49  ;;  %v1930_v61 = vsub.f32 %v6656_v6, %v1815_v44  ;;  %v1931_v30 = vsub.f32 %v6657_v17, %v1815_v44  ;;  %v6660_v44 = vld [vmem:[#allocation46_spill] sm:$0xff]  ;;  %v6661_v17 = vld [vmem:[#allocation47_spill] sm:$0xff] }
 0x3bd   : > { %v1820_v51 = vpop.permute.xlu0 %1819  ;;  %4310 = vpow.bf16 %v2035_v55  ;;  %v6663_v55 = vld [vmem:[#allocation49_spill] sm:$0xff] }
 0x3be   : > { %v1932_v53 = vsub.f32 %v6658_v34, %v1820_v51  ;;  %v1933_v11 = vsub.f32 %v6659_v8, %v1820_v51  ;;  %v6662_v34 = vld [vmem:[#allocation48_spill] sm:$0xff] }
 0x3bf   : > { %v5920_v19 = vpop.eup %4304 }
 0x3c0   : > { %v1980_v13 = vpack.c.bf16 %v1932_v53, %v1930_v61  ;;  %v1981_v3 = vpack.c.bf16 %v1933_v11, %v1931_v30  ;;  %2679 = vmatprep.mubr.bf16.mxu0 %v5920_v19  ;;  %v5923_v60 = vpop.eup %4306 }
 0x3c2   : > { %v2044_v7 = vmul.bf16 1069105081, %v1981_v3  ;;  %v2041_v15 = vmul.bf16 1069105081, %v1980_v13 }
 0x3c3   : > { %v1825_v36 = vpop.permute.xlu1 %1824 }
 0x3c4   : > { %2680 = vmatmul.mubr.bf16.gmra.mrb[56].mxu0 %v5923_v60  ;;  %4312 = vpow.bf16 %v2044_v7  ;;  %v1934_v6 = vsub.f32 %v6660_v44, %v1825_v36  ;;  %v1935_v51 = vsub.f32 %v6661_v17, %v1825_v36  ;;  %v6664_v44 = vld [vmem:[#allocation50_spill] sm:$0xff] }
 0x3c5   : > { %v1830_v49 = vpop.permute.xlu0 %1829  ;;  %4314 = vpow.bf16 %v2041_v15  ;;  %v6667_v15 = vld [vmem:[#allocation53_spill] sm:$0xff] }
 0x3c6   : > { %v1936_v8 = vsub.f32 %v6662_v34, %v1830_v49  ;;  %v1937_v61 = vsub.f32 %v6663_v55, %v1830_v49  ;;  %v6665_v34 = vld [vmem:[#allocation51_spill] sm:$0xff]  ;;  %v6666_v55 = vld [vmem:[#allocation52_spill] sm:$0xff] }
 0x3c7   : > { %v5930_v30 = vpop.eup %4308 }
 0x3c8   : > { %v1982_v53 = vpack.c.bf16 %v1936_v8, %v1934_v6  ;;  %v1983_v11 = vpack.c.bf16 %v1937_v61, %v1935_v51  ;;  %2687 = vmatprep.mubr.bf16.mxu0 %v5930_v30  ;;  %v5933_v3 = vpop.eup %4310 }
 0x3ca   : > { %v2050_v13 = vmul.bf16 1069105081, %v1983_v11  ;;  %v2047_v24 = vmul.bf16 1069105081, %v1982_v53 }
 0x3cb   : > { %v1835_v7 = vpop.permute.xlu1 %1834 }
 0x3cc   : > { %2688 = vmatmul.mubr.bf16.gmra.mrb[60].mxu0 %v5933_v3  ;;  %4316 = vpow.bf16 %v2050_v13  ;;  %v1938_v17 = vsub.f32 %v6664_v44, %v1835_v7  ;;  %v1939_v49 = vsub.f32 %v6665_v34, %v1835_v7  ;;  %v6668_v44 = vld [vmem:[#allocation54_spill] sm:$0xff] }
 0x3cd   : > { %v1840_v36 = vpop.permute.xlu0 %1839  ;;  %4318 = vpow.bf16 %v2047_v24  ;;  %v6671_v24 = vld [vmem:[#allocation57_spill] sm:$0xff] }
 0x3ce   : > { %v1940_v46 = vsub.f32 %v6666_v55, %v1840_v36  ;;  %v1941_v6 = vsub.f32 %v6667_v15, %v1840_v36  ;;  %v6669_v55 = vld [vmem:[#allocation55_spill] sm:$0xff]  ;;  %v6670_v15 = vld [vmem:[#allocation56_spill] sm:$0xff] }
 0x3cf   : > { %v5940_v51 = vpop.eup %4312 }
 0x3d0   : > { %v1984_v8 = vpack.c.bf16 %v1940_v46, %v1938_v17  ;;  %v1985_v61 = vpack.c.bf16 %v1941_v6, %v1939_v49  ;;  %2695 = vmatprep.mubr.bf16.mxu0 %v5940_v51  ;;  %v5943_v11 = vpop.eup %4314 }
 0x3d2   : > { %v2056_v53 = vmul.bf16 1069105081, %v1985_v61  ;;  %v2053_v40 = vmul.bf16 1069105081, %v1984_v8 }
 0x3d3   : > { %v1845_v13 = vpop.permute.xlu1 %1844 }
 0x3d4   : > { %2696 = vmatmul.mubr.bf16.gmra.mrb[64].mxu0 %v5943_v11  ;;  %4320 = vpow.bf16 %v2056_v53  ;;  %v1942_v34 = vsub.f32 %v6668_v44, %v1845_v13  ;;  %v1943_v36 = vsub.f32 %v6669_v55, %v1845_v13  ;;  %v2166_v44 = vunpack.c.l.bf16 %v5858_v18 }
 0x3d5   : > { %v1850_v7 = vpop.permute.xlu0 %1849  ;;  %4322 = vpow.bf16 %v2053_v40  ;;  %v2167_v13 = vunpack.c.l.bf16 %v5862_v48  ;;  %v6672_v40 = vld [vmem:[#allocation58_spill] sm:$0xff]  ;;  %v2170_v18 = vunpack.c.l.bf16 %v5884_v22  ;;  %v2171_v48 = vunpack.c.l.bf16 %v5886_v52 }
 0x3d6   : > { %v1944_v33 = vsub.f32 %v6670_v15, %v1850_v7  ;;  %v1945_v46 = vsub.f32 %v6671_v24, %v1850_v7  ;;  %v6675_v24 = vld [vmem:[#allocation61_spill] sm:$0xff] }
 0x3d7   : > { %v5950_v17 = vpop.eup %4316 }
 0x3d8   : > { %v1986_v49 = vpack.c.bf16 %v1944_v33, %v1942_v34  ;;  %v1987_v6 = vpack.c.bf16 %v1945_v46, %v1943_v36  ;;  %2703 = vmatprep.mubr.bf16.mxu0 %v5950_v17  ;;  %v5954_v61 = vpop.eup %4318  ;;  %v6673_v34 = vld [vmem:[#allocation59_spill] sm:$0xff] }
 0x3d9   : > { %2226 = vadd.xlane.f32.xlu0 %v5818_v0  ;;  %v6674_v0 = vld [vmem:[#allocation60_spill] sm:$0xff] }
 0x3da   : > { %v2062_v8 = vmul.bf16 1069105081, %v1987_v6  ;;  %v2059_v55 = vmul.bf16 1069105081, %v1986_v49  ;;  %v2234_v6 = vadd.f32 %v2167_v13, %v2166_v44  ;;  %v2174_v44 = vunpack.c.l.bf16 %v5910_v39 }
 0x3db   : > { %v1855_v53 = vpop.permute.xlu1 %1854  ;;  %v2175_v13 = vunpack.c.l.bf16 %v5903_v47 }
 0x3dc   : > { %2704 = vmatmul.mubr.bf16.gmra.mrb[68].mxu0 %v5954_v61  ;;  %4324 = vpow.bf16 %v2062_v8  ;;  %v1946_v7 = vsub.f32 %v6672_v40, %v1855_v53  ;;  %v1947_v36 = vsub.f32 %v6673_v34, %v1855_v53 }
 0x3dd   : > { %2229 = vadd.xlane.f32.xlu0 %v5843_v37  ;;  %v1860_v33 = vpop.permute.xlu0 %1859  ;;  %4326 = vpow.bf16 %v2059_v55  ;;  %v2172_v55 = vunpack.c.h.bf16 %v5884_v22 }
 0x3de   : > { %v1948_v15 = vsub.f32 %v6674_v0, %v1860_v33  ;;  %v1949_v46 = vsub.f32 %v6675_v24, %v1860_v33  ;;  %v2240_v33 = vadd.f32 %v2171_v48, %v2170_v18  ;;  %v6677_v0 = vld [vmem:[#allocation63_spill] sm:$0xff]  ;;  %v6678_v24 = vld [vmem:[#allocation64_spill] sm:$0xff]  ;;  %v2246_v48 = vadd.f32 %v2175_v13, %v2174_v44 }
 0x3df   : > { %v5966_v49 = vpop.eup %4320 }
 0x3e0   : > { %v1988_v8 = vpack.c.bf16 %v1948_v15, %v1946_v7  ;;  %v1989_v16 = vpack.c.bf16 %v1949_v46, %v1947_v36  ;;  %2223 = vadd.xlane.f32.xlu1 %v5820_v29  ;;  %2711 = vmatprep.mubr.bf16.mxu0 %v5966_v49  ;;  %v5970_v53 = vpop.eup %4322  ;;  %v6676_v7 = vld [vmem:[#allocation62_spill] sm:$0xff] }
 0x3e1   : > { %2235 = vadd.xlane.f32.xlu0 %v2234_v6  ;;  %v6679_v6 = vld [vmem:[#allocation65_spill] sm:$0xff] }
 0x3e2   : > { %v2068_v37 = vmul.bf16 1069105081, %v1989_v16  ;;  %v2065_v34 = vmul.bf16 1069105081, %v1988_v8  ;;  %v2173_v16 = vunpack.c.h.bf16 %v5886_v52  ;;  %v2178_v8 = vunpack.c.l.bf16 %v5923_v60 }
 0x3e3   : > { %v1865_v40 = vpop.permute.xlu1 %1864  ;;  %v2176_v52 = vunpack.c.h.bf16 %v5910_v39 }
 0x3e4   : > { %2712 = vmatmul.mubr.bf16.gmra.mrb[72].mxu0 %v5970_v53  ;;  %2232 = vadd.xlane.f32.xlu1 %v5845_v42  ;;  %4328 = vpow.bf16 %v2068_v37  ;;  %v1950_v36 = vsub.f32 %v6676_v7, %v1865_v40  ;;  %v1951_v15 = vsub.f32 %v6677_v0, %v1865_v40  ;;  %v2179_v42 = vunpack.c.l.bf16 %v5920_v19 }
 0x3e5   : > { %2241 = vadd.xlane.f32.xlu0 %v2240_v33  ;;  %v1870_v29 = vpop.permute.xlu0 %1869  ;;  %4330 = vpow.bf16 %v2065_v34  ;;  %v2177_v40 = vunpack.c.h.bf16 %v5903_v47  ;;  %v2243_v44 = vadd.f32 %v2173_v16, %v2172_v55  ;;  %v2183_v34 = vunpack.c.l.bf16 %v5930_v30  ;;  %v6680_v16 = vld [vmem:[#allocation66_spill] sm:$0xff] }
 0x3e6   : > { %v1952_v46 = vsub.f32 %v6678_v24, %v1870_v29  ;;  %v1953_v18 = vsub.f32 %v6679_v6, %v1870_v29  ;;  %v2252_v0 = vadd.f32 %v2179_v42, %v2178_v8  ;;  %v2182_v24 = vunpack.c.l.bf16 %v5933_v3  ;;  %v6683_v8 = vld [vmem:[#allocation69_spill] sm:$0xff] }
 0x3e7   : > { %v5984_v37 = vpop.eup %4324  ;;  %v2249_v39 = vadd.f32 %v2177_v40, %v2176_v52  ;;  %v2180_v47 = vunpack.c.h.bf16 %v5923_v60  ;;  %v2181_v55 = vunpack.c.h.bf16 %v5920_v19  ;;  %v2184_v19 = vunpack.c.h.bf16 %v5933_v3 }
 0x3e8   : > { %v1990_v33 = vpack.c.bf16 %v1952_v46, %v1950_v36  ;;  %v1991_v22 = vpack.c.bf16 %v1953_v18, %v1951_v15  ;;  %2238 = vadd.xlane.f32.xlu1 %v5874_v62  ;;  %2719 = vmatprep.mubr.bf16.mxu0 %v5984_v37  ;;  %v5990_v13 = vpop.eup %4326  ;;  %v6681_v46 = vld [vmem:[#allocation67_spill] sm:$0xff]  ;;  %v6682_v18 = vld [vmem:[#allocation68_spill] sm:$0xff]  ;;  %v2185_v40 = vunpack.c.h.bf16 %v5930_v30  ;;  %v2188_v30 = vunpack.c.h.bf16 %v5943_v11 }
 0x3e9   : > { %2247 = vadd.xlane.f32.xlu0 %v2246_v48 }
 0x3ea   : > { %v2074_v29 = vmul.bf16 1069105081, %v1991_v22  ;;  %v2071_v36 = vmul.bf16 1069105081, %v1990_v33  ;;  %v2258_v33 = vadd.f32 %v2183_v34, %v2182_v24  ;;  %v2186_v22 = vunpack.c.l.bf16 %v5943_v11 }
 0x3eb   : > { %v1875_v7 = vpop.permute.xlu1 %1874  ;;  %v2261_v3 = vadd.f32 %v2185_v40, %v2184_v19  ;;  %v2193_v40 = vunpack.c.h.bf16 %v5950_v17 }
 0x3ec   : > { %2720 = vmatmul.mubr.bf16.gmra.mrb[76].mxu0 %v5990_v13  ;;  %2244 = vadd.xlane.f32.xlu1 %v2243_v44  ;;  %4332 = vpow.bf16 %v2074_v29  ;;  %v1954_v15 = vsub.f32 %v6680_v16, %v1875_v7  ;;  %v1955_v6 = vsub.f32 %v6681_v46, %v1875_v7  ;;  %v2187_v29 = vunpack.c.l.bf16 %v5940_v51 }
 0x3ed   : > { %2253 = vadd.xlane.f32.xlu0 %v2252_v0  ;;  %v1880_v62 = vpop.permute.xlu0 %1879  ;;  %4334 = vpow.bf16 %v2071_v36  ;;  %v2255_v0 = vadd.f32 %v2181_v55, %v2180_v47  ;;  %v2190_v16 = vunpack.c.l.bf16 %v5954_v61  ;;  %v2191_v36 = vunpack.c.l.bf16 %v5950_v17  ;;  %v6684_v55 = vld [vmem:[#allocation70_spill] sm:$0xff] }
 0x3ee   : > { %v1956_v48 = vsub.f32 %v6682_v18, %v1880_v62  ;;  %v1957_v42 = vsub.f32 %v6683_v8, %v1880_v62  ;;  %v2264_v62 = vadd.f32 %v2187_v29, %v2186_v22  ;;  %v2189_v47 = vunpack.c.h.bf16 %v5940_v51 }
 0x3ef   : > { %v6003_v44 = vpop.eup %4328  ;;  %v2270_v22 = vadd.f32 %v2191_v36, %v2190_v16  ;;  %v2194_v29 = vunpack.c.l.bf16 %v5970_v53  ;;  %v2192_v51 = vunpack.c.h.bf16 %v5954_v61  ;;  %v2196_v17 = vunpack.c.h.bf16 %v5970_v53 }
 0x3f0   : > { %v1992_v52 = vpack.c.bf16 %v1956_v48, %v1954_v15  ;;  %v1993_v60 = vpack.c.bf16 %v1957_v42, %v1955_v6  ;;  %2250 = vadd.xlane.f32.xlu1 %v2249_v39  ;;  %2727 = vmatprep.mubr.bf16.mxu0 %v6003_v44  ;;  %v6008_v24 = vpop.eup %4330  ;;  %v6685_v6 = vld [vmem:[#allocation71_spill] sm:$0xff]  ;;  %v6686_v48 = vld [vmem:[#allocation72_spill] sm:$0xff]  ;;  %v6687_v42 = vld [vmem:[#allocation73_spill] sm:$0xff] }
 0x3f1   : > { %2259 = vadd.xlane.f32.xlu0 %v2258_v33 }
 0x3f2   : > { %v2080_v7 = vmul.bf16 1069105081, %v1993_v60  ;;  %v2077_v15 = vmul.bf16 1069105081, %v1992_v52  ;;  %v2195_v52 = vunpack.c.l.bf16 %v5966_v49 }
 0x3f3   : > { %v1885_v34 = vpop.permute.xlu1 %1884 }
 0x3f4   : > { %2728 = vmatmul.mubr.bf16.gmra.mrb[80].mxu0 %v6008_v24  ;;  %2256 = vadd.xlane.f32.xlu1 %v2255_v0  ;;  %4336 = vpow.bf16 %v2080_v7  ;;  %v1958_v46 = vsub.f32 %v6684_v55, %v1885_v34  ;;  %v1959_v18 = vsub.f32 %v6685_v6, %v1885_v34  ;;  %v2267_v34 = vadd.f32 %v2189_v47, %v2188_v30  ;;  %v6688_v47 = vld [vmem:[#allocation74_spill] sm:$0xff] }
 0x3f5   : > { %2265 = vadd.xlane.f32.xlu0 %v2264_v62  ;;  %v1890_v39 = vpop.permute.xlu0 %1889  ;;  %4338 = vpow.bf16 %v2077_v15  ;;  %v2276_v36 = vadd.f32 %v2195_v52, %v2194_v29  ;;  %v2199_v15 = vunpack.c.l.bf16 %v5984_v37  ;;  %v2197_v30 = vunpack.c.h.bf16 %v5966_v49 }
 0x3f6   : > { %v1960_v8 = vsub.f32 %v6686_v48, %v1890_v39  ;;  %v1961_v33 = vsub.f32 %v6687_v42, %v1890_v39  ;;  %v2198_v39 = vunpack.c.l.bf16 %v5990_v13  ;;  %v2203_v29 = vunpack.c.l.bf16 %v6003_v44 }
 0x3f7   : > { %v6021_v60 = vpop.eup %4332  ;;  %v2279_v49 = vadd.f32 %v2197_v30, %v2196_v17 }
 0x3f8   : > { %v1994_v19 = vpack.c.bf16 %v1960_v8, %v1958_v46  ;;  %v1995_v11 = vpack.c.bf16 %v1961_v33, %v1959_v18  ;;  %2262 = vadd.xlane.f32.xlu1 %v2261_v3  ;;  %2735 = vmatprep.mubr.bf16.mxu0 %v6021_v60  ;;  %v6026_v62 = vpop.eup %4334  ;;  %v2273_v3 = vadd.f32 %v2193_v40, %v2192_v51  ;;  %v6689_v46 = vld [vmem:[#allocation75_spill] sm:$0xff]  ;;  %v6690_v18 = vld [vmem:[#allocation76_spill] sm:$0xff]  ;;  %v6691_v8 = vld [vmem:[#allocation77_spill] sm:$0xff]  ;;  %v2200_v40 = vunpack.c.h.bf16 %v5990_v13 }
 0x3f9   : > { %2271 = vadd.xlane.f32.xlu0 %v2270_v22  ;;  %v2282_v33 = vadd.f32 %v2199_v15, %v2198_v39  ;;  %v2202_v22 = vunpack.c.l.bf16 %v6008_v24  ;;  %v2204_v15 = vunpack.c.h.bf16 %v6008_v24 }
 0x3fa   : > { %v2083_v7 = vmul.bf16 1069105081, %v1994_v19  ;;  %v2086_v0 = vmul.bf16 1069105081, %v1995_v11 }
 0x3fb   : > { %v1895_v16 = vpop.permute.xlu1 %1894 }
 0x3fc   : > { %4340 = vpow.bf16 %v2083_v7  ;;  %2736 = vmatmul.mubr.bf16.gmra.mrb[84].mxu0 %v6026_v62  ;;  %2268 = vadd.xlane.f32.xlu1 %v2267_v34  ;;  %v1962_v55 = vsub.f32 %v6688_v47, %v1895_v16  ;;  %v1963_v6 = vsub.f32 %v6689_v46, %v1895_v16  ;;  %v2201_v7 = vunpack.c.h.bf16 %v5984_v37 }
 0x3fd   : > { %4342 = vpow.bf16 %v2086_v0  ;;  %2277 = vadd.xlane.f32.xlu0 %v2276_v36  ;;  %v1900_v61 = vpop.permute.xlu0 %1899  ;;  %v2288_v34 = vadd.f32 %v2203_v29, %v2202_v22  ;;  %v2206_v16 = vunpack.c.l.bf16 %v6026_v62  ;;  %v2207_v36 = vunpack.c.l.bf16 %v6021_v60 }
 0x3fe   : > { %v1964_v48 = vsub.f32 %v6690_v18, %v1900_v61  ;;  %v1965_v42 = vsub.f32 %v6691_v8, %v1900_v61  ;;  %v2285_v39 = vadd.f32 %v2201_v7, %v2200_v40  ;;  %v2205_v61 = vunpack.c.h.bf16 %v6003_v44 }
 0x3ff   : > { %v4337_v52 = vpop.eup %4336  ;;  %v2294_v13 = vadd.f32 %v2207_v36, %v2206_v16  ;;  %v2209_v46 = vunpack.c.h.bf16 %v6021_v60  ;;  %v6049_v22 = vpop.permute.xlu1 %2422 }
 0x400   : > { %v1996_v19 = vpack.c.bf16 %v1964_v48, %v1962_v55  ;;  %v1997_v11 = vpack.c.bf16 %v1965_v42, %v1963_v6  ;;  %2274 = vadd.xlane.f32.xlu1 %v2273_v3  ;;  %2743 = vmatprep.mubr.bf16.mxu0 %v4337_v52  ;;  %v4339_v0 = vpop.eup %4338  ;;  %v2211_v37 = vunpack.c.l.bf16 %v4337_v52  ;;  %v2291_v47 = vadd.f32 %v2205_v61, %v2204_v15 }
 0x401   : > { %2283 = vadd.xlane.f32.xlu0 %v2282_v33  ;;  %v2210_v17 = vunpack.c.l.bf16 %v4339_v0  ;;  %v2208_v55 = vunpack.c.h.bf16 %v6026_v62  ;;  %v6047_v44 = vpop.permute.xlu0 %2417  ;;  %v2212_v8 = vunpack.c.h.bf16 %v4339_v0  ;;  %v2213_v42 = vunpack.c.h.bf16 %v4337_v52 }
 0x402   : > { %v2089_v53 = vmul.bf16 1069105081, %v1996_v19  ;;  %v2092_v51 = vmul.bf16 1069105081, %v1997_v11  ;;  %v6692_v15 = vsub.f32 %v5678_v25, %v5689_v41 }
 0x403   : > { %v2300_v6 = vadd.f32 %v2211_v37, %v2210_v17  ;;  %v2297_v24 = vadd.f32 %v2209_v46, %v2208_v55  ;;  %v2303_v62 = vadd.f32 %v2213_v42, %v2212_v8  ;;  %v6053_v7 = vpop.permute.xlu1 %2427 }
 0x404   : > { %4344 = vpow.bf16 %v2089_v53  ;;  %2744 = vmatmul.mubr.bf16.gmra.mrb[88].mxu0 %v4339_v0  ;;  %2280 = vadd.xlane.f32.xlu1 %v2279_v49  ;;  %v1740_v61 = vmul.f32 1.442695, %v6692_v15 }
 0x405   : > { %4346 = vpow.bf16 %v2092_v51  ;;  %2289 = vadd.xlane.f32.xlu0 %v2288_v34  ;;  %v6051_v40 = vpop.permute.xlu0 %2432 }
 0x406   : > { %4348 = vpow2.f32 %v1740_v61 }
 0x407   : > { %v4341_v3 = vpop.eup %4340 }
 0x408   : > { %v4343_v30 = vpop.eup %4342  ;;  %2286 = vadd.xlane.f32.xlu1 %v2285_v39  ;;  %v2214_v18 = vunpack.c.l.bf16 %v4341_v3  ;;  %v2216_v49 = vunpack.c.h.bf16 %v4341_v3  ;;  %v6057_v39 = vpop.permute.xlu1 %2437 }
 0x409   : > { %2751 = vmatprep.mubr.bf16.mxu1 %v4343_v30  ;;  %2295 = vadd.xlane.f32.xlu0 %v2294_v13  ;;  %v2215_v48 = vunpack.c.l.bf16 %v4343_v30  ;;  %v2217_v53 = vunpack.c.h.bf16 %v4343_v30  ;;  %v6055_v16 = vpop.permute.xlu0 %2442 }
 0x40a   : > { %2752 = vmatmul.mubr.bf16.vlgmr.msra.gmra.mrb[96].mxu1 %v4341_v3 }
 0x40b   : > { %v2306_v29 = vadd.f32 %v2215_v48, %v2214_v18  ;;  %v2309_v52 = vadd.f32 %v2217_v53, %v2216_v49 }
 0x40c   : > { %2292 = vadd.xlane.f32.xlu1 %v2291_v47  ;;  %v6064_v13 = vpop.permute.xlu1 %2447 }
 0x40d   : > { %2301 = vadd.xlane.f32.xlu0 %v2300_v6  ;;  %v6062_v3 = vpop.permute.xlu0 %2452 }
 0x40f   : > { %v4345_v33 = vpop.eup %4344 }
 0x410   : > { %v4347_v19 = vpop.eup %4346  ;;  %2298 = vadd.xlane.f32.xlu1 %v2297_v24  ;;  %v2218_v11 = vunpack.c.l.bf16 %v4345_v33  ;;  %v2220_v0 = vunpack.c.h.bf16 %v4345_v33  ;;  %v6068_v37 = vpop.permute.xlu1 %2457 }
 0x411   : > { %2759 = vmatprep.mubr.bf16.mxu1 %v4347_v19  ;;  %2307 = vadd.xlane.f32.xlu0 %v2306_v29  ;;  %v2219_v60 = vunpack.c.l.bf16 %v4347_v19  ;;  %v2221_v34 = vunpack.c.h.bf16 %v4347_v19  ;;  %v6066_v17 = vpop.permute.xlu0 %2462  ;;  %v6070_v30 = vpop.eup %4348 }
 0x412   : > { %2760 = vmatmul.mubr.bf16.gmra.mrb[100].mxu1 %v4345_v33 }
 0x413   : > { %v2312_v51 = vadd.f32 %v2219_v60, %v2218_v11  ;;  %v2315_v36 = vadd.f32 %v2221_v34, %v2220_v0 }
 0x414   : > { %2304 = vadd.xlane.f32.xlu1 %v2303_v62  ;;  %v6075_v55 = vpop.permute.xlu1 %2467 }
 0x415   : > { %2313 = vadd.xlane.f32.xlu0 %v2312_v51  ;;  %v6073_v47 = vpop.permute.xlu0 %2472  ;;  %v2095_v51 = vld [vmem:[#allocation4 + $0x8] sm:$0xff] }
 0x416   : > { %v2127_v0 = vmul.f32 %v5700_v58, %v2095_v51  ;;  %v2097_v51 = vld [vmem:[#allocation4 + $0x18] sm:$0xff] }
 0x418   : > { %2310 = vadd.xlane.f32.xlu1 %v2309_v52  ;;  %v6079_v41 = vpop.permute.xlu1 %2477 }
 0x419   : > { %v6077_v25 = vpop.permute.xlu0 %2482 }
 0x41c   : > { %2316 = vadd.xlane.f32.xlu1 %v2315_v36  ;;  %v6083_v6 = vpop.permute.xlu1 %2487  ;;  %v2096_v36 = vld [vmem:[#allocation4 + $0x10] sm:$0xff] }
 0x41d   : > { %v6081_v46 = vpop.permute.xlu0 %2492 }
 0x420   : > { %v6087_v48 = vpop.permute.xlu1 %2497 }
 0x421   : > { %v6085_v18 = vpop.permute.xlu0 %2502 }
 0x424   : > { %v6091_v8 = vpop.permute.xlu1 %2507 }
 0x425   : > { %v6089_v24 = vpop.permute.xlu0 %2512 }
 0x428   : > { %v6095_v33 = vpop.permute.xlu1 %2517 }
 0x429   : > { %v6093_v42 = vpop.permute.xlu0 %2522  ;;  %6694 = vst [vmem:[#allocation82_spill] sm:$0xff] %v6095_v33 }
 0x42a   : > { %6693 = vst [vmem:[#allocation84_spill] sm:$0xff] %v6093_v42 }
 0x42b   : > { %2572 = vperm.xlu0 %4172, %v6070_v30  }
 0x42c   : > { %v6099_v19 = vpop.permute.xlu1 %2527 }
 0x42d   : > { %v6097_v29 = vpop.permute.xlu0 %2532  ;;  %6696 = vst [vmem:[#allocation83_spill] sm:$0xff] %v6099_v19 }
 0x42e   : > { %6695 = vst [vmem:[#allocation85_spill] sm:$0xff] %v6097_v29  ;;  %v2098_v29 = vld [vmem:[#allocation4 + $0x20] sm:$0xff] }
 0x42f   : > { %v2130_v58 = vmul.f32 %v5727_v1, %v2098_v29 }
 0x430   : > { %v6103_v60 = vpop.permute.xlu1 %2537 }
 0x431   : > { %v6101_v11 = vpop.permute.xlu0 %2542  ;;  %6698 = vst [vmem:[#allocation81_spill] sm:$0xff] %v6103_v60  ;;  %v2094_v60 = vld [vmem:[#allocation4] sm:$0xff] }
 0x432   : > { %6697 = vst [vmem:[#allocation79_spill] sm:$0xff] %v6101_v11  ;;  %v2128_v11 = vmul.f32 %v5712_v23, %v2096_v36  ;;  %v2129_v36 = vmul.f32 %v5718_v31, %v2097_v51 }
 0x434   : > { %v6107_v49 = vpop.permute.xlu1 %2547 }
 0x435   : > { %v6105_v62 = vpop.permute.xlu0 %2552  ;;  %6700 = vst [vmem:[#allocation27_spill] sm:$0xff] %v6107_v49 }
 0x436   : > { %6699 = vst [vmem:[#allocation26_spill] sm:$0xff] %v6105_v62 }
 0x438   : > { %v6111_v52 = vpop.permute.xlu1 %2557 }
 0x439   : > { %v6109_v53 = vpop.permute.xlu0 %2562  ;;  %6702 = vst [vmem:[#allocation29_spill] sm:$0xff] %v6111_v52 }
 0x43a   : > { %6701 = vst [vmem:[#allocation28_spill] sm:$0xff] %v6109_v53  ;;  %v2126_v53 = vmul.f32 %v5706_v63, %v2094_v60 }
 0x43c   : > { %v6114_v61 = vpop.permute.xlu1 %2567 }
 0x43d   : > { %6703 = vst [vmem:[#allocation88_spill] sm:$0xff] %v6114_v61 }
 0x466   : > { %v2227_v34 = vpop.xlane.xlu0 %2226 }
 0x467   : > { %v2319_v15 = vadd.f32 %v2227_v34, %v2127_v0  ;;  %v2100_v34 = vld [vmem:[#allocation4 + $0x30] sm:$0xff] }
 0x468   : > { %v2132_v29 = vmul.f32 %v5746_v27, %v2100_v34 }
 0x469   : > { %2352 = vst.msk [vmem:[#allocation4 + $0x8] sm:$0xff] %vm761_vm0, %v2319_v15 }
 0x46a   : > { %v2230_v62 = vpop.xlane.xlu0 %2229 }
 0x46b   : > { %v2320_v49 = vadd.f32 %v2230_v62, %v2128_v11  ;;  %v2575_v11 = vmul.f32 0.0, %v6047_v44  ;;  %v2099_v62 = vld [vmem:[#allocation4 + $0x28] sm:$0xff] }
 0x46c   : > { %v2131_v44 = vmul.f32 %v5740_v57, %v2099_v62 }
 0x46d   : > { %2353 = vst.msk [vmem:[#allocation4 + $0x10] sm:$0xff] %vm761_vm0, %v2320_v49  ;;  %v2224_v52 = vpop.xlane.xlu1 %2223 }
 0x46e   : > { %v2318_v19 = vadd.f32 %v2224_v52, %v2126_v53  ;;  %v2236_v0 = vpop.xlane.xlu0 %2235 }
 0x46f   : > { %v3869_v61 = vpop.f32.mrb[36].mxu0  ;;  %v2322_v42 = vadd.f32 %v2236_v0, %v2130_v58  ;;  %v2102_v58 = vld [vmem:[#allocation4 + $0x40] sm:$0xff] }
 0x470   : > { %v2868_v15 = vld [vmem:[#allocation4 + $0x8] sm:$0xff]  ;;  %2351 = vst.msk [vmem:[#allocation4] sm:$0xff] %vm761_vm0, %v2318_v19  ;;  %v3870_v23 = vpop.f32.mrb[37].mxu0  ;;  %v2576_v19 = vmul.f32 0.0, %v6049_v22  ;;  %v2134_v27 = vmul.f32 %v5758_v59, %v2102_v58 }
 0x471   : > { %4350 = vrcp.f32 %v2868_v15  ;;  %2355 = vst.msk [vmem:[#allocation4 + $0x20] sm:$0xff] %vm761_vm0, %v2322_v42  ;;  %v3871_v63 = vadd.f32 %v3870_v23, %v3869_v61  ;;  %v3872_v60 = vpop.f32.mrb[38].mxu0  ;;  %v2233_v1 = vpop.xlane.xlu1 %2232  ;;  %v2101_v61 = vld [vmem:[#allocation4 + $0x38] sm:$0xff]  ;;  %v2104_v23 = vld [vmem:[#allocation4 + $0x50] sm:$0xff] }
 0x472   : > { %v3873_v49 = vpop.f32.mrb[39].mxu0  ;;  %v2321_v53 = vadd.f32 %v2233_v1, %v2129_v36  ;;  %v2242_v52 = vpop.xlane.xlu0 %2241  ;;  %v2133_v57 = vmul.f32 %v5749_v35, %v2101_v61  ;;  %v2136_v62 = vmul.f32 %v5777_v38, %v2104_v23 }
 0x473   : > { %v3874_v0 = vadd.f32 %v3873_v49, %v3872_v60  ;;  %v2324_v33 = vadd.f32 %v2242_v52, %v2132_v29  ;;  %v6127_v31 = vadd.f32 %v3871_v63, %v2575_v11  ;;  %v2103_v49 = vld [vmem:[#allocation4 + $0x48] sm:$0xff] }
 0x474   : > { %2354 = vst.msk [vmem:[#allocation4 + $0x18] sm:$0xff] %vm761_vm0, %v2321_v53  ;;  %v2869_v11 = vld [vmem:[#allocation4 + $0x10] sm:$0xff]  ;;  %v2578_v53 = vmul.f32 0.0, %v6051_v40  ;;  %v2135_v38 = vmul.f32 %v5771_v9, %v2103_v49 }
 0x475   : > { %2357 = vst.msk [vmem:[#allocation4 + $0x30] sm:$0xff] %vm761_vm0, %v2324_v33  ;;  %v2239_v42 = vpop.xlane.xlu1 %2238  ;;  %v6133_v51 = vadd.f32 %v3874_v0, %v2576_v19  ;;  %v2577_v33 = vmul.f32 0.0, %v6053_v7  ;;  %v2106_v0 = vld [vmem:[#allocation4 + $0x60] sm:$0xff] }
 0x476   : > { %v2323_v34 = vadd.f32 %v2239_v42, %v2131_v44  ;;  %v2248_v15 = vpop.xlane.xlu0 %2247 }
 0x477   : > { %v2867_v22 = vld [vmem:[#allocation4] sm:$0xff]  ;;  %v3875_v36 = vpop.f32.mrb[40].mxu0  ;;  %v2326_v60 = vadd.f32 %v2248_v15, %v2134_v27  ;;  %v2105_v15 = vld [vmem:[#allocation4 + $0x58] sm:$0xff] }
 0x478   : > { %4352 = vrcp.f32 %v2867_v22  ;;  %2356 = vst.msk [vmem:[#allocation4 + $0x28] sm:$0xff] %vm761_vm0, %v2323_v34  ;;  %v3876_v63 = vpop.f32.mrb[41].mxu0  ;;  %v2871_v61 = vld [vmem:[#allocation4 + $0x20] sm:$0xff]  ;;  %v2138_v34 = vmul.f32 %v5782_v5, %v2106_v0 }
 0x479   : > { %2359 = vst.msk [vmem:[#allocation4 + $0x40] sm:$0xff] %vm761_vm0, %v2326_v60  ;;  %v3877_v59 = vadd.f32 %v3876_v63, %v3875_v36  ;;  %v3878_v1 = vpop.f32.mrb[42].mxu0  ;;  %v2245_v29 = vpop.xlane.xlu1 %2244  ;;  %4354 = vrcp.f32 %v2869_v11  ;;  %v2108_v60 = vld [vmem:[#allocation4 + $0x70] sm:$0xff] }
 0x47a   : > { %v3879_v52 = vpop.f32.mrb[43].mxu0  ;;  %v2325_v58 = vadd.f32 %v2245_v29, %v2133_v57  ;;  %v2254_v19 = vpop.xlane.xlu0 %2253  ;;  %v2140_v49 = vmul.f32 %v5790_v45, %v2108_v60 }
 0x47b   : > { %v4351_v44 = vpop.eup %4350  ;;  %v2870_v42 = vld [vmem:[#allocation4 + $0x18] sm:$0xff]  ;;  %v3880_v35 = vadd.f32 %v3879_v52, %v3878_v1  ;;  %v2328_v27 = vadd.f32 %v2254_v19, %v2136_v62  ;;  %v6141_v7 = vadd.f32 %v3877_v59, %v2577_v33  ;;  %v2137_v59 = vmul.f32 %v5779_v43, %v2105_v15 }
 0x47c   : > { %4356 = vrcp.f32 %v2870_v42  ;;  %2358 = vst.msk [vmem:[#allocation4 + $0x38] sm:$0xff] %vm761_vm0, %v2325_v58  ;;  %2970 = vperm.xlu0 %4172, %v4351_v44   ;;  %v2873_v33 = vld [vmem:[#allocation4 + $0x30] sm:$0xff]  ;;  %v2579_v1 = vmul.f32 0.0, %v6057_v39  ;;  %v2580_v58 = vmul.f32 0.0, %v6055_v16  ;;  %v2110_v42 = vld [vmem:[#allocation4 + $0x80] sm:$0xff] }
 0x47d   : > { %2361 = vst.msk [vmem:[#allocation4 + $0x50] sm:$0xff] %vm761_vm0, %v2328_v27  ;;  %v2251_v40 = vpop.xlane.xlu1 %2250  ;;  %v6147_v23 = vadd.f32 %v3880_v35, %v2578_v53  ;;  %4358 = vrcp.f32 %v2871_v61  ;;  %v2107_v53 = vld [vmem:[#allocation4 + $0x68] sm:$0xff] }
 0x47e   : > { %v2327_v22 = vadd.f32 %v2251_v40, %v2135_v38  ;;  %v2260_v36 = vpop.xlane.xlu0 %2259  ;;  %v2139_v45 = vmul.f32 %v5787_v28, %v2107_v53  ;;  %v2142_v40 = vmul.f32 %v5810_v56, %v2110_v42  ;;  %v2111_v53 = vld [vmem:[#allocation4 + $0x88] sm:$0xff]  ;;  %v2114_v42 = vld [vmem:[#allocation4 + $0xa0] sm:$0xff] }
 0x47f   : > { %v2872_v11 = vld [vmem:[#allocation4 + $0x28] sm:$0xff]  ;;  %v3881_v63 = vpop.f32.mrb[44].mxu0  ;;  %v2330_v57 = vadd.f32 %v2260_v36, %v2138_v34  ;;  %v2109_v34 = vld [vmem:[#allocation4 + $0x78] sm:$0xff] }
 0x480   : > { %4360 = vrcp.f32 %v2872_v11  ;;  %2360 = vst.msk [vmem:[#allocation4 + $0x48] sm:$0xff] %vm761_vm0, %v2327_v22  ;;  %v3882_v9 = vpop.f32.mrb[45].mxu0  ;;  %v2875_v61 = vld [vmem:[#allocation4 + $0x40] sm:$0xff]  ;;  %v2112_v11 = vld [vmem:[#allocation4 + $0x90] sm:$0xff]  ;;  %v2141_v56 = vmul.f32 %v5804_v50, %v2109_v34 }
 0x481   : > { %2363 = vst.msk [vmem:[#allocation4 + $0x60] sm:$0xff] %vm761_vm0, %v2330_v57  ;;  %v3883_v5 = vadd.f32 %v3882_v9, %v3881_v63  ;;  %v3884_v29 = vpop.f32.mrb[46].mxu0  ;;  %v2257_v62 = vpop.xlane.xlu1 %2256  ;;  %4362 = vrcp.f32 %v2873_v33 }
 0x482   : > { %v4353_v52 = vpop.eup %4352  ;;  %v3885_v19 = vpop.f32.mrb[47].mxu0  ;;  %v2329_v0 = vadd.f32 %v2257_v62, %v2137_v59 }
 0x483   : > { %v2266_v44 = vpop.xlane.xlu0 %2265  ;;  %v2874_v35 = vld [vmem:[#allocation4 + $0x38] sm:$0xff]  ;;  %v3886_v43 = vadd.f32 %v3885_v19, %v3884_v29  ;;  %2965 = vperm.xlu1 %4173, %v4353_v52   ;;  %v6155_v39 = vadd.f32 %v3883_v5, %v2579_v1  ;;  %v4355_v38 = vpop.eup %4354  ;;  %v2581_v1 = vmul.f32 0.0, %v6064_v13 }
 0x484   : > { %v2332_v27 = vadd.f32 %v2266_v44, %v2140_v49  ;;  %4364 = vrcp.f32 %v2874_v35  ;;  %2362 = vst.msk [vmem:[#allocation4 + $0x58] sm:$0xff] %vm761_vm0, %v2329_v0  ;;  %v2877_v28 = vld [vmem:[#allocation4 + $0x50] sm:$0xff]  ;;  %v2144_v49 = vmul.f32 %v5822_v32, %v2112_v11  ;;  %v2143_v32 = vmul.f32 %v5813_v20, %v2111_v53 }
 0x485   : > { %v2263_v16 = vpop.xlane.xlu1 %2262  ;;  %v6161_v15 = vadd.f32 %v3886_v43, %v2580_v58  ;;  %4366 = vrcp.f32 %v2875_v61  ;;  %v2582_v58 = vmul.f32 0.0, %v6062_v3 }
 0x486   : > { %2365 = vst.msk [vmem:[#allocation4 + $0x70] sm:$0xff] %vm761_vm0, %v2332_v27  ;;  %v4357_v22 = vpop.eup %4356  ;;  %v2331_v36 = vadd.f32 %v2263_v16, %v2139_v45  ;;  %v2146_v45 = vmul.f32 %v5835_v54, %v2114_v42 }
 0x487   : > { %v2272_v60 = vpop.xlane.xlu0 %2271  ;;  %v2876_v63 = vld [vmem:[#allocation4 + $0x48] sm:$0xff]  ;;  %v3887_v57 = vpop.f32.mrb[48].mxu0  ;;  %2980 = vperm.xlu0 %4172, %v4357_v22   ;;  %2975 = vperm.xlu1 %4173, %v4355_v38   ;;  %v2113_v38 = vld [vmem:[#allocation4 + $0x98] sm:$0xff] }
 0x488   : > { %v2334_v33 = vadd.f32 %v2272_v60, %v2142_v40  ;;  %4368 = vrcp.f32 %v2876_v63  ;;  %2364 = vst.msk [vmem:[#allocation4 + $0x68] sm:$0xff] %vm761_vm0, %v2331_v36  ;;  %v3888_v9 = vpop.f32.mrb[49].mxu0  ;;  %v4359_v59 = vpop.eup %4358  ;;  %v2879_v27 = vld [vmem:[#allocation4 + $0x60] sm:$0xff]  ;;  %v2116_v36 = vld [vmem:[#allocation4 + $0xb0] sm:$0xff]  ;;  %v2145_v54 = vmul.f32 %v5825_v21, %v2113_v38 }
 0x489   : > { %v3889_v5 = vadd.f32 %v3888_v9, %v3887_v57  ;;  %v3890_v29 = vpop.f32.mrb[50].mxu0  ;;  %v2269_v62 = vpop.xlane.xlu1 %2268  ;;  %4370 = vrcp.f32 %v2877_v28  ;;  %v2583_v28 = vmul.f32 0.0, %v6068_v37 }
 0x48a   : > { %2367 = vst.msk [vmem:[#allocation4 + $0x80] sm:$0xff] %vm761_vm0, %v2334_v33  ;;  %v4361_v52 = vpop.eup %4360  ;;  %v3891_v19 = vpop.f32.mrb[51].mxu0  ;;  %v2333_v0 = vadd.f32 %v2269_v62, %v2141_v56  ;;  %v2584_v62 = vmul.f32 0.0, %v6066_v17 }
 0x48b   : > { %v2278_v44 = vpop.xlane.xlu0 %2277  ;;  %v2878_v50 = vld [vmem:[#allocation4 + $0x58] sm:$0xff]  ;;  %v3892_v35 = vadd.f32 %v3891_v19, %v3890_v29  ;;  %2990 = vperm.xlu0 %4172, %v4361_v52   ;;  %2985 = vperm.xlu1 %4173, %v4359_v59   ;;  %v6169_v13 = vadd.f32 %v3889_v5, %v2581_v1  ;;  %v4363_v61 = vpop.eup %4362  ;;  %v2148_v1 = vmul.f32 %v5853_v14, %v2116_v36  ;;  %v2115_v5 = vld [vmem:[#allocation4 + $0xa8] sm:$0xff]  ;;  %v2585_v36 = vmul.f32 0.0, %v6075_v55 }
 0x48c   : > { %v2336_v43 = vadd.f32 %v2278_v44, %v2144_v49  ;;  %4372 = vrcp.f32 %v2878_v50  ;;  %2366 = vst.msk [vmem:[#allocation4 + $0x78] sm:$0xff] %vm761_vm0, %v2333_v0  ;;  %v2147_v14 = vmul.f32 %v5847_v4, %v2115_v5 }
 0x48d   : > { %v2275_v3 = vpop.xlane.xlu1 %2274  ;;  %v6175_v16 = vadd.f32 %v3892_v35, %v2582_v58  ;;  %4374 = vrcp.f32 %v2879_v27  ;;  %v2881_v20 = vld [vmem:[#allocation4 + $0x70] sm:$0xff]  ;;  %v2118_v58 = vld [vmem:[#allocation4 + $0xc0] sm:$0xff]  ;;  %v2117_v35 = vld [vmem:[#allocation4 + $0xb8] sm:$0xff] }
 0x48e   : > { %2369 = vst.msk [vmem:[#allocation4 + $0x90] sm:$0xff] %vm761_vm0, %v2336_v43  ;;  %v4365_v40 = vpop.eup %4364  ;;  %v2335_v34 = vadd.f32 %v2275_v3, %v2143_v32  ;;  %v2150_v50 = vmul.f32 %v5872_v10, %v2118_v58  ;;  %v2120_v3 = vld [vmem:[#allocation4 + $0xd0] sm:$0xff]  ;;  %v2149_v10 = vmul.f32 %v5866_v12, %v2117_v35  ;;  %v6705_v35 = vld [vmem:[#allocation24_spill] sm:$0xff] }
 0x48f   : > { %v2284_v22 = vpop.xlane.xlu0 %2283  ;;  %v2880_v60 = vld [vmem:[#allocation4 + $0x68] sm:$0xff]  ;;  %v3893_v11 = vpop.f32.mrb[52].mxu0  ;;  %3000 = vperm.xlu0 %4172, %v4365_v40   ;;  %2995 = vperm.xlu1 %4173, %v4363_v61  }
 0x490   : > { %v2338_v63 = vadd.f32 %v2284_v22, %v2146_v45  ;;  %4376 = vrcp.f32 %v2880_v60  ;;  %2368 = vst.msk [vmem:[#allocation4 + $0x88] sm:$0xff] %vm761_vm0, %v2335_v34  ;;  %v3894_v57 = vpop.f32.mrb[53].mxu0  ;;  %v4367_v33 = vpop.eup %4366 }
 0x491   : > { %v3895_v9 = vadd.f32 %v3894_v57, %v3893_v11  ;;  %v3896_v56 = vpop.f32.mrb[54].mxu0  ;;  %v2281_v59 = vpop.xlane.xlu1 %2280  ;;  %4378 = vrcp.f32 %v2881_v20  ;;  %v2883_v44 = vld [vmem:[#allocation4 + $0x80] sm:$0xff]  ;;  %v2152_v20 = vmul.f32 %v5889_v26, %v2120_v3  ;;  %v2119_v57 = vld [vmem:[#allocation4 + $0xc8] sm:$0xff] }
 0x492   : > { %2371 = vst.msk [vmem:[#allocation4 + $0xa0] sm:$0xff] %vm761_vm0, %v2338_v63  ;;  %v4369_v29 = vpop.eup %4368  ;;  %v3897_v49 = vpop.f32.mrb[55].mxu0  ;;  %v2337_v53 = vadd.f32 %v2281_v59, %v2145_v54  ;;  %v2122_v59 = vld [vmem:[#allocation4 + $0xe0] sm:$0xff]  ;;  %v2151_v26 = vmul.f32 %v5876_v2, %v2119_v57 }
 0x493   : > { %v2290_v52 = vpop.xlane.xlu0 %2289  ;;  %v2882_v21 = vld [vmem:[#allocation4 + $0x78] sm:$0xff]  ;;  %v3898_v19 = vadd.f32 %v3897_v49, %v3896_v56  ;;  %3010 = vperm.xlu0 %4172, %v4369_v29   ;;  %3005 = vperm.xlu1 %4173, %v4367_v33   ;;  %v6183_v37 = vadd.f32 %v3895_v9, %v2583_v28  ;;  %v4371_v42 = vpop.eup %4370  ;;  %v2586_v33 = vmul.f32 0.0, %v6073_v47  ;;  %v6704_v49 = vld [vmem:[#allocation25_spill] sm:$0xff] }
 0x494   : > { %v2340_v0 = vadd.f32 %v2290_v52, %v2148_v1  ;;  %4380 = vrcp.f32 %v2882_v21  ;;  %2370 = vst.msk [vmem:[#allocation4 + $0x98] sm:$0xff] %vm761_vm0, %v2337_v53  ;;  %v2154_v53 = vmul.f32 %v6704_v49, %v2122_v59  ;;  %v2121_v52 = vld [vmem:[#allocation4 + $0xd8] sm:$0xff] }
 0x495   : > { %v2287_v17 = vpop.xlane.xlu1 %2286  ;;  %v6189_v43 = vadd.f32 %v3898_v19, %v2584_v62  ;;  %4382 = vrcp.f32 %v2883_v44  ;;  %v2885_v4 = vld [vmem:[#allocation4 + $0x90] sm:$0xff] }
 0x496   : > { %2373 = vst.msk [vmem:[#allocation4 + $0xb0] sm:$0xff] %vm761_vm0, %v2340_v0  ;;  %v4373_v27 = vpop.eup %4372  ;;  %v2339_v32 = vadd.f32 %v2287_v17, %v2147_v14  ;;  %v2124_v44 = vld [vmem:[#allocation4 + $0xf0] sm:$0xff] }
 0x497   : > { %v2296_v61 = vpop.xlane.xlu0 %2295  ;;  %v2884_v45 = vld [vmem:[#allocation4 + $0x88] sm:$0xff]  ;;  %v3899_v38 = vpop.f32.mrb[56].mxu0  ;;  %3020 = vperm.xlu0 %4172, %v4373_v27   ;;  %3015 = vperm.xlu1 %4173, %v4371_v42   ;;  %v2153_v27 = vmul.f32 %v6705_v35, %v2121_v52 }
 0x498   : > { %v2342_v40 = vadd.f32 %v2296_v61, %v2150_v50  ;;  %4384 = vrcp.f32 %v2884_v45  ;;  %2372 = vst.msk [vmem:[#allocation4 + $0xa8] sm:$0xff] %vm761_vm0, %v2339_v32  ;;  %v3900_v34 = vpop.f32.mrb[57].mxu0  ;;  %v4375_v22 = vpop.eup %4374  ;;  %v2587_v61 = vmul.f32 0.0, %v6079_v41 }
 0x499   : > { %v3901_v60 = vadd.f32 %v3900_v34, %v3899_v38  ;;  %v3902_v11 = vpop.f32.mrb[58].mxu0  ;;  %v2293_v63 = vpop.xlane.xlu1 %2292  ;;  %4386 = vrcp.f32 %v2885_v4  ;;  %v2887_v29 = vld [vmem:[#allocation4 + $0xa0] sm:$0xff]  ;;  %v2123_v34 = vld [vmem:[#allocation4 + $0xe8] sm:$0xff] }
 0x49a   : > { %2375 = vst.msk [vmem:[#allocation4 + $0xc0] sm:$0xff] %vm761_vm0, %v2342_v40  ;;  %v4377_v54 = vpop.eup %4376  ;;  %v3903_v28 = vpop.f32.mrb[59].mxu0  ;;  %v2341_v9 = vadd.f32 %v2293_v63, %v2149_v10  ;;  %v6706_v40 = vld [vmem:[#allocation80_spill] sm:$0xff] }
 0x49b   : > { %v2302_v56 = vpop.xlane.xlu0 %2301  ;;  %v2886_v12 = vld [vmem:[#allocation4 + $0x98] sm:$0xff]  ;;  %v3904_v1 = vadd.f32 %v3903_v28, %v3902_v11  ;;  %3030 = vperm.xlu0 %4172, %v4377_v54   ;;  %3025 = vperm.xlu1 %4173, %v4375_v22   ;;  %v6197_v55 = vadd.f32 %v3901_v60, %v2585_v36  ;;  %v4379_v62 = vpop.eup %4378  ;;  %v2156_v4 = vmul.f32 %v6706_v40, %v2124_v44  ;;  %v2588_v22 = vmul.f32 0.0, %v6077_v25 }
 0x49c   : > { %v2344_v5 = vadd.f32 %v2302_v56, %v2152_v20  ;;  %4388 = vrcp.f32 %v2886_v12  ;;  %2374 = vst.msk [vmem:[#allocation4 + $0xb8] sm:$0xff] %vm761_vm0, %v2341_v9  ;;  %v2125_v56 = vld [vmem:[#allocation4 + $0xf8] sm:$0xff] }
 0x49d   : > { %v2299_v47 = vpop.xlane.xlu1 %2298  ;;  %v6203_v58 = vadd.f32 %v3904_v1, %v2586_v33  ;;  %4390 = vrcp.f32 %v2887_v29  ;;  %v2889_v2 = vld [vmem:[#allocation4 + $0xb0] sm:$0xff] }
 0x49e   : > { %2377 = vst.msk [vmem:[#allocation4 + $0xd0] sm:$0xff] %vm761_vm0, %v2344_v5  ;;  %v4381_v21 = vpop.eup %4380  ;;  %v2343_v19 = vadd.f32 %v2299_v47, %v2151_v26  ;;  %v6707_v33 = vld [vmem:[#allocation78_spill] sm:$0xff]  ;;  %v2157_v47 = vmul.f32 %v6070_v30, %v2125_v56 }
 0x49f   : > { %v2308_v0 = vpop.xlane.xlu0 %2307  ;;  %v2888_v14 = vld [vmem:[#allocation4 + $0xa8] sm:$0xff]  ;;  %v3905_v42 = vpop.f32.mrb[60].mxu0  ;;  %3040 = vperm.xlu0 %4172, %v4381_v21   ;;  %3035 = vperm.xlu1 %4173, %v4379_v62   ;;  %v2155_v28 = vmul.f32 %v6707_v33, %v2123_v34 }
 0x4a0   : > { %v2346_v17 = vadd.f32 %v2308_v0, %v2154_v53  ;;  %4392 = vrcp.f32 %v2888_v14  ;;  %2376 = vst.msk [vmem:[#allocation4 + $0xc8] sm:$0xff] %vm761_vm0, %v2343_v19  ;;  %v3906_v50 = vpop.f32.mrb[61].mxu0  ;;  %v4383_v32 = vpop.eup %4382  ;;  %v2589_v53 = vmul.f32 0.0, %v6083_v6 }
 0x4a1   : > { %v3907_v3 = vadd.f32 %v3906_v50, %v3905_v42  ;;  %v3908_v45 = vpop.f32.mrb[62].mxu0  ;;  %v2305_v38 = vpop.xlane.xlu1 %2304  ;;  %4394 = vrcp.f32 %v2889_v2  ;;  %v2891_v54 = vld [vmem:[#allocation4 + $0xc0] sm:$0xff]  ;;  %v2590_v42 = vmul.f32 0.0, %v6081_v46 }
 0x4a2   : > { %2379 = vst.msk [vmem:[#allocation4 + $0xe0] sm:$0xff] %vm761_vm0, %v2346_v17  ;;  %v4385_v10 = vpop.eup %4384  ;;  %v3909_v36 = vpop.f32.mrb[63].mxu0  ;;  %v2345_v60 = vadd.f32 %v2305_v38, %v2153_v27  ;;  %v2591_v38 = vmul.f32 0.0, %v6087_v48 }
 0x4a3   : > { %v2314_v11 = vpop.xlane.xlu0 %2313  ;;  %v2890_v63 = vld [vmem:[#allocation4 + $0xb8] sm:$0xff]  ;;  %v3910_v20 = vadd.f32 %v3909_v36, %v3908_v45  ;;  %3050 = vperm.xlu0 %4172, %v4385_v10   ;;  %3045 = vperm.xlu1 %4173, %v4383_v32   ;;  %v6211_v41 = vadd.f32 %v3907_v3, %v2587_v61  ;;  %v4387_v9 = vpop.eup %4386 }
 0x4a4   : > { %v2348_v57 = vadd.f32 %v2314_v11, %v2156_v4  ;;  %4396 = vrcp.f32 %v2890_v63  ;;  %2378 = vst.msk [vmem:[#allocation4 + $0xd8] sm:$0xff] %vm761_vm0, %v2345_v60 }
 0x4a5   : > { %v2311_v25 = vpop.xlane.xlu1 %2310  ;;  %v6216_v59 = vadd.f32 %v3910_v20, %v2588_v22  ;;  %4398 = vrcp.f32 %v2891_v54  ;;  %v2893_v26 = vld [vmem:[#allocation4 + $0xd0] sm:$0xff]  ;;  %v2592_v22 = vmul.f32 0.0, %v6085_v18 }
 0x4a6   : > { %2381 = vst.msk [vmem:[#allocation4 + $0xf0] sm:$0xff] %vm761_vm0, %v2348_v57  ;;  %v4389_v12 = vpop.eup %4388  ;;  %v2347_v1 = vadd.f32 %v2311_v25, %v2155_v28  ;;  %v2593_v28 = vmul.f32 0.0, %v6091_v8  ;;  %v6708_v8 = vld [vmem:[#allocation82_spill] sm:$0xff] }
 0x4a7   : > { %v2892_v5 = vld [vmem:[#allocation4 + $0xc8] sm:$0xff]  ;;  %v3911_v29 = vpop.f32.mrb[64].mxu0  ;;  %3060 = vperm.xlu0 %4172, %v4389_v12   ;;  %3055 = vperm.xlu1 %4173, %v4387_v9   ;;  %v4391_v49 = vpop.eup %4390  ;;  %v2594_v12 = vmul.f32 0.0, %v6089_v24 }
 0x4a8   : > { %4400 = vrcp.f32 %v2892_v5  ;;  %2380 = vst.msk [vmem:[#allocation4 + $0xe8] sm:$0xff] %vm761_vm0, %v2347_v1  ;;  %v3912_v62 = vpop.f32.mrb[65].mxu0 }
 0x4a9   : > { %v3913_v52 = vadd.f32 %v3912_v62, %v3911_v29  ;;  %v3914_v21 = vpop.f32.mrb[66].mxu0  ;;  %v2317_v19 = vpop.xlane.xlu1 %2316  ;;  %4402 = vrcp.f32 %v2893_v26  ;;  %v2895_v35 = vld [vmem:[#allocation4 + $0xe0] sm:$0xff] }
 0x4aa   : > { %v4393_v0 = vpop.eup %4392  ;;  %v3915_v44 = vpop.f32.mrb[67].mxu0  ;;  %v2349_v14 = vadd.f32 %v2317_v19, %v2157_v47 }
 0x4ab   : > { %v2894_v17 = vld [vmem:[#allocation4 + $0xd8] sm:$0xff]  ;;  %v3916_v2 = vadd.f32 %v3915_v44, %v3914_v21  ;;  %3070 = vperm.xlu0 %4172, %v4393_v0   ;;  %3065 = vperm.xlu1 %4173, %v4391_v49   ;;  %v6222_v50 = vadd.f32 %v3913_v52, %v2589_v53  ;;  %v4395_v30 = vpop.eup %4394  ;;  %v2595_v53 = vmul.f32 0.0, %v6708_v8  ;;  %v6709_v0 = vld [vmem:[#allocation84_spill] sm:$0xff] }
 0x4ac   : > { %4404 = vrcp.f32 %v2894_v17  ;;  %2382 = vst.msk [vmem:[#allocation4 + $0xf8] sm:$0xff] %vm761_vm0, %v2349_v14  ;;  %v2596_v24 = vmul.f32 0.0, %v6709_v0 }
 0x4ad   : > { %v6225_v6 = vadd.f32 %v3916_v2, %v2590_v42  ;;  %4406 = vrcp.f32 %v2895_v35  ;;  %v2897_v46 = vld [vmem:[#allocation4 + $0xf0] sm:$0xff]  ;;  %v6710_v35 = vld [vmem:[#allocation83_spill] sm:$0xff] }
 0x4ae   : > { %v4397_v27 = vpop.eup %4396 }
 0x4af   : > { %v2896_v32 = vld [vmem:[#allocation4 + $0xe8] sm:$0xff]  ;;  %v3917_v61 = vpop.f32.mrb[68].mxu0  ;;  %3080 = vperm.xlu0 %4172, %v4397_v27   ;;  %3075 = vperm.xlu1 %4173, %v4395_v30   ;;  %v4399_v45 = vpop.eup %4398  ;;  %v2597_v30 = vmul.f32 0.0, %v6710_v35 }
 0x4b0   : > { %4408 = vrcp.f32 %v2896_v32  ;;  %v3918_v3 = vpop.f32.mrb[69].mxu0 }
 0x4b1   : > { %v3919_v40 = vadd.f32 %v3918_v3, %v3917_v61  ;;  %v3920_v4 = vpop.f32.mrb[70].mxu0  ;;  %4410 = vrcp.f32 %v2897_v46  ;;  %v6711_v46 = vld [vmem:[#allocation85_spill] sm:$0xff] }
 0x4b2   : > { %v4401_v34 = vpop.eup %4400  ;;  %v3921_v10 = vpop.f32.mrb[71].mxu0  ;;  %v2598_v3 = vmul.f32 0.0, %v6711_v46 }
 0x4b3   : > { %v2898_v36 = vld [vmem:[#allocation4 + $0xf8] sm:$0xff]  ;;  %v3922_v60 = vadd.f32 %v3921_v10, %v3920_v4  ;;  %3090 = vperm.xlu0 %4172, %v4401_v34   ;;  %3085 = vperm.xlu1 %4173, %v4399_v45   ;;  %v6229_v11 = vadd.f32 %v3919_v40, %v2591_v38  ;;  %v4403_v63 = vpop.eup %4402  ;;  %v6712_v10 = vld [vmem:[#allocation81_spill] sm:$0xff] }
 0x4b4   : > { %4412 = vrcp.f32 %v2898_v36 }
 0x4b5   : > { %v6231_v20 = vadd.f32 %v3922_v60, %v2592_v22  ;;  %v2599_v22 = vmul.f32 0.0, %v6712_v10 }
 0x4b6   : > { %v4405_v57 = vpop.eup %4404 }
 0x4b7   : > { %v3923_v54 = vpop.f32.mrb[72].mxu0  ;;  %3100 = vperm.xlu0 %4172, %v4405_v57   ;;  %3095 = vperm.xlu1 %4173, %v4403_v63   ;;  %v4407_v33 = vpop.eup %4406  ;;  %v6713_v57 = vld [vmem:[#allocation79_spill] sm:$0xff] }
 0x4b8   : > { %v3924_v48 = vpop.f32.mrb[73].mxu0 }
 0x4b9   : > { %v3925_v18 = vadd.f32 %v3924_v48, %v3923_v54  ;;  %v3926_v9 = vpop.f32.mrb[74].mxu0  ;;  %v2600_v54 = vmul.f32 0.0, %v6713_v57 }
 0x4ba   : > { %v4409_v25 = vpop.eup %4408  ;;  %v3927_v56 = vpop.f32.mrb[75].mxu0 }
 0x4bb   : > { %v3928_v1 = vadd.f32 %v3927_v56, %v3926_v9  ;;  %3110 = vperm.xlu0 %4172, %v4409_v25   ;;  %3105 = vperm.xlu1 %4173, %v4407_v33   ;;  %v6235_v5 = vadd.f32 %v3925_v18, %v2593_v28  ;;  %v4411_v29 = vpop.eup %4410  ;;  %v6714_v25 = vld [vmem:[#allocation27_spill] sm:$0xff] }
 0x4bc   : > { %v2601_v56 = vmul.f32 0.0, %v6714_v25 }
 0x4bd   : > { %v6237_v26 = vadd.f32 %v3928_v1, %v2594_v12 }
 0x4be   : > { %v4413_v62 = vpop.eup %4412 }
 0x4bf   : > { %v3929_v47 = vpop.f32.mrb[76].mxu0  ;;  %3120 = vperm.xlu0 %4172, %v4413_v62   ;;  %3115 = vperm.xlu1 %4173, %v4411_v29   ;;  %v6715_v62 = vld [vmem:[#allocation26_spill] sm:$0xff] }
 0x4c0   : > { %v3930_v49 = vpop.f32.mrb[77].mxu0 }
 0x4c1   : > { %v3931_v52 = vadd.f32 %v3930_v49, %v3929_v47  ;;  %v3932_v21 = vpop.f32.mrb[78].mxu0  ;;  %v2602_v47 = vmul.f32 0.0, %v6715_v62 }
 0x4c2   : > { %v3933_v19 = vpop.f32.mrb[79].mxu0 }
 0x4c3   : > { %v3934_v44 = vadd.f32 %v3933_v19, %v3932_v21  ;;  %v6241_v14 = vadd.f32 %v3931_v52, %v2595_v53  ;;  %v6716_v19 = vld [vmem:[#allocation29_spill] sm:$0xff] }
 0x4c4   : > { %v2603_v0 = vmul.f32 0.0, %v6716_v19 }
 0x4c5   : > { %v6243_v42 = vadd.f32 %v3934_v44, %v2596_v24 }
 0x4c7   : > { %v3935_v17 = vpop.f32.mrb[80].mxu0 }
 0x4c8   : > { %v3936_v2 = vpop.f32.mrb[81].mxu0 }
 0x4c9   : > { %v3937_v27 = vadd.f32 %v3936_v2, %v3935_v17  ;;  %v3938_v32 = vpop.f32.mrb[82].mxu0  ;;  %v6717_v2 = vld [vmem:[#allocation28_spill] sm:$0xff] }
 0x4ca   : > { %v3939_v61 = vpop.f32.mrb[83].mxu0  ;;  %v2604_v35 = vmul.f32 0.0, %v6717_v2 }
 0x4cb   : > { %v3940_v45 = vadd.f32 %v3939_v61, %v3938_v32  ;;  %v6247_v38 = vadd.f32 %v3937_v27, %v2597_v30 }
 0x4cd   : > { %v6249_v40 = vadd.f32 %v3940_v45, %v2598_v3  ;;  %v6718_v3 = vld [vmem:[#allocation88_spill] sm:$0xff] }
 0x4ce   : > { %v2605_v45 = vmul.f32 0.0, %v6718_v3 }
 0x4cf   : > { %v3941_v4 = vpop.f32.mrb[84].mxu0 }
 0x4d0   : > { %v3942_v34 = vpop.f32.mrb[85].mxu0 }
 0x4d1   : > { %v3943_v36 = vadd.f32 %v3942_v34, %v3941_v4  ;;  %v3944_v60 = vpop.f32.mrb[86].mxu0 }
 0x4d2   : > { %v3945_v63 = vpop.f32.mrb[87].mxu0 }
 0x4d3   : > { %v3946_v48 = vadd.f32 %v3945_v63, %v3944_v60  ;;  %v6253_v33 = vadd.f32 %v3943_v36, %v2599_v22  ;;  %v6274_v60 = vpop.permute.xlu0 %2572 }
 0x4d5   : > { %v6255_v28 = vadd.f32 %v3946_v48, %v2600_v54  ;;  %v6280_v54 = vld [vmem:[%s6426_s5] ss:$0 sm:$0xff] }
 0x4d7   : > { %v3947_v18 = vpop.f32.mrb[88].mxu0 }
 0x4d8   : > { %v3948_v9 = vpop.f32.mrb[89].mxu0 }
 0x4d9   : > { %v3949_v12 = vadd.f32 %v3948_v9, %v3947_v18  ;;  %v3950_v1 = vpop.f32.mrb[90].mxu0 }
 0x4da   : > { %v3951_v29 = vpop.f32.mrb[91].mxu0 }
 0x4db   : > { %v3952_v49 = vadd.f32 %v3951_v29, %v3950_v1  ;;  %v6259_v8 = vadd.f32 %v3949_v12, %v2601_v56 }
 0x4dd   : > { %v3953_v53 = vpop.f32.mrb[96].mxu1  ;;  %v6261_v52 = vadd.f32 %v3952_v49, %v2602_v47 }
 0x4de   : > { %v3954_v21 = vpop.f32.mrb[97].mxu1 }
 0x4df   : > { %v3955_v24 = vadd.f32 %v3954_v21, %v3953_v53  ;;  %v3956_v44 = vpop.f32.mrb[98].mxu1 }
 0x4e0   : > { %v3957_v17 = vpop.f32.mrb[99].mxu1 }
 0x4e1   : > { %v3958_v30 = vadd.f32 %v3957_v17, %v3956_v44  ;;  %v6265_v27 = vadd.f32 %v3955_v24, %v2603_v0 }
 0x4e3   : > { %v6267_v32 = vadd.f32 %v3958_v30, %v2604_v35 }
 0x4e5   : > { %v3959_v61 = vpop.f32.mrb[100].mxu1 }
 0x4e6   : > { %v3960_v46 = vpop.f32.mrb[101].mxu1 }
 0x4e7   : > { %v3961_v4 = vadd.f32 %v3960_v46, %v3959_v61  ;;  %v3962_v34 = vpop.f32.mrb[102].mxu1 }
 0x4e8   : > { %v3963_v10 = vpop.f32.mrb[103].mxu1 }
 0x4e9   : > { %v6270_v22 = vadd.f32 %v3963_v10, %v3962_v34  ;;  %v6272_v36 = vadd.f32 %v3961_v4, %v2605_v45 }
 0x4fb   : > { %v2971_v63 = vpop.permute.xlu0 %2970 }
 0x4fc   : > { %v3124_v57 = vmul.f32 %v2971_v63, %v6133_v51 }
 0x4fe   : > { %v3163_v9 = vadd.f32 %v6280_v54, %v3124_v57 }
 0x502   : > { %v2966_v48 = vpop.permute.xlu1 %2965 }
 0x503   : > { %v3123_v18 = vmul.f32 %v2966_v48, %v6127_v31 }
 0x505   : > { %v3162_v25 = vadd.f32 %v6280_v54, %v3123_v18 }
 0x506   : > { %v2976_v56 = vpop.permute.xlu1 %2975  ;;  %v2981_v12 = vpop.permute.xlu0 %2980 }
 0x507   : > { %v3647_v1 = vpack.c.bf16 %v3163_v9, %v3162_v25  ;;  %v3125_v29 = vmul.f32 %v2976_v56, %v6141_v7  ;;  %v3126_v62 = vmul.f32 %v2981_v12, %v6147_v23 }
 0x509   : > { %3648 = vst [vmem:[%s6288_s14] sm:$0xff] %v3647_v1   ;;  %v3164_v51 = vadd.f32 %v6280_v54, %v3125_v29  ;;  %v3165_v31 = vadd.f32 %v6280_v54, %v3126_v62 }
 0x50a   : > { %v2986_v47 = vpop.permute.xlu1 %2985  ;;  %v2991_v49 = vpop.permute.xlu0 %2990 }
 0x50b   : > { %v3652_v53 = vpack.c.bf16 %v3165_v31, %v3164_v51  ;;  %v3127_v21 = vmul.f32 %v2986_v47, %v6155_v39  ;;  %v3128_v19 = vmul.f32 %v2991_v49, %v6161_v15 }
 0x50d   : > { %3724 = vst [vmem:[%s6288_s14 + $0x8] sm:$0xff] %v3652_v53   ;;  %v3166_v7 = vadd.f32 %v6280_v54, %v3127_v21  ;;  %v3167_v23 = vadd.f32 %v6280_v54, %v3128_v19 }
 0x50e   : > { %v2996_v0 = vpop.permute.xlu1 %2995  ;;  %v3001_v24 = vpop.permute.xlu0 %3000 }
 0x50f   : > { %v3657_v44 = vpack.c.bf16 %v3167_v23, %v3166_v7  ;;  %v3129_v17 = vmul.f32 %v2996_v0, %v6169_v13  ;;  %v3130_v2 = vmul.f32 %v3001_v24, %v6175_v16 }
 0x511   : > { %3725 = vst [vmem:[%s6288_s14 + $0x10] sm:$0xff] %v3657_v44   ;;  %v3168_v35 = vadd.f32 %v6280_v54, %v3129_v17  ;;  %v3169_v39 = vadd.f32 %v6280_v54, %v3130_v2 }
 0x512   : > { %v3006_v15 = vpop.permute.xlu1 %3005  ;;  %v3011_v30 = vpop.permute.xlu0 %3010 }
 0x513   : > { %v3662_v61 = vpack.c.bf16 %v3169_v39, %v3168_v35  ;;  %v3131_v46 = vmul.f32 %v3006_v15, %v6183_v37  ;;  %v3132_v3 = vmul.f32 %v3011_v30, %v6189_v43 }
 0x515   : > { %3726 = vst [vmem:[%s6288_s14 + $0x18] sm:$0xff] %v3662_v61   ;;  %v3170_v45 = vadd.f32 %v6280_v54, %v3131_v46  ;;  %v3171_v13 = vadd.f32 %v6280_v54, %v3132_v3 }
 0x516   : > { %v3016_v16 = vpop.permute.xlu1 %3015  ;;  %v3021_v4 = vpop.permute.xlu0 %3020 }
 0x517   : > { %v3667_v34 = vpack.c.bf16 %v3171_v13, %v3170_v45  ;;  %v3133_v10 = vmul.f32 %v3016_v16, %v6197_v55  ;;  %v3134_v63 = vmul.f32 %v3021_v4, %v6203_v58 }
 0x519   : > { %3727 = vst [vmem:[%s6288_s14 + $0x20] sm:$0xff] %v3667_v34   ;;  %v3172_v57 = vadd.f32 %v6280_v54, %v3133_v10  ;;  %v3173_v37 = vadd.f32 %v6280_v54, %v3134_v63 }
 0x51a   : > { %v3026_v43 = vpop.permute.xlu1 %3025  ;;  %v3031_v48 = vpop.permute.xlu0 %3030 }
 0x51b   : > { %v3672_v18 = vpack.c.bf16 %v3173_v37, %v3172_v57  ;;  %v3135_v9 = vmul.f32 %v3026_v43, %v6211_v41  ;;  %v3136_v25 = vmul.f32 %v3031_v48, %v6216_v59 }
 0x51d   : > { %3728 = vst [vmem:[%s6288_s14 + $0x28] sm:$0xff] %v3672_v18   ;;  %v3174_v56 = vadd.f32 %v6280_v54, %v3135_v9  ;;  %v3175_v55 = vadd.f32 %v6280_v54, %v3136_v25  ;;  %v2606_v18 = vmul.f32 0.0, %v6274_v60 }
 0x51e   : > { %v3036_v58 = vpop.permute.xlu1 %3035  ;;  %v3041_v12 = vpop.permute.xlu0 %3040 }
 0x51f   : > { %v3677_v1 = vpack.c.bf16 %v3175_v55, %v3174_v56  ;;  %v3137_v29 = vmul.f32 %v3036_v58, %v6222_v50  ;;  %v3138_v62 = vmul.f32 %v3041_v12, %v6225_v6  ;;  %v2799_v55 = vadd.f32 %v6270_v22, %v2606_v18 }
 0x521   : > { %3729 = vst [vmem:[%s6288_s14 + $0x30] sm:$0xff] %v3677_v1   ;;  %v3176_v51 = vadd.f32 %v6280_v54, %v3137_v29  ;;  %v3177_v41 = vadd.f32 %v6280_v54, %v3138_v62 }
 0x522   : > { %v3046_v59 = vpop.permute.xlu1 %3045  ;;  %v3051_v31 = vpop.permute.xlu0 %3050 }
 0x523   : > { %v3682_v47 = vpack.c.bf16 %v3177_v41, %v3176_v51  ;;  %v3139_v49 = vmul.f32 %v3046_v59, %v6229_v11  ;;  %v3140_v53 = vmul.f32 %v3051_v31, %v6231_v20 }
 0x525   : > { %3730 = vst [vmem:[%s6288_s14 + $0x38] sm:$0xff] %v3682_v47   ;;  %v3178_v21 = vadd.f32 %v6280_v54, %v3139_v49  ;;  %v3179_v50 = vadd.f32 %v6280_v54, %v3140_v53 }
 0x526   : > { %v3056_v6 = vpop.permute.xlu1 %3055  ;;  %v3061_v19 = vpop.permute.xlu0 %3060 }
 0x527   : > { %v3687_v7 = vpack.c.bf16 %v3179_v50, %v3178_v21  ;;  %v3141_v23 = vmul.f32 %v3056_v6, %v6235_v5  ;;  %v3142_v0 = vmul.f32 %v3061_v19, %v6237_v26 }
 0x529   : > { %3731 = vst [vmem:[%s6288_s14 + $0x40] sm:$0xff] %v3687_v7   ;;  %v3180_v24 = vadd.f32 %v6280_v54, %v3141_v23  ;;  %v3181_v11 = vadd.f32 %v6280_v54, %v3142_v0 }
 0x52a   : > { %v3066_v20 = vpop.permute.xlu1 %3065  ;;  %v3071_v44 = vpop.permute.xlu0 %3070 }
 0x52b   : > { %v3692_v17 = vpack.c.bf16 %v3181_v11, %v3180_v24  ;;  %v3143_v2 = vmul.f32 %v3066_v20, %v6241_v14  ;;  %v3144_v35 = vmul.f32 %v3071_v44, %v6243_v42 }
 0x52d   : > { %3732 = vst [vmem:[%s6288_s14 + $0x48] sm:$0xff] %v3692_v17   ;;  %v3182_v39 = vadd.f32 %v6280_v54, %v3143_v2  ;;  %v3183_v5 = vadd.f32 %v6280_v54, %v3144_v35 }
 0x52e   : > { %v3076_v26 = vpop.permute.xlu1 %3075  ;;  %v3081_v15 = vpop.permute.xlu0 %3080 }
 0x52f   : > { %v3697_v30 = vpack.c.bf16 %v3183_v5, %v3182_v39  ;;  %v3145_v61 = vmul.f32 %v3076_v26, %v6247_v38  ;;  %v3146_v46 = vmul.f32 %v3081_v15, %v6249_v40 }
 0x531   : > { %3733 = vst [vmem:[%s6288_s14 + $0x50] sm:$0xff] %v3697_v30   ;;  %v3184_v3 = vadd.f32 %v6280_v54, %v3145_v61  ;;  %v3185_v14 = vadd.f32 %v6280_v54, %v3146_v46 }
 0x532   : > { %v3086_v42 = vpop.permute.xlu1 %3085  ;;  %v3091_v45 = vpop.permute.xlu0 %3090 }
 0x533   : > { %v3702_v13 = vpack.c.bf16 %v3185_v14, %v3184_v3  ;;  %v3147_v16 = vmul.f32 %v3086_v42, %v6253_v33  ;;  %v3148_v4 = vmul.f32 %v3091_v45, %v6255_v28 }
 0x535   : > { %3734 = vst [vmem:[%s6288_s14 + $0x58] sm:$0xff] %v3702_v13   ;;  %v3186_v34 = vadd.f32 %v6280_v54, %v3147_v16  ;;  %v3187_v38 = vadd.f32 %v6280_v54, %v3148_v4 }
 0x536   : > { %v3096_v40 = vpop.permute.xlu1 %3095  ;;  %v3101_v10 = vpop.permute.xlu0 %3100 }
 0x537   : > { %v3707_v63 = vpack.c.bf16 %v3187_v38, %v3186_v34  ;;  %v3149_v57 = vmul.f32 %v3096_v40, %v6259_v8  ;;  %v3150_v37 = vmul.f32 %v3101_v10, %v6261_v52 }
 0x539   : > { %3735 = vst [vmem:[%s6288_s14 + $0x60] sm:$0xff] %v3707_v63   ;;  %v3188_v43 = vadd.f32 %v6280_v54, %v3149_v57  ;;  %v3189_v33 = vadd.f32 %v6280_v54, %v3150_v37 }
 0x53a   : > { %v3106_v28 = vpop.permute.xlu1 %3105  ;;  %v3111_v48 = vpop.permute.xlu0 %3110 }
 0x53b   : > { %v3712_v9 = vpack.c.bf16 %v3189_v33, %v3188_v43  ;;  %v3151_v25 = vmul.f32 %v3106_v28, %v6265_v27  ;;  %v3152_v56 = vmul.f32 %v3111_v48, %v6267_v32 }
 0x53d   : > { %3736 = vst [vmem:[%s6288_s14 + $0x68] sm:$0xff] %v3712_v9   ;;  %v3190_v8 = vadd.f32 %v6280_v54, %v3151_v25  ;;  %v3191_v52 = vadd.f32 %v6280_v54, %v3152_v56 }
 0x53e   : > { %v3116_v58 = vpop.permute.xlu1 %3115  ;;  %v3121_v12 = vpop.permute.xlu0 %3120 }
 0x53f   : > { %v3717_v1 = vpack.c.bf16 %v3191_v52, %v3190_v8  ;;  %v3153_v60 = vmul.f32 %v3116_v58, %v6272_v36  ;;  %v3154_v29 = vmul.f32 %v3121_v12, %v2799_v55 }
 0x541   : > { %3737 = vst [vmem:[%s6288_s14 + $0x70] sm:$0xff] %v3717_v1   ;;  %v3192_v27 = vadd.f32 %v6280_v54, %v3153_v60  ;;  %v3193_v32 = vadd.f32 %v6280_v54, %v3154_v29 }
 0x543   : > { %v3722_v22 = vpack.c.bf16 %v3193_v32, %v3192_v27 }
 0x545   : > { %3738 = vst [vmem:[%s6288_s14 + $0x78] sm:$0xff] %v3722_v22  }
 0x546   : > { %4543 = shalt.err (!%p4540_p7)
}
 0x547   : > { %s4544_s9 = scalar_lea.hbm %s6369_s25, 2048  ;;  %s4548_s7 = scalar_lea.hbm %s6427_s6, 4096 }
 0x548   : > { %p4545_p12 = scmp.ne.s32.totalorder %s6369_s25, %s4544_s9  ;;  %p4549_p11 = scmp.lt.u32.totalorder %s6369_s25, %s6427_s6 }
 0x549   : > { %p4550_p13 = scmp.lt.u32.totalorder %s4548_s7, %s4544_s9  ;;  %p4552_p2 = scmp.lt.u32.totalorder %s4544_s9, %s6369_s25 }
 0x54a   : > { %p4546_p1 = pnand %p4545_p12, %p6719_p6 }
 0x54b   : > { %p4551_p0 = por %p4550_p13, %p4549_p11 }
 0x54c   : > { %p4547_p8 = pneg %p4546_p1 }
 0x54d   : > { %p4553_p10 = por %p4552_p2, %p4551_p0 }
 0x54f   : > { %p4554_p3 = pnand %p4553_p10, %p4547_p8 }
 0x551   : > { %4557 = shalt.err (!%p4554_p3)
}
 0x552   : > { %s4636_s27 = smov 64   ;;  %s4637_s29 = smov 4  }
 0x553   : > { %4089 = dma.vmem_to_hbm [thread:$0]  (%p6719_p6), %s6371_s8, 2048, %s6369_s25, %s3355_s28, %s4636_s27, %s4636_s27, %s4637_s29  }
 0x554 PF: > { %s3385_s10 = sand.u32 1, %s4604_s21   ;;  %p6720_p4 = scmp.ne.s32.totalorder %s6514_s30, 0 }
 0x555   : > { %p6721_p9 = scmp.ge.s32.totalorder %s4624_s26, 2  ;;  %s3386_s19 = scalar_lea.sflag [#allocation8], %s3385_s10 }
 0x557   : > { %p4106_p5 = pnand %p6721_p9, %p6720_p4 }
 0x559   : > { %4599 = dma.done.wait (!%p4106_p5), %s3386_s19, 2048  }
 0x55a   : > { %4601 = vsyncadd (!%p4106_p5), %s3386_s19, 4294965248  ;;  %s26_s26 = sadd.s32 1, %s4624_s26   ;;  %s6722_s14 = sld [smem:[#allocation20_spill]] }
 0x55b   : > { %p23_p7 = scmp.ge.s32.totalorder %s26_s26, 4   ;;  %s6723_s23 = sld [smem:[#allocation23_spill]] }
 0x55c   : > { %s6724_s24 = sld [smem:[#allocation21_spill]]  ;;  %s6725_s25 = sld [smem:[#allocation22_spill]] }
 0x55d   : > { %s6726_s21 = smov %s4608_s22  ;;  %25 = sbr.rel (!%p23_p7) target bundleno = 13 (0xd), region = 118 }
 0x560   : > { %s6727_s22 = smov %s6722_s14 }
 0x564   :  { %3391 = vsyncpa [#allocation7], 1 }
 0x565   :  { %3393 = vsyncpa [#allocation7 + $0x1], 1 }
 0x566   :  { %3394 = vsyncpa [#allocation10], 1 }
 0x567   :  { %3396 = vsyncpa [#allocation10 + $0x1], 1 }
 0x568   :  { %3397 = vsyncpa [#allocation13], 1 }
 0x569   :  { %3398 = vsyncpa [#allocation8], 1 }
 0x56a   :  { %3400 = vsyncpa [#allocation8 + $0x1], 1 }

</bundles_post_ra>
